<compile_context>
chip_gen: v5e
topology: v5e:2x2
jax: 0.10.0
libtpu: 0.0.40
codegen_flags: <defaults>
</compile_context>

<pallas_src>
import math

import jax
import jax.numpy as jnp
from jax.experimental import pallas as pl
from jax.experimental.pallas import tpu as pltpu  # noqa: F401  (TPU backend)

# ---- model hyper-parameters (small, consistent with the module's forward) ----
B, S, CIN = 2, 8, 4            # batch, sequence length, input feat dim
D_MODEL = 32                   # d_model
NUM_HEADS = 4                  # num_heads
HEAD_DIM = D_MODEL // NUM_HEADS
N_LAYERS = 2                   # encode_layers_num
D_FF = 2048                    # nn.TransformerEncoderLayer default dim_feedforward
FF_CHUNK = 1024                # D_FF tiling chunk (2 chunks; h1 stays in-register)
OUT_DIM = 1                    # output_dim
KSIZE = 3                      # kernel_size
LN_EPS = 1e-5                  # nn.LayerNorm default eps
BS = B * S

# ---- f32 vector-slab row layout ([NV_ROWS, D_MODEL]) ----
ROW_PE = 0                                    # BS rows of positional encoding
ROW_CONV_B = ROW_PE + BS                      # conv bias
ROW_LAYER0 = ROW_CONV_B + 1                   # first per-layer block
ROWS_PER_LAYER = 9
(OFF_BQ, OFF_BK, OFF_BV, OFF_BO,
 OFF_LN1G, OFF_LN1B, OFF_B2, OFF_LN2G, OFF_LN2B) = range(ROWS_PER_LAYER)
ROW_DEC_W = ROW_LAYER0 + N_LAYERS * ROWS_PER_LAYER
ROW_DEC_B = ROW_DEC_W + 1
NV_ROWS = ROW_DEC_B + 1                       # 37

# ---- bf16 weight-slab row layout ([NW_ROWS, D_MODEL]) ----
WROW_CONV = 0                                 # 16 rows reserved (KSIZE*CIN=12 used)
WROW_QKV = 16                                 # 3*N_LAYERS blocks of D_MODEL rows
WROW_WO = WROW_QKV + 3 * N_LAYERS * D_MODEL   # N_LAYERS blocks of D_MODEL rows
WROW_W2 = WROW_WO + N_LAYERS * D_MODEL        # N_LAYERS blocks of D_FF rows
NW_ROWS = WROW_W2 + N_LAYERS * D_FF           # 4368 (every block 16-row aligned)


def _layer_norm(v, g, b):
    """LayerNorm over the last dim, stats in f32."""
    mu = jnp.mean(v, axis=-1, keepdims=True)
    var = jnp.mean(jnp.square(v - mu), axis=-1, keepdims=True)
    return (v - mu) * jax.lax.rsqrt(var + LN_EPS) * g + b


# ------------------------- fused whole-forward kernel -------------------------
def fused_transformer_kernel(x_ref, w_ref, w1_ref, v_ref, b1_ref, o_ref):
    f32 = jnp.float32
    bf16 = jnp.bfloat16
    scale = 1.0 / math.sqrt(HEAD_DIM)

    def vrow(r):                               # [1, D_MODEL] f32 bias/gain row
        return v_ref[r:r + 1, :]

    # ---- causal Conv1d (im2col window built in wrapper) + positional enc ----
    wc = w_ref[WROW_CONV:WROW_CONV + KSIZE * CIN, :]          # [K*CIN, D] bf16
    x2 = jnp.dot(x_ref[...], wc, preferred_element_type=f32)  # [BS, D] f32
    x2 = x2 + vrow(ROW_CONV_B) + v_ref[ROW_PE:ROW_PE + BS, :]

    # ---- N x TransformerEncoderLayer (batch_first, post-norm, ReLU FFN) ----
    for l in range(N_LAYERS):                                 # static unroll
        lrow = ROW_LAYER0 + l * ROWS_PER_LAYER
        xb = x2.astype(bf16)

        # three separate lane-0-aligned projections; single bf16 cast each
        def proj(t, brow):
            r0 = WROW_QKV + (l * 3 + t) * D_MODEL
            w = w_ref[r0:r0 + D_MODEL, :]                     # [D, D] bf16
            return (jnp.dot(xb, w, preferred_element_type=f32)
                    + vrow(brow)).astype(bf16)
        q3 = proj(0, lrow + OFF_BQ).reshape(B, S, D_MODEL)
        k3 = proj(1, lrow + OFF_BK).reshape(B, S, D_MODEL)
        v3 = proj(2, lrow + OFF_BV).reshape(B, S, D_MODEL)

        # per-head attention (B-batched 3-D einsums), contexts concatenated
        # once along lanes -> single output projection with un-split w_o.
        ctx_heads = []
        for h in range(NUM_HEADS):
            sl = slice(h * HEAD_DIM, (h + 1) * HEAD_DIM)
            sc = jnp.einsum('bqe,bke->bqk', q3[:, :, sl], k3[:, :, sl],
                            preferred_element_type=f32) * scale
            sc = sc - jnp.max(sc, axis=-1, keepdims=True)
            p = jnp.exp(sc)
            p = p / jnp.sum(p, axis=-1, keepdims=True)        # exact softmax
            ctx = jnp.einsum('bqk,bke->bqe', p.astype(bf16), v3[:, :, sl],
                             preferred_element_type=f32)
            ctx_heads.append(ctx.reshape(BS, HEAD_DIM))
        ctx2 = jnp.concatenate(ctx_heads, axis=-1).astype(bf16)  # [BS, D]

        wo = w_ref[WROW_WO + l * D_MODEL:WROW_WO + (l + 1) * D_MODEL, :]
        attn2 = jnp.dot(ctx2, wo, preferred_element_type=f32) + vrow(lrow + OFF_BO)

        # residual + LayerNorm 1 (f32)
        y = _layer_norm(x2 + attn2, vrow(lrow + OFF_LN1G), vrow(lrow + OFF_LN1B))

        # feed-forward (ReLU), chunked over D_FF (2 chunks of 1024)
        yb = y.astype(bf16)
        acc = jnp.zeros((BS, D_MODEL), f32)
        for c in range(D_FF // FF_CHUNK):                      # static unroll (2)
            c0 = c * FF_CHUNK
            w1c = w1_ref[l * D_MODEL:(l + 1) * D_MODEL, c0:c0 + FF_CHUNK]
            b1c = b1_ref[l:l + 1, c0:c0 + FF_CHUNK]            # [1, FF_CHUNK]
            h1 = jnp.dot(yb, w1c, preferred_element_type=f32) + b1c
            h1 = jnp.maximum(h1, 0.0)
            r0 = WROW_W2 + l * D_FF + c0
            w2c = w_ref[r0:r0 + FF_CHUNK, :]                   # [FF_CHUNK, D] bf16
            acc = acc + jnp.dot(h1.astype(bf16), w2c, preferred_element_type=f32)
        ff = acc + vrow(lrow + OFF_B2)

        # residual + LayerNorm 2 (f32)
        x2 = _layer_norm(y + ff, vrow(lrow + OFF_LN2G), vrow(lrow + OFF_LN2B))

    # ---- decoder: Linear(d_model -> 1) as VPU mul + lane reduce, then exp ----
    dec_w = vrow(ROW_DEC_W)                                    # [1, D]
    dec = jnp.sum(x2 * dec_w, axis=-1, keepdims=True)          # [BS, 1]
    dec = dec + v_ref[ROW_DEC_B:ROW_DEC_B + 1, 0:1]            # scalar bias
    o_ref[...] = jnp.exp(dec)                                  # [BS, OUT_DIM]


# --------------------------------- wrapper ------------------------------------
def transformer_model(x, params):
    """x: [B, S, CIN] float32  ->  [B, S, OUT_DIM] float32."""
    # causal left-pad + im2col window are layout glue done in XLA; the whole
    # forward runs in ONE fused Pallas kernel with all operands resident in VMEM.
    x_pad = jnp.pad(x, ((0, 0), (KSIZE - 1, 0), (0, 0)))
    win = jnp.concatenate([x_pad[:, k:k + S, :] for k in range(KSIZE)], axis=-1)
    x_win = win.reshape(BS, KSIZE * CIN).astype(jnp.bfloat16)  # [BS, K*CIN]

    out2 = pl.pallas_call(
        fused_transformer_kernel,
        out_shape=jax.ShapeDtypeStruct((BS, OUT_DIM), jnp.float32),
    )(x_win, params['w_slab'], params['w1_slab'], params['v_slab'],
      params['b1_slab'])
    return out2.reshape(B, S, OUT_DIM)


transformer_model = jax.jit(transformer_model)


# ------------------------------ parameter init --------------------------------
def init_params(key):
    f32 = jnp.float32
    ks = iter(jax.random.split(key, 64))

    # CausalConv1d: torch weight [D, CIN, K], bias [D] -> im2col weight [K*CIN, D]
    bnd = 1.0 / math.sqrt(CIN * KSIZE)
    conv_w = jax.random.uniform(next(ks), (D_MODEL, CIN, KSIZE), f32, -bnd, bnd)
    conv_w_i2c = jnp.transpose(conv_w, (2, 1, 0)).reshape(KSIZE * CIN, D_MODEL)
    conv_b = jax.random.uniform(next(ks), (D_MODEL,), f32, -bnd, bnd)

    # traditional sinusoidal positional-encoding table (first S rows), tiled per batch
    pos = jnp.arange(S, dtype=f32)[:, None]
    div = jnp.exp(jnp.arange(0, D_MODEL, 2, dtype=f32) * (-math.log(10000.0) / D_MODEL))
    pe = jnp.zeros((S, D_MODEL), f32)
    pe = pe.at[:, 0::2].set(jnp.sin(pos * div))
    pe = pe.at[:, 1::2].set(jnp.cos(pos * div))
    pe_bs = jnp.tile(pe, (B, 1))                               # [BS, D]

    # slabs
    w_slab = jnp.zeros((NW_ROWS, D_MODEL), f32)
    w_slab = w_slab.at[WROW_CONV:WROW_CONV + KSIZE * CIN].set(conv_w_i2c)
    w1_slab = jnp.zeros((N_LAYERS * D_MODEL, D_FF), f32)
    b1_slab = jnp.zeros((N_LAYERS, D_FF), f32)
    v_slab = jnp.zeros((NV_ROWS, D_MODEL), f32)
    v_slab = v_slab.at[ROW_PE:ROW_PE + BS].set(pe_bs)
    v_slab = v_slab.at[ROW_CONV_B].set(conv_b)

    a = 1.0 / math.sqrt(D_MODEL)
    af = 1.0 / math.sqrt(D_FF)
    for l in range(N_LAYERS):
        lrow = ROW_LAYER0 + l * ROWS_PER_LAYER
        # NOTE: PyTorch MultiheadAttention uses xavier_uniform_ for in_proj;
        # uniform(+-1/sqrt(D)) is an init-fidelity difference only.
        in_proj = jax.random.uniform(next(ks), (3 * D_MODEL, D_MODEL), f32, -a, a)
        for t in range(3):                                     # Q, K, V ([D, D] each)
            r = WROW_QKV + (l * 3 + t) * D_MODEL
            w_slab = w_slab.at[r:r + D_MODEL].set(in_proj[t * D_MODEL:(t + 1) * D_MODEL].T)
        # in_proj_bias / out_proj.bias: torch inits to 0 -> v_slab rows stay zero
        wo = jax.random.uniform(next(ks), (D_MODEL, D_MODEL), f32, -a, a).T
        w_slab = w_slab.at[WROW_WO + l * D_MODEL:WROW_WO + (l + 1) * D_MODEL].set(wo)
        # FFN
        w1 = jax.random.uniform(next(ks), (D_FF, D_MODEL), f32, -a, a).T   # [D, D_FF]
        w1_slab = w1_slab.at[l * D_MODEL:(l + 1) * D_MODEL].set(w1)
        b1_slab = b1_slab.at[l].set(jax.random.uniform(next(ks), (D_FF,), f32, -a, a))
        w2 = jax.random.uniform(next(ks), (D_MODEL, D_FF), f32, -af, af).T  # [D_FF, D]
        w_slab = w_slab.at[WROW_W2 + l * D_FF:WROW_W2 + (l + 1) * D_FF].set(w2)
        v_slab = v_slab.at[lrow + OFF_B2].set(
            jax.random.uniform(next(ks), (D_MODEL,), f32, -af, af))
        # LayerNorm: gain 1, bias 0
        v_slab = v_slab.at[lrow + OFF_LN1G].set(jnp.ones((D_MODEL,), f32))
        v_slab = v_slab.at[lrow + OFF_LN2G].set(jnp.ones((D_MODEL,), f32))

    # decoder: init_weights() => weight.uniform_(-0.1, 0.1), bias zero
    dec_w = jax.random.uniform(next(ks), (OUT_DIM, D_MODEL), f32, -0.1, 0.1)
    v_slab = v_slab.at[ROW_DEC_W].set(dec_w[0])
    # ROW_DEC_B stays zero

    return {'w_slab': w_slab.astype(jnp.bfloat16),     # conv / qkv / wo / w2
            'w1_slab': w1_slab.astype(jnp.bfloat16),   # [L*D, D_FF]
            'v_slab': v_slab,                          # PE + all biases / gains
            'b1_slab': b1_slab}                        # [L, D_FF]


# ----------------------------------- main --------------------------------------
if __name__ == "__main__":
    key = jax.random.PRNGKey(0)
    k_in, k_par = jax.random.split(key)
    sample_tensor = jax.random.normal(k_in, (B, S, CIN), jnp.float32)
    params = init_params(k_par)

    out = transformer_model(sample_tensor, params)
    out = jax.block_until_ready(out)

    assert out.shape == (B, S, OUT_DIM)
    assert bool(jnp.all(jnp.isfinite(out)))
    assert bool(jnp.all(out > 0.0))  # exp() output must be positive
    # TODO(synk): dropout layers are identity here (eval-mode semantics).
    print("KERNEL_OK")
</pallas_src>

<mosaic_0001>
module attributes {stable_mosaic.version = 11 : i64} {
  func.func @fused_transformer_kernel(%arg0: memref<16x12xbf16, #tpu.memory_space<vmem>>, %arg1: memref<4368x32xbf16, #tpu.memory_space<vmem>>, %arg2: memref<64x2048xbf16, #tpu.memory_space<vmem>>, %arg3: memref<37x32xf32, #tpu.memory_space<vmem>>, %arg4: memref<2x2048xf32, #tpu.memory_space<vmem>>, %arg5: memref<16x1xf32, #tpu.memory_space<vmem>>) attributes {dimension_semantics = [], scalar_prefetch = 0 : i64, scratch_operands = 0 : i64, tpu.core_type = #tpu.core_type<tc>} {
    %c0 = arith.constant 0 : index
    %c0_0 = arith.constant 0 : index
    %0 = vector.load %arg1[%c0, %c0_0] : memref<4368x32xbf16, #tpu.memory_space<vmem>>, vector<12x32xbf16>
    %c0_1 = arith.constant 0 : index
    %c0_2 = arith.constant 0 : index
    %1 = vector.load %arg0[%c0_1, %c0_2] : memref<16x12xbf16, #tpu.memory_space<vmem>>, vector<16x12xbf16>
    %cst = arith.constant dense<0.000000e+00> : vector<16x32xf32>
    %2 = tpu.matmul %1, %0, %cst {dimension_numbers = #tpu.dot_dimension_numbers<[1], [0], [0], [1], [0, 0, 1, 1], [], []>} : vector<16x12xbf16>, vector<12x32xbf16>, vector<16x32xf32> -> vector<16x32xf32>
    %c16 = arith.constant 16 : index
    %c0_3 = arith.constant 0 : index
    %3 = vector.load %arg3[%c16, %c0_3] : memref<37x32xf32, #tpu.memory_space<vmem>>, vector<1x32xf32>
    %4 = vector.broadcast %3 : vector<1x32xf32> to vector<16x32xf32>
    %5 = arith.addf %2, %4 : vector<16x32xf32>
    %c0_4 = arith.constant 0 : index
    %c0_5 = arith.constant 0 : index
    %6 = vector.load %arg3[%c0_4, %c0_5] : memref<37x32xf32, #tpu.memory_space<vmem>>, vector<16x32xf32>
    %7 = arith.addf %5, %6 : vector<16x32xf32>
    %8 = arith.truncf %7 : vector<16x32xf32> to vector<16x32xbf16>
    %c16_6 = arith.constant 16 : index
    %c0_7 = arith.constant 0 : index
    %9 = vector.load %arg1[%c16_6, %c0_7] : memref<4368x32xbf16, #tpu.memory_space<vmem>>, vector<32x32xbf16>
    %cst_8 = arith.constant dense<0.000000e+00> : vector<16x32xf32>
    %10 = tpu.matmul %8, %9, %cst_8 {dimension_numbers = #tpu.dot_dimension_numbers<[1], [0], [0], [1], [0, 0, 1, 1], [], []>} : vector<16x32xbf16>, vector<32x32xbf16>, vector<16x32xf32> -> vector<16x32xf32>
    %c17 = arith.constant 17 : index
    %c0_9 = arith.constant 0 : index
    %11 = vector.load %arg3[%c17, %c0_9] : memref<37x32xf32, #tpu.memory_space<vmem>>, vector<1x32xf32>
    %12 = vector.broadcast %11 : vector<1x32xf32> to vector<16x32xf32>
    %13 = arith.addf %10, %12 : vector<16x32xf32>
    %14 = arith.truncf %13 : vector<16x32xf32> to vector<16x32xbf16>
    %15 = vector.shape_cast %14 : vector<16x32xbf16> to vector<2x8x32xbf16>
    %c48 = arith.constant 48 : index
    %c0_10 = arith.constant 0 : index
    %16 = vector.load %arg1[%c48, %c0_10] : memref<4368x32xbf16, #tpu.memory_space<vmem>>, vector<32x32xbf16>
    %cst_11 = arith.constant dense<0.000000e+00> : vector<16x32xf32>
    %17 = tpu.matmul %8, %16, %cst_11 {dimension_numbers = #tpu.dot_dimension_numbers<[1], [0], [0], [1], [0, 0, 1, 1], [], []>} : vector<16x32xbf16>, vector<32x32xbf16>, vector<16x32xf32> -> vector<16x32xf32>
    %c18 = arith.constant 18 : index
    %c0_12 = arith.constant 0 : index
    %18 = vector.load %arg3[%c18, %c0_12] : memref<37x32xf32, #tpu.memory_space<vmem>>, vector<1x32xf32>
    %19 = vector.broadcast %18 : vector<1x32xf32> to vector<16x32xf32>
    %20 = arith.addf %17, %19 : vector<16x32xf32>
    %21 = arith.truncf %20 : vector<16x32xf32> to vector<16x32xbf16>
    %22 = vector.shape_cast %21 : vector<16x32xbf16> to vector<2x8x32xbf16>
    %c80 = arith.constant 80 : index
    %c0_13 = arith.constant 0 : index
    %23 = vector.load %arg1[%c80, %c0_13] : memref<4368x32xbf16, #tpu.memory_space<vmem>>, vector<32x32xbf16>
    %cst_14 = arith.constant dense<0.000000e+00> : vector<16x32xf32>
    %24 = tpu.matmul %8, %23, %cst_14 {dimension_numbers = #tpu.dot_dimension_numbers<[1], [0], [0], [1], [0, 0, 1, 1], [], []>} : vector<16x32xbf16>, vector<32x32xbf16>, vector<16x32xf32> -> vector<16x32xf32>
    %c19 = arith.constant 19 : index
    %c0_15 = arith.constant 0 : index
    %25 = vector.load %arg3[%c19, %c0_15] : memref<37x32xf32, #tpu.memory_space<vmem>>, vector<1x32xf32>
    %26 = vector.broadcast %25 : vector<1x32xf32> to vector<16x32xf32>
    %27 = arith.addf %24, %26 : vector<16x32xf32>
    %28 = arith.truncf %27 : vector<16x32xf32> to vector<16x32xbf16>
    %29 = vector.shape_cast %28 : vector<16x32xbf16> to vector<2x8x32xbf16>
    %30 = vector.extract_strided_slice %15 {offsets = [0, 0, 0], sizes = [2, 8, 8], strides = [1, 1, 1]} : vector<2x8x32xbf16> to vector<2x8x8xbf16>
    %31 = vector.extract_strided_slice %22 {offsets = [0, 0, 0], sizes = [2, 8, 8], strides = [1, 1, 1]} : vector<2x8x32xbf16> to vector<2x8x8xbf16>
    "tpu.trace_start"() <{level = 10 : i32, message = "bqe,bke->bqk"}> : () -> ()
    %cst_16 = arith.constant dense<0.000000e+00> : vector<2x8x8xf32>
    %32 = tpu.matmul %30, %31, %cst_16 {dimension_numbers = #tpu.dot_dimension_numbers<[2], [2], [1], [1], [0, 0, 0, 1, 1, 1], [0], [0]>} : vector<2x8x8xbf16>, vector<2x8x8xbf16>, vector<2x8x8xf32> -> vector<2x8x8xf32>
    "tpu.trace_stop"() : () -> ()
    %cst_17 = arith.constant 0.353553385 : f32
    %33 = vector.broadcast %cst_17 : f32 to vector<2x8x8xf32>
    %34 = arith.mulf %32, %33 : vector<2x8x8xf32>
    %cst_18 = arith.constant dense<0xFF800000> : vector<2x8xf32>
    %35 = vector.multi_reduction <maximumf>, %34, %cst_18 [2] : vector<2x8x8xf32> to vector<2x8xf32>
    %36 = vector.shape_cast %35 : vector<2x8xf32> to vector<2x8x1xf32>
    %37 = vector.broadcast %36 : vector<2x8x1xf32> to vector<2x8x8xf32>
    %38 = arith.subf %34, %37 : vector<2x8x8xf32>
    %39 = math.exp %38 : vector<2x8x8xf32>
    %cst_19 = arith.constant dense<0.000000e+00> : vector<2x8xf32>
    %40 = vector.multi_reduction <add>, %39, %cst_19 [2] : vector<2x8x8xf32> to vector<2x8xf32>
    %41 = vector.shape_cast %40 : vector<2x8xf32> to vector<2x8x1xf32>
    %42 = vector.broadcast %41 : vector<2x8x1xf32> to vector<2x8x8xf32>
    %43 = arith.divf %39, %42 : vector<2x8x8xf32>
    %44 = arith.truncf %43 : vector<2x8x8xf32> to vector<2x8x8xbf16>
    %45 = vector.extract_strided_slice %29 {offsets = [0, 0, 0], sizes = [2, 8, 8], strides = [1, 1, 1]} : vector<2x8x32xbf16> to vector<2x8x8xbf16>
    "tpu.trace_start"() <{level = 10 : i32, message = "bqk,bke->bqe"}> : () -> ()
    %cst_20 = arith.constant dense<0.000000e+00> : vector<2x8x8xf32>
    %46 = tpu.matmul %44, %45, %cst_20 {dimension_numbers = #tpu.dot_dimension_numbers<[2], [1], [1], [2], [0, 0, 0, 1, 1, 2], [0], [0]>} : vector<2x8x8xbf16>, vector<2x8x8xbf16>, vector<2x8x8xf32> -> vector<2x8x8xf32>
    "tpu.trace_stop"() : () -> ()
    %47 = vector.shape_cast %46 : vector<2x8x8xf32> to vector<16x8xf32>
    %48 = vector.extract_strided_slice %15 {offsets = [0, 0, 8], sizes = [2, 8, 8], strides = [1, 1, 1]} : vector<2x8x32xbf16> to vector<2x8x8xbf16>
    %49 = vector.extract_strided_slice %22 {offsets = [0, 0, 8], sizes = [2, 8, 8], strides = [1, 1, 1]} : vector<2x8x32xbf16> to vector<2x8x8xbf16>
    "tpu.trace_start"() <{level = 10 : i32, message = "bqe,bke->bqk"}> : () -> ()
    %cst_21 = arith.constant dense<0.000000e+00> : vector<2x8x8xf32>
    %50 = tpu.matmul %48, %49, %cst_21 {dimension_numbers = #tpu.dot_dimension_numbers<[2], [2], [1], [1], [0, 0, 0, 1, 1, 1], [0], [0]>} : vector<2x8x8xbf16>, vector<2x8x8xbf16>, vector<2x8x8xf32> -> vector<2x8x8xf32>
    "tpu.trace_stop"() : () -> ()
    %cst_22 = arith.constant 0.353553385 : f32
    %51 = vector.broadcast %cst_22 : f32 to vector<2x8x8xf32>
    %52 = arith.mulf %50, %51 : vector<2x8x8xf32>
    %cst_23 = arith.constant dense<0xFF800000> : vector<2x8xf32>
    %53 = vector.multi_reduction <maximumf>, %52, %cst_23 [2] : vector<2x8x8xf32> to vector<2x8xf32>
    %54 = vector.shape_cast %53 : vector<2x8xf32> to vector<2x8x1xf32>
    %55 = vector.broadcast %54 : vector<2x8x1xf32> to vector<2x8x8xf32>
    %56 = arith.subf %52, %55 : vector<2x8x8xf32>
    %57 = math.exp %56 : vector<2x8x8xf32>
    %cst_24 = arith.constant dense<0.000000e+00> : vector<2x8xf32>
    %58 = vector.multi_reduction <add>, %57, %cst_24 [2] : vector<2x8x8xf32> to vector<2x8xf32>
    %59 = vector.shape_cast %58 : vector<2x8xf32> to vector<2x8x1xf32>
    %60 = vector.broadcast %59 : vector<2x8x1xf32> to vector<2x8x8xf32>
    %61 = arith.divf %57, %60 : vector<2x8x8xf32>
    %62 = arith.truncf %61 : vector<2x8x8xf32> to vector<2x8x8xbf16>
    %63 = vector.extract_strided_slice %29 {offsets = [0, 0, 8], sizes = [2, 8, 8], strides = [1, 1, 1]} : vector<2x8x32xbf16> to vector<2x8x8xbf16>
    "tpu.trace_start"() <{level = 10 : i32, message = "bqk,bke->bqe"}> : () -> ()
    %cst_25 = arith.constant dense<0.000000e+00> : vector<2x8x8xf32>
    %64 = tpu.matmul %62, %63, %cst_25 {dimension_numbers = #tpu.dot_dimension_numbers<[2], [1], [1], [2], [0, 0, 0, 1, 1, 2], [0], [0]>} : vector<2x8x8xbf16>, vector<2x8x8xbf16>, vector<2x8x8xf32> -> vector<2x8x8xf32>
    "tpu.trace_stop"() : () -> ()
    %65 = vector.shape_cast %64 : vector<2x8x8xf32> to vector<16x8xf32>
    %66 = vector.extract_strided_slice %15 {offsets = [0, 0, 16], sizes = [2, 8, 8], strides = [1, 1, 1]} : vector<2x8x32xbf16> to vector<2x8x8xbf16>
    %67 = vector.extract_strided_slice %22 {offsets = [0, 0, 16], sizes = [2, 8, 8], strides = [1, 1, 1]} : vector<2x8x32xbf16> to vector<2x8x8xbf16>
    "tpu.trace_start"() <{level = 10 : i32, message = "bqe,bke->bqk"}> : () -> ()
    %cst_26 = arith.constant dense<0.000000e+00> : vector<2x8x8xf32>
    %68 = tpu.matmul %66, %67, %cst_26 {dimension_numbers = #tpu.dot_dimension_numbers<[2], [2], [1], [1], [0, 0, 0, 1, 1, 1], [0], [0]>} : vector<2x8x8xbf16>, vector<2x8x8xbf16>, vector<2x8x8xf32> -> vector<2x8x8xf32>
    "tpu.trace_stop"() : () -> ()
    %cst_27 = arith.constant 0.353553385 : f32
    %69 = vector.broadcast %cst_27 : f32 to vector<2x8x8xf32>
    %70 = arith.mulf %68, %69 : vector<2x8x8xf32>
    %cst_28 = arith.constant dense<0xFF800000> : vector<2x8xf32>
    %71 = vector.multi_reduction <maximumf>, %70, %cst_28 [2] : vector<2x8x8xf32> to vector<2x8xf32>
    %72 = vector.shape_cast %71 : vector<2x8xf32> to vector<2x8x1xf32>
    %73 = vector.broadcast %72 : vector<2x8x1xf32> to vector<2x8x8xf32>
    %74 = arith.subf %70, %73 : vector<2x8x8xf32>
    %75 = math.exp %74 : vector<2x8x8xf32>
    %cst_29 = arith.constant dense<0.000000e+00> : vector<2x8xf32>
    %76 = vector.multi_reduction <add>, %75, %cst_29 [2] : vector<2x8x8xf32> to vector<2x8xf32>
    %77 = vector.shape_cast %76 : vector<2x8xf32> to vector<2x8x1xf32>
    %78 = vector.broadcast %77 : vector<2x8x1xf32> to vector<2x8x8xf32>
    %79 = arith.divf %75, %78 : vector<2x8x8xf32>
    %80 = arith.truncf %79 : vector<2x8x8xf32> to vector<2x8x8xbf16>
    %81 = vector.extract_strided_slice %29 {offsets = [0, 0, 16], sizes = [2, 8, 8], strides = [1, 1, 1]} : vector<2x8x32xbf16> to vector<2x8x8xbf16>
    "tpu.trace_start"() <{level = 10 : i32, message = "bqk,bke->bqe"}> : () -> ()
    %cst_30 = arith.constant dense<0.000000e+00> : vector<2x8x8xf32>
    %82 = tpu.matmul %80, %81, %cst_30 {dimension_numbers = #tpu.dot_dimension_numbers<[2], [1], [1], [2], [0, 0, 0, 1, 1, 2], [0], [0]>} : vector<2x8x8xbf16>, vector<2x8x8xbf16>, vector<2x8x8xf32> -> vector<2x8x8xf32>
    "tpu.trace_stop"() : () -> ()
    %83 = vector.shape_cast %82 : vector<2x8x8xf32> to vector<16x8xf32>
    %84 = vector.extract_strided_slice %15 {offsets = [0, 0, 24], sizes = [2, 8, 8], strides = [1, 1, 1]} : vector<2x8x32xbf16> to vector<2x8x8xbf16>
    %85 = vector.extract_strided_slice %22 {offsets = [0, 0, 24], sizes = [2, 8, 8], strides = [1, 1, 1]} : vector<2x8x32xbf16> to vector<2x8x8xbf16>
    "tpu.trace_start"() <{level = 10 : i32, message = "bqe,bke->bqk"}> : () -> ()
    %cst_31 = arith.constant dense<0.000000e+00> : vector<2x8x8xf32>
    %86 = tpu.matmul %84, %85, %cst_31 {dimension_numbers = #tpu.dot_dimension_numbers<[2], [2], [1], [1], [0, 0, 0, 1, 1, 1], [0], [0]>} : vector<2x8x8xbf16>, vector<2x8x8xbf16>, vector<2x8x8xf32> -> vector<2x8x8xf32>
    "tpu.trace_stop"() : () -> ()
    %cst_32 = arith.constant 0.353553385 : f32
    %87 = vector.broadcast %cst_32 : f32 to vector<2x8x8xf32>
    %88 = arith.mulf %86, %87 : vector<2x8x8xf32>
    %cst_33 = arith.constant dense<0xFF800000> : vector<2x8xf32>
    %89 = vector.multi_reduction <maximumf>, %88, %cst_33 [2] : vector<2x8x8xf32> to vector<2x8xf32>
    %90 = vector.shape_cast %89 : vector<2x8xf32> to vector<2x8x1xf32>
    %91 = vector.broadcast %90 : vector<2x8x1xf32> to vector<2x8x8xf32>
    %92 = arith.subf %88, %91 : vector<2x8x8xf32>
    %93 = math.exp %92 : vector<2x8x8xf32>
    %cst_34 = arith.constant dense<0.000000e+00> : vector<2x8xf32>
    %94 = vector.multi_reduction <add>, %93, %cst_34 [2] : vector<2x8x8xf32> to vector<2x8xf32>
    %95 = vector.shape_cast %94 : vector<2x8xf32> to vector<2x8x1xf32>
    %96 = vector.broadcast %95 : vector<2x8x1xf32> to vector<2x8x8xf32>
    %97 = arith.divf %93, %96 : vector<2x8x8xf32>
    %98 = arith.truncf %97 : vector<2x8x8xf32> to vector<2x8x8xbf16>
    %99 = vector.extract_strided_slice %29 {offsets = [0, 0, 24], sizes = [2, 8, 8], strides = [1, 1, 1]} : vector<2x8x32xbf16> to vector<2x8x8xbf16>
    "tpu.trace_start"() <{level = 10 : i32, message = "bqk,bke->bqe"}> : () -> ()
    %cst_35 = arith.constant dense<0.000000e+00> : vector<2x8x8xf32>
    %100 = tpu.matmul %98, %99, %cst_35 {dimension_numbers = #tpu.dot_dimension_numbers<[2], [1], [1], [2], [0, 0, 0, 1, 1, 2], [0], [0]>} : vector<2x8x8xbf16>, vector<2x8x8xbf16>, vector<2x8x8xf32> -> vector<2x8x8xf32>
    "tpu.trace_stop"() : () -> ()
    %101 = vector.shape_cast %100 : vector<2x8x8xf32> to vector<16x8xf32>
    %102 = tpu.concatenate %47, %65, %83, %101 in 1 : vector<16x8xf32>, vector<16x8xf32>, vector<16x8xf32>, vector<16x8xf32> -> vector<16x32xf32>
    %103 = arith.truncf %102 : vector<16x32xf32> to vector<16x32xbf16>
    %c208 = arith.constant 208 : index
    %c0_36 = arith.constant 0 : index
    %104 = vector.load %arg1[%c208, %c0_36] : memref<4368x32xbf16, #tpu.memory_space<vmem>>, vector<32x32xbf16>
    %cst_37 = arith.constant dense<0.000000e+00> : vector<16x32xf32>
    %105 = tpu.matmul %103, %104, %cst_37 {dimension_numbers = #tpu.dot_dimension_numbers<[1], [0], [0], [1], [0, 0, 1, 1], [], []>} : vector<16x32xbf16>, vector<32x32xbf16>, vector<16x32xf32> -> vector<16x32xf32>
    %c20 = arith.constant 20 : index
    %c0_38 = arith.constant 0 : index
    %106 = vector.load %arg3[%c20, %c0_38] : memref<37x32xf32, #tpu.memory_space<vmem>>, vector<1x32xf32>
    %107 = vector.broadcast %106 : vector<1x32xf32> to vector<16x32xf32>
    %108 = arith.addf %105, %107 : vector<16x32xf32>
    %109 = arith.addf %7, %108 : vector<16x32xf32>
    %c21 = arith.constant 21 : index
    %c0_39 = arith.constant 0 : index
    %110 = vector.load %arg3[%c21, %c0_39] : memref<37x32xf32, #tpu.memory_space<vmem>>, vector<1x32xf32>
    %c22 = arith.constant 22 : index
    %c0_40 = arith.constant 0 : index
    %111 = vector.load %arg3[%c22, %c0_40] : memref<37x32xf32, #tpu.memory_space<vmem>>, vector<1x32xf32>
    %cst_41 = arith.constant dense<0.000000e+00> : vector<16xf32>
    %112 = vector.multi_reduction <add>, %109, %cst_41 [1] : vector<16x32xf32> to vector<16xf32>
    %113 = vector.shape_cast %112 : vector<16xf32> to vector<16x1xf32>
    %cst_42 = arith.constant 3.200000e+01 : f32
    %114 = vector.broadcast %cst_42 : f32 to vector<16x1xf32>
    %115 = arith.divf %113, %114 : vector<16x1xf32>
    %116 = vector.broadcast %115 : vector<16x1xf32> to vector<16x32xf32>
    %117 = arith.subf %109, %116 : vector<16x32xf32>
    %118 = arith.mulf %117, %117 : vector<16x32xf32>
    %cst_43 = arith.constant dense<0.000000e+00> : vector<16xf32>
    %119 = vector.multi_reduction <add>, %118, %cst_43 [1] : vector<16x32xf32> to vector<16xf32>
    %120 = vector.shape_cast %119 : vector<16xf32> to vector<16x1xf32>
    %cst_44 = arith.constant 3.200000e+01 : f32
    %121 = vector.broadcast %cst_44 : f32 to vector<16x1xf32>
    %122 = arith.divf %120, %121 : vector<16x1xf32>
    %123 = vector.broadcast %115 : vector<16x1xf32> to vector<16x32xf32>
    %124 = arith.subf %109, %123 : vector<16x32xf32>
    %cst_45 = arith.constant 9.99999974E-6 : f32
    %125 = vector.broadcast %cst_45 : f32 to vector<16x1xf32>
    %126 = arith.addf %122, %125 : vector<16x1xf32>
    %127 = math.rsqrt %126 : vector<16x1xf32>
    %128 = vector.broadcast %127 : vector<16x1xf32> to vector<16x32xf32>
    %129 = arith.mulf %124, %128 : vector<16x32xf32>
    %130 = vector.broadcast %110 : vector<1x32xf32> to vector<16x32xf32>
    %131 = arith.mulf %129, %130 : vector<16x32xf32>
    %132 = vector.broadcast %111 : vector<1x32xf32> to vector<16x32xf32>
    %133 = arith.addf %131, %132 : vector<16x32xf32>
    %134 = arith.truncf %133 : vector<16x32xf32> to vector<16x32xbf16>
    %cst_46 = arith.constant 0.000000e+00 : f32
    %135 = vector.broadcast %cst_46 : f32 to vector<16x32xf32>
    %c0_47 = arith.constant 0 : index
    %c0_48 = arith.constant 0 : index
    %136 = vector.load %arg2[%c0_47, %c0_48] : memref<64x2048xbf16, #tpu.memory_space<vmem>>, vector<32x1024xbf16>
    %c0_49 = arith.constant 0 : index
    %c0_50 = arith.constant 0 : index
    %137 = vector.load %arg4[%c0_49, %c0_50] : memref<2x2048xf32, #tpu.memory_space<vmem>>, vector<1x1024xf32>
    %cst_51 = arith.constant dense<0.000000e+00> : vector<16x1024xf32>
    %138 = tpu.matmul %134, %136, %cst_51 {dimension_numbers = #tpu.dot_dimension_numbers<[1], [0], [0], [1], [0, 0, 1, 1], [], []>} : vector<16x32xbf16>, vector<32x1024xbf16>, vector<16x1024xf32> -> vector<16x1024xf32>
    %139 = vector.broadcast %137 : vector<1x1024xf32> to vector<16x1024xf32>
    %140 = arith.addf %138, %139 : vector<16x1024xf32>
    %cst_52 = arith.constant 0.000000e+00 : f32
    %141 = vector.broadcast %cst_52 : f32 to vector<16x1024xf32>
    %142 = arith.maximumf %140, %141 : vector<16x1024xf32>
    %c272 = arith.constant 272 : index
    %c0_53 = arith.constant 0 : index
    %143 = vector.load %arg1[%c272, %c0_53] : memref<4368x32xbf16, #tpu.memory_space<vmem>>, vector<1024x32xbf16>
    %144 = arith.truncf %142 : vector<16x1024xf32> to vector<16x1024xbf16>
    %cst_54 = arith.constant dense<0.000000e+00> : vector<16x32xf32>
    %145 = tpu.matmul %144, %143, %cst_54 {dimension_numbers = #tpu.dot_dimension_numbers<[1], [0], [0], [1], [0, 0, 1, 1], [], []>} : vector<16x1024xbf16>, vector<1024x32xbf16>, vector<16x32xf32> -> vector<16x32xf32>
    %146 = arith.addf %135, %145 : vector<16x32xf32>
    %c0_55 = arith.constant 0 : index
    %c1024 = arith.constant 1024 : index
    %147 = vector.load %arg2[%c0_55, %c1024] : memref<64x2048xbf16, #tpu.memory_space<vmem>>, vector<32x1024xbf16>
    %c0_56 = arith.constant 0 : index
    %c1024_57 = arith.constant 1024 : index
    %148 = vector.load %arg4[%c0_56, %c1024_57] : memref<2x2048xf32, #tpu.memory_space<vmem>>, vector<1x1024xf32>
    %cst_58 = arith.constant dense<0.000000e+00> : vector<16x1024xf32>
    %149 = tpu.matmul %134, %147, %cst_58 {dimension_numbers = #tpu.dot_dimension_numbers<[1], [0], [0], [1], [0, 0, 1, 1], [], []>} : vector<16x32xbf16>, vector<32x1024xbf16>, vector<16x1024xf32> -> vector<16x1024xf32>
    %150 = vector.broadcast %148 : vector<1x1024xf32> to vector<16x1024xf32>
    %151 = arith.addf %149, %150 : vector<16x1024xf32>
    %cst_59 = arith.constant 0.000000e+00 : f32
    %152 = vector.broadcast %cst_59 : f32 to vector<16x1024xf32>
    %153 = arith.maximumf %151, %152 : vector<16x1024xf32>
    %c1296 = arith.constant 1296 : index
    %c0_60 = arith.constant 0 : index
    %154 = vector.load %arg1[%c1296, %c0_60] : memref<4368x32xbf16, #tpu.memory_space<vmem>>, vector<1024x32xbf16>
    %155 = arith.truncf %153 : vector<16x1024xf32> to vector<16x1024xbf16>
    %cst_61 = arith.constant dense<0.000000e+00> : vector<16x32xf32>
    %156 = tpu.matmul %155, %154, %cst_61 {dimension_numbers = #tpu.dot_dimension_numbers<[1], [0], [0], [1], [0, 0, 1, 1], [], []>} : vector<16x1024xbf16>, vector<1024x32xbf16>, vector<16x32xf32> -> vector<16x32xf32>
    %157 = arith.addf %146, %156 : vector<16x32xf32>
    %c23 = arith.constant 23 : index
    %c0_62 = arith.constant 0 : index
    %158 = vector.load %arg3[%c23, %c0_62] : memref<37x32xf32, #tpu.memory_space<vmem>>, vector<1x32xf32>
    %159 = vector.broadcast %158 : vector<1x32xf32> to vector<16x32xf32>
    %160 = arith.addf %157, %159 : vector<16x32xf32>
    %161 = arith.addf %133, %160 : vector<16x32xf32>
    %c24 = arith.constant 24 : index
    %c0_63 = arith.constant 0 : index
    %162 = vector.load %arg3[%c24, %c0_63] : memref<37x32xf32, #tpu.memory_space<vmem>>, vector<1x32xf32>
    %c25 = arith.constant 25 : index
    %c0_64 = arith.constant 0 : index
    %163 = vector.load %arg3[%c25, %c0_64] : memref<37x32xf32, #tpu.memory_space<vmem>>, vector<1x32xf32>
    %cst_65 = arith.constant dense<0.000000e+00> : vector<16xf32>
    %164 = vector.multi_reduction <add>, %161, %cst_65 [1] : vector<16x32xf32> to vector<16xf32>
    %165 = vector.shape_cast %164 : vector<16xf32> to vector<16x1xf32>
    %cst_66 = arith.constant 3.200000e+01 : f32
    %166 = vector.broadcast %cst_66 : f32 to vector<16x1xf32>
    %167 = arith.divf %165, %166 : vector<16x1xf32>
    %168 = vector.broadcast %167 : vector<16x1xf32> to vector<16x32xf32>
    %169 = arith.subf %161, %168 : vector<16x32xf32>
    %170 = arith.mulf %169, %169 : vector<16x32xf32>
    %cst_67 = arith.constant dense<0.000000e+00> : vector<16xf32>
    %171 = vector.multi_reduction <add>, %170, %cst_67 [1] : vector<16x32xf32> to vector<16xf32>
    %172 = vector.shape_cast %171 : vector<16xf32> to vector<16x1xf32>
    %cst_68 = arith.constant 3.200000e+01 : f32
    %173 = vector.broadcast %cst_68 : f32 to vector<16x1xf32>
    %174 = arith.divf %172, %173 : vector<16x1xf32>
    %175 = vector.broadcast %167 : vector<16x1xf32> to vector<16x32xf32>
    %176 = arith.subf %161, %175 : vector<16x32xf32>
    %cst_69 = arith.constant 9.99999974E-6 : f32
    %177 = vector.broadcast %cst_69 : f32 to vector<16x1xf32>
    %178 = arith.addf %174, %177 : vector<16x1xf32>
    %179 = math.rsqrt %178 : vector<16x1xf32>
    %180 = vector.broadcast %179 : vector<16x1xf32> to vector<16x32xf32>
    %181 = arith.mulf %176, %180 : vector<16x32xf32>
    %182 = vector.broadcast %162 : vector<1x32xf32> to vector<16x32xf32>
    %183 = arith.mulf %181, %182 : vector<16x32xf32>
    %184 = vector.broadcast %163 : vector<1x32xf32> to vector<16x32xf32>
    %185 = arith.addf %183, %184 : vector<16x32xf32>
    %186 = arith.truncf %185 : vector<16x32xf32> to vector<16x32xbf16>
    %c112 = arith.constant 112 : index
    %c0_70 = arith.constant 0 : index
    %187 = vector.load %arg1[%c112, %c0_70] : memref<4368x32xbf16, #tpu.memory_space<vmem>>, vector<32x32xbf16>
    %cst_71 = arith.constant dense<0.000000e+00> : vector<16x32xf32>
    %188 = tpu.matmul %186, %187, %cst_71 {dimension_numbers = #tpu.dot_dimension_numbers<[1], [0], [0], [1], [0, 0, 1, 1], [], []>} : vector<16x32xbf16>, vector<32x32xbf16>, vector<16x32xf32> -> vector<16x32xf32>
    %c26 = arith.constant 26 : index
    %c0_72 = arith.constant 0 : index
    %189 = vector.load %arg3[%c26, %c0_72] : memref<37x32xf32, #tpu.memory_space<vmem>>, vector<1x32xf32>
    %190 = vector.broadcast %189 : vector<1x32xf32> to vector<16x32xf32>
    %191 = arith.addf %188, %190 : vector<16x32xf32>
    %192 = arith.truncf %191 : vector<16x32xf32> to vector<16x32xbf16>
    %193 = vector.shape_cast %192 : vector<16x32xbf16> to vector<2x8x32xbf16>
    %c144 = arith.constant 144 : index
    %c0_73 = arith.constant 0 : index
    %194 = vector.load %arg1[%c144, %c0_73] : memref<4368x32xbf16, #tpu.memory_space<vmem>>, vector<32x32xbf16>
    %cst_74 = arith.constant dense<0.000000e+00> : vector<16x32xf32>
    %195 = tpu.matmul %186, %194, %cst_74 {dimension_numbers = #tpu.dot_dimension_numbers<[1], [0], [0], [1], [0, 0, 1, 1], [], []>} : vector<16x32xbf16>, vector<32x32xbf16>, vector<16x32xf32> -> vector<16x32xf32>
    %c27 = arith.constant 27 : index
    %c0_75 = arith.constant 0 : index
    %196 = vector.load %arg3[%c27, %c0_75] : memref<37x32xf32, #tpu.memory_space<vmem>>, vector<1x32xf32>
    %197 = vector.broadcast %196 : vector<1x32xf32> to vector<16x32xf32>
    %198 = arith.addf %195, %197 : vector<16x32xf32>
    %199 = arith.truncf %198 : vector<16x32xf32> to vector<16x32xbf16>
    %200 = vector.shape_cast %199 : vector<16x32xbf16> to vector<2x8x32xbf16>
    %c176 = arith.constant 176 : index
    %c0_76 = arith.constant 0 : index
    %201 = vector.load %arg1[%c176, %c0_76] : memref<4368x32xbf16, #tpu.memory_space<vmem>>, vector<32x32xbf16>
    %cst_77 = arith.constant dense<0.000000e+00> : vector<16x32xf32>
    %202 = tpu.matmul %186, %201, %cst_77 {dimension_numbers = #tpu.dot_dimension_numbers<[1], [0], [0], [1], [0, 0, 1, 1], [], []>} : vector<16x32xbf16>, vector<32x32xbf16>, vector<16x32xf32> -> vector<16x32xf32>
    %c28 = arith.constant 28 : index
    %c0_78 = arith.constant 0 : index
    %203 = vector.load %arg3[%c28, %c0_78] : memref<37x32xf32, #tpu.memory_space<vmem>>, vector<1x32xf32>
    %204 = vector.broadcast %203 : vector<1x32xf32> to vector<16x32xf32>
    %205 = arith.addf %202, %204 : vector<16x32xf32>
    %206 = arith.truncf %205 : vector<16x32xf32> to vector<16x32xbf16>
    %207 = vector.shape_cast %206 : vector<16x32xbf16> to vector<2x8x32xbf16>
    %208 = vector.extract_strided_slice %193 {offsets = [0, 0, 0], sizes = [2, 8, 8], strides = [1, 1, 1]} : vector<2x8x32xbf16> to vector<2x8x8xbf16>
    %209 = vector.extract_strided_slice %200 {offsets = [0, 0, 0], sizes = [2, 8, 8], strides = [1, 1, 1]} : vector<2x8x32xbf16> to vector<2x8x8xbf16>
    "tpu.trace_start"() <{level = 10 : i32, message = "bqe,bke->bqk"}> : () -> ()
    %cst_79 = arith.constant dense<0.000000e+00> : vector<2x8x8xf32>
    %210 = tpu.matmul %208, %209, %cst_79 {dimension_numbers = #tpu.dot_dimension_numbers<[2], [2], [1], [1], [0, 0, 0, 1, 1, 1], [0], [0]>} : vector<2x8x8xbf16>, vector<2x8x8xbf16>, vector<2x8x8xf32> -> vector<2x8x8xf32>
    "tpu.trace_stop"() : () -> ()
    %cst_80 = arith.constant 0.353553385 : f32
    %211 = vector.broadcast %cst_80 : f32 to vector<2x8x8xf32>
    %212 = arith.mulf %210, %211 : vector<2x8x8xf32>
    %cst_81 = arith.constant dense<0xFF800000> : vector<2x8xf32>
    %213 = vector.multi_reduction <maximumf>, %212, %cst_81 [2] : vector<2x8x8xf32> to vector<2x8xf32>
    %214 = vector.shape_cast %213 : vector<2x8xf32> to vector<2x8x1xf32>
    %215 = vector.broadcast %214 : vector<2x8x1xf32> to vector<2x8x8xf32>
    %216 = arith.subf %212, %215 : vector<2x8x8xf32>
    %217 = math.exp %216 : vector<2x8x8xf32>
    %cst_82 = arith.constant dense<0.000000e+00> : vector<2x8xf32>
    %218 = vector.multi_reduction <add>, %217, %cst_82 [2] : vector<2x8x8xf32> to vector<2x8xf32>
    %219 = vector.shape_cast %218 : vector<2x8xf32> to vector<2x8x1xf32>
    %220 = vector.broadcast %219 : vector<2x8x1xf32> to vector<2x8x8xf32>
    %221 = arith.divf %217, %220 : vector<2x8x8xf32>
    %222 = arith.truncf %221 : vector<2x8x8xf32> to vector<2x8x8xbf16>
    %223 = vector.extract_strided_slice %207 {offsets = [0, 0, 0], sizes = [2, 8, 8], strides = [1, 1, 1]} : vector<2x8x32xbf16> to vector<2x8x8xbf16>
    "tpu.trace_start"() <{level = 10 : i32, message = "bqk,bke->bqe"}> : () -> ()
    %cst_83 = arith.constant dense<0.000000e+00> : vector<2x8x8xf32>
    %224 = tpu.matmul %222, %223, %cst_83 {dimension_numbers = #tpu.dot_dimension_numbers<[2], [1], [1], [2], [0, 0, 0, 1, 1, 2], [0], [0]>} : vector<2x8x8xbf16>, vector<2x8x8xbf16>, vector<2x8x8xf32> -> vector<2x8x8xf32>
    "tpu.trace_stop"() : () -> ()
    %225 = vector.shape_cast %224 : vector<2x8x8xf32> to vector<16x8xf32>
    %226 = vector.extract_strided_slice %193 {offsets = [0, 0, 8], sizes = [2, 8, 8], strides = [1, 1, 1]} : vector<2x8x32xbf16> to vector<2x8x8xbf16>
    %227 = vector.extract_strided_slice %200 {offsets = [0, 0, 8], sizes = [2, 8, 8], strides = [1, 1, 1]} : vector<2x8x32xbf16> to vector<2x8x8xbf16>
    "tpu.trace_start"() <{level = 10 : i32, message = "bqe,bke->bqk"}> : () -> ()
    %cst_84 = arith.constant dense<0.000000e+00> : vector<2x8x8xf32>
    %228 = tpu.matmul %226, %227, %cst_84 {dimension_numbers = #tpu.dot_dimension_numbers<[2], [2], [1], [1], [0, 0, 0, 1, 1, 1], [0], [0]>} : vector<2x8x8xbf16>, vector<2x8x8xbf16>, vector<2x8x8xf32> -> vector<2x8x8xf32>
    "tpu.trace_stop"() : () -> ()
    %cst_85 = arith.constant 0.353553385 : f32
    %229 = vector.broadcast %cst_85 : f32 to vector<2x8x8xf32>
    %230 = arith.mulf %228, %229 : vector<2x8x8xf32>
    %cst_86 = arith.constant dense<0xFF800000> : vector<2x8xf32>
    %231 = vector.multi_reduction <maximumf>, %230, %cst_86 [2] : vector<2x8x8xf32> to vector<2x8xf32>
    %232 = vector.shape_cast %231 : vector<2x8xf32> to vector<2x8x1xf32>
    %233 = vector.broadcast %232 : vector<2x8x1xf32> to vector<2x8x8xf32>
    %234 = arith.subf %230, %233 : vector<2x8x8xf32>
    %235 = math.exp %234 : vector<2x8x8xf32>
    %cst_87 = arith.constant dense<0.000000e+00> : vector<2x8xf32>
    %236 = vector.multi_reduction <add>, %235, %cst_87 [2] : vector<2x8x8xf32> to vector<2x8xf32>
    %237 = vector.shape_cast %236 : vector<2x8xf32> to vector<2x8x1xf32>
    %238 = vector.broadcast %237 : vector<2x8x1xf32> to vector<2x8x8xf32>
    %239 = arith.divf %235, %238 : vector<2x8x8xf32>
    %240 = arith.truncf %239 : vector<2x8x8xf32> to vector<2x8x8xbf16>
    %241 = vector.extract_strided_slice %207 {offsets = [0, 0, 8], sizes = [2, 8, 8], strides = [1, 1, 1]} : vector<2x8x32xbf16> to vector<2x8x8xbf16>
    "tpu.trace_start"() <{level = 10 : i32, message = "bqk,bke->bqe"}> : () -> ()
    %cst_88 = arith.constant dense<0.000000e+00> : vector<2x8x8xf32>
    %242 = tpu.matmul %240, %241, %cst_88 {dimension_numbers = #tpu.dot_dimension_numbers<[2], [1], [1], [2], [0, 0, 0, 1, 1, 2], [0], [0]>} : vector<2x8x8xbf16>, vector<2x8x8xbf16>, vector<2x8x8xf32> -> vector<2x8x8xf32>
    "tpu.trace_stop"() : () -> ()
    %243 = vector.shape_cast %242 : vector<2x8x8xf32> to vector<16x8xf32>
    %244 = vector.extract_strided_slice %193 {offsets = [0, 0, 16], sizes = [2, 8, 8], strides = [1, 1, 1]} : vector<2x8x32xbf16> to vector<2x8x8xbf16>
    %245 = vector.extract_strided_slice %200 {offsets = [0, 0, 16], sizes = [2, 8, 8], strides = [1, 1, 1]} : vector<2x8x32xbf16> to vector<2x8x8xbf16>
    "tpu.trace_start"() <{level = 10 : i32, message = "bqe,bke->bqk"}> : () -> ()
    %cst_89 = arith.constant dense<0.000000e+00> : vector<2x8x8xf32>
    %246 = tpu.matmul %244, %245, %cst_89 {dimension_numbers = #tpu.dot_dimension_numbers<[2], [2], [1], [1], [0, 0, 0, 1, 1, 1], [0], [0]>} : vector<2x8x8xbf16>, vector<2x8x8xbf16>, vector<2x8x8xf32> -> vector<2x8x8xf32>
    "tpu.trace_stop"() : () -> ()
    %cst_90 = arith.constant 0.353553385 : f32
    %247 = vector.broadcast %cst_90 : f32 to vector<2x8x8xf32>
    %248 = arith.mulf %246, %247 : vector<2x8x8xf32>
    %cst_91 = arith.constant dense<0xFF800000> : vector<2x8xf32>
    %249 = vector.multi_reduction <maximumf>, %248, %cst_91 [2] : vector<2x8x8xf32> to vector<2x8xf32>
    %250 = vector.shape_cast %249 : vector<2x8xf32> to vector<2x8x1xf32>
    %251 = vector.broadcast %250 : vector<2x8x1xf32> to vector<2x8x8xf32>
    %252 = arith.subf %248, %251 : vector<2x8x8xf32>
    %253 = math.exp %252 : vector<2x8x8xf32>
    %cst_92 = arith.constant dense<0.000000e+00> : vector<2x8xf32>
    %254 = vector.multi_reduction <add>, %253, %cst_92 [2] : vector<2x8x8xf32> to vector<2x8xf32>
    %255 = vector.shape_cast %254 : vector<2x8xf32> to vector<2x8x1xf32>
    %256 = vector.broadcast %255 : vector<2x8x1xf32> to vector<2x8x8xf32>
    %257 = arith.divf %253, %256 : vector<2x8x8xf32>
    %258 = arith.truncf %257 : vector<2x8x8xf32> to vector<2x8x8xbf16>
    %259 = vector.extract_strided_slice %207 {offsets = [0, 0, 16], sizes = [2, 8, 8], strides = [1, 1, 1]} : vector<2x8x32xbf16> to vector<2x8x8xbf16>
    "tpu.trace_start"() <{level = 10 : i32, message = "bqk,bke->bqe"}> : () -> ()
    %cst_93 = arith.constant dense<0.000000e+00> : vector<2x8x8xf32>
    %260 = tpu.matmul %258, %259, %cst_93 {dimension_numbers = #tpu.dot_dimension_numbers<[2], [1], [1], [2], [0, 0, 0, 1, 1, 2], [0], [0]>} : vector<2x8x8xbf16>, vector<2x8x8xbf16>, vector<2x8x8xf32> -> vector<2x8x8xf32>
    "tpu.trace_stop"() : () -> ()
    %261 = vector.shape_cast %260 : vector<2x8x8xf32> to vector<16x8xf32>
    %262 = vector.extract_strided_slice %193 {offsets = [0, 0, 24], sizes = [2, 8, 8], strides = [1, 1, 1]} : vector<2x8x32xbf16> to vector<2x8x8xbf16>
    %263 = vector.extract_strided_slice %200 {offsets = [0, 0, 24], sizes = [2, 8, 8], strides = [1, 1, 1]} : vector<2x8x32xbf16> to vector<2x8x8xbf16>
    "tpu.trace_start"() <{level = 10 : i32, message = "bqe,bke->bqk"}> : () -> ()
    %cst_94 = arith.constant dense<0.000000e+00> : vector<2x8x8xf32>
    %264 = tpu.matmul %262, %263, %cst_94 {dimension_numbers = #tpu.dot_dimension_numbers<[2], [2], [1], [1], [0, 0, 0, 1, 1, 1], [0], [0]>} : vector<2x8x8xbf16>, vector<2x8x8xbf16>, vector<2x8x8xf32> -> vector<2x8x8xf32>
    "tpu.trace_stop"() : () -> ()
    %cst_95 = arith.constant 0.353553385 : f32
    %265 = vector.broadcast %cst_95 : f32 to vector<2x8x8xf32>
    %266 = arith.mulf %264, %265 : vector<2x8x8xf32>
    %cst_96 = arith.constant dense<0xFF800000> : vector<2x8xf32>
    %267 = vector.multi_reduction <maximumf>, %266, %cst_96 [2] : vector<2x8x8xf32> to vector<2x8xf32>
    %268 = vector.shape_cast %267 : vector<2x8xf32> to vector<2x8x1xf32>
    %269 = vector.broadcast %268 : vector<2x8x1xf32> to vector<2x8x8xf32>
    %270 = arith.subf %266, %269 : vector<2x8x8xf32>
    %271 = math.exp %270 : vector<2x8x8xf32>
    %cst_97 = arith.constant dense<0.000000e+00> : vector<2x8xf32>
    %272 = vector.multi_reduction <add>, %271, %cst_97 [2] : vector<2x8x8xf32> to vector<2x8xf32>
    %273 = vector.shape_cast %272 : vector<2x8xf32> to vector<2x8x1xf32>
    %274 = vector.broadcast %273 : vector<2x8x1xf32> to vector<2x8x8xf32>
    %275 = arith.divf %271, %274 : vector<2x8x8xf32>
    %276 = arith.truncf %275 : vector<2x8x8xf32> to vector<2x8x8xbf16>
    %277 = vector.extract_strided_slice %207 {offsets = [0, 0, 24], sizes = [2, 8, 8], strides = [1, 1, 1]} : vector<2x8x32xbf16> to vector<2x8x8xbf16>
    "tpu.trace_start"() <{level = 10 : i32, message = "bqk,bke->bqe"}> : () -> ()
    %cst_98 = arith.constant dense<0.000000e+00> : vector<2x8x8xf32>
    %278 = tpu.matmul %276, %277, %cst_98 {dimension_numbers = #tpu.dot_dimension_numbers<[2], [1], [1], [2], [0, 0, 0, 1, 1, 2], [0], [0]>} : vector<2x8x8xbf16>, vector<2x8x8xbf16>, vector<2x8x8xf32> -> vector<2x8x8xf32>
    "tpu.trace_stop"() : () -> ()
    %279 = vector.shape_cast %278 : vector<2x8x8xf32> to vector<16x8xf32>
    %280 = tpu.concatenate %225, %243, %261, %279 in 1 : vector<16x8xf32>, vector<16x8xf32>, vector<16x8xf32>, vector<16x8xf32> -> vector<16x32xf32>
    %281 = arith.truncf %280 : vector<16x32xf32> to vector<16x32xbf16>
    %c240 = arith.constant 240 : index
    %c0_99 = arith.constant 0 : index
    %282 = vector.load %arg1[%c240, %c0_99] : memref<4368x32xbf16, #tpu.memory_space<vmem>>, vector<32x32xbf16>
    %cst_100 = arith.constant dense<0.000000e+00> : vector<16x32xf32>
    %283 = tpu.matmul %281, %282, %cst_100 {dimension_numbers = #tpu.dot_dimension_numbers<[1], [0], [0], [1], [0, 0, 1, 1], [], []>} : vector<16x32xbf16>, vector<32x32xbf16>, vector<16x32xf32> -> vector<16x32xf32>
    %c29 = arith.constant 29 : index
    %c0_101 = arith.constant 0 : index
    %284 = vector.load %arg3[%c29, %c0_101] : memref<37x32xf32, #tpu.memory_space<vmem>>, vector<1x32xf32>
    %285 = vector.broadcast %284 : vector<1x32xf32> to vector<16x32xf32>
    %286 = arith.addf %283, %285 : vector<16x32xf32>
    %287 = arith.addf %185, %286 : vector<16x32xf32>
    %c30 = arith.constant 30 : index
    %c0_102 = arith.constant 0 : index
    %288 = vector.load %arg3[%c30, %c0_102] : memref<37x32xf32, #tpu.memory_space<vmem>>, vector<1x32xf32>
    %c31 = arith.constant 31 : index
    %c0_103 = arith.constant 0 : index
    %289 = vector.load %arg3[%c31, %c0_103] : memref<37x32xf32, #tpu.memory_space<vmem>>, vector<1x32xf32>
    %cst_104 = arith.constant dense<0.000000e+00> : vector<16xf32>
    %290 = vector.multi_reduction <add>, %287, %cst_104 [1] : vector<16x32xf32> to vector<16xf32>
    %291 = vector.shape_cast %290 : vector<16xf32> to vector<16x1xf32>
    %cst_105 = arith.constant 3.200000e+01 : f32
    %292 = vector.broadcast %cst_105 : f32 to vector<16x1xf32>
    %293 = arith.divf %291, %292 : vector<16x1xf32>
    %294 = vector.broadcast %293 : vector<16x1xf32> to vector<16x32xf32>
    %295 = arith.subf %287, %294 : vector<16x32xf32>
    %296 = arith.mulf %295, %295 : vector<16x32xf32>
    %cst_106 = arith.constant dense<0.000000e+00> : vector<16xf32>
    %297 = vector.multi_reduction <add>, %296, %cst_106 [1] : vector<16x32xf32> to vector<16xf32>
    %298 = vector.shape_cast %297 : vector<16xf32> to vector<16x1xf32>
    %cst_107 = arith.constant 3.200000e+01 : f32
    %299 = vector.broadcast %cst_107 : f32 to vector<16x1xf32>
    %300 = arith.divf %298, %299 : vector<16x1xf32>
    %301 = vector.broadcast %293 : vector<16x1xf32> to vector<16x32xf32>
    %302 = arith.subf %287, %301 : vector<16x32xf32>
    %cst_108 = arith.constant 9.99999974E-6 : f32
    %303 = vector.broadcast %cst_108 : f32 to vector<16x1xf32>
    %304 = arith.addf %300, %303 : vector<16x1xf32>
    %305 = math.rsqrt %304 : vector<16x1xf32>
    %306 = vector.broadcast %305 : vector<16x1xf32> to vector<16x32xf32>
    %307 = arith.mulf %302, %306 : vector<16x32xf32>
    %308 = vector.broadcast %288 : vector<1x32xf32> to vector<16x32xf32>
    %309 = arith.mulf %307, %308 : vector<16x32xf32>
    %310 = vector.broadcast %289 : vector<1x32xf32> to vector<16x32xf32>
    %311 = arith.addf %309, %310 : vector<16x32xf32>
    %312 = arith.truncf %311 : vector<16x32xf32> to vector<16x32xbf16>
    %cst_109 = arith.constant 0.000000e+00 : f32
    %313 = vector.broadcast %cst_109 : f32 to vector<16x32xf32>
    %c32 = arith.constant 32 : index
    %c0_110 = arith.constant 0 : index
    %314 = vector.load %arg2[%c32, %c0_110] : memref<64x2048xbf16, #tpu.memory_space<vmem>>, vector<32x1024xbf16>
    %c1 = arith.constant 1 : index
    %c0_111 = arith.constant 0 : index
    %315 = vector.load %arg4[%c1, %c0_111] : memref<2x2048xf32, #tpu.memory_space<vmem>>, vector<1x1024xf32>
    %cst_112 = arith.constant dense<0.000000e+00> : vector<16x1024xf32>
    %316 = tpu.matmul %312, %314, %cst_112 {dimension_numbers = #tpu.dot_dimension_numbers<[1], [0], [0], [1], [0, 0, 1, 1], [], []>} : vector<16x32xbf16>, vector<32x1024xbf16>, vector<16x1024xf32> -> vector<16x1024xf32>
    %317 = vector.broadcast %315 : vector<1x1024xf32> to vector<16x1024xf32>
    %318 = arith.addf %316, %317 : vector<16x1024xf32>
    %cst_113 = arith.constant 0.000000e+00 : f32
    %319 = vector.broadcast %cst_113 : f32 to vector<16x1024xf32>
    %320 = arith.maximumf %318, %319 : vector<16x1024xf32>
    %c2320 = arith.constant 2320 : index
    %c0_114 = arith.constant 0 : index
    %321 = vector.load %arg1[%c2320, %c0_114] : memref<4368x32xbf16, #tpu.memory_space<vmem>>, vector<1024x32xbf16>
    %322 = arith.truncf %320 : vector<16x1024xf32> to vector<16x1024xbf16>
    %cst_115 = arith.constant dense<0.000000e+00> : vector<16x32xf32>
    %323 = tpu.matmul %322, %321, %cst_115 {dimension_numbers = #tpu.dot_dimension_numbers<[1], [0], [0], [1], [0, 0, 1, 1], [], []>} : vector<16x1024xbf16>, vector<1024x32xbf16>, vector<16x32xf32> -> vector<16x32xf32>
    %324 = arith.addf %313, %323 : vector<16x32xf32>
    %c32_116 = arith.constant 32 : index
    %c1024_117 = arith.constant 1024 : index
    %325 = vector.load %arg2[%c32_116, %c1024_117] : memref<64x2048xbf16, #tpu.memory_space<vmem>>, vector<32x1024xbf16>
    %c1_118 = arith.constant 1 : index
    %c1024_119 = arith.constant 1024 : index
    %326 = vector.load %arg4[%c1_118, %c1024_119] : memref<2x2048xf32, #tpu.memory_space<vmem>>, vector<1x1024xf32>
    %cst_120 = arith.constant dense<0.000000e+00> : vector<16x1024xf32>
    %327 = tpu.matmul %312, %325, %cst_120 {dimension_numbers = #tpu.dot_dimension_numbers<[1], [0], [0], [1], [0, 0, 1, 1], [], []>} : vector<16x32xbf16>, vector<32x1024xbf16>, vector<16x1024xf32> -> vector<16x1024xf32>
    %328 = vector.broadcast %326 : vector<1x1024xf32> to vector<16x1024xf32>
    %329 = arith.addf %327, %328 : vector<16x1024xf32>
    %cst_121 = arith.constant 0.000000e+00 : f32
    %330 = vector.broadcast %cst_121 : f32 to vector<16x1024xf32>
    %331 = arith.maximumf %329, %330 : vector<16x1024xf32>
    %c3344 = arith.constant 3344 : index
    %c0_122 = arith.constant 0 : index
    %332 = vector.load %arg1[%c3344, %c0_122] : memref<4368x32xbf16, #tpu.memory_space<vmem>>, vector<1024x32xbf16>
    %333 = arith.truncf %331 : vector<16x1024xf32> to vector<16x1024xbf16>
    %cst_123 = arith.constant dense<0.000000e+00> : vector<16x32xf32>
    %334 = tpu.matmul %333, %332, %cst_123 {dimension_numbers = #tpu.dot_dimension_numbers<[1], [0], [0], [1], [0, 0, 1, 1], [], []>} : vector<16x1024xbf16>, vector<1024x32xbf16>, vector<16x32xf32> -> vector<16x32xf32>
    %335 = arith.addf %324, %334 : vector<16x32xf32>
    %c32_124 = arith.constant 32 : index
    %c0_125 = arith.constant 0 : index
    %336 = vector.load %arg3[%c32_124, %c0_125] : memref<37x32xf32, #tpu.memory_space<vmem>>, vector<1x32xf32>
    %337 = vector.broadcast %336 : vector<1x32xf32> to vector<16x32xf32>
    %338 = arith.addf %335, %337 : vector<16x32xf32>
    %339 = arith.addf %311, %338 : vector<16x32xf32>
    %c33 = arith.constant 33 : index
    %c0_126 = arith.constant 0 : index
    %340 = vector.load %arg3[%c33, %c0_126] : memref<37x32xf32, #tpu.memory_space<vmem>>, vector<1x32xf32>
    %c34 = arith.constant 34 : index
    %c0_127 = arith.constant 0 : index
    %341 = vector.load %arg3[%c34, %c0_127] : memref<37x32xf32, #tpu.memory_space<vmem>>, vector<1x32xf32>
    %cst_128 = arith.constant dense<0.000000e+00> : vector<16xf32>
    %342 = vector.multi_reduction <add>, %339, %cst_128 [1] : vector<16x32xf32> to vector<16xf32>
    %343 = vector.shape_cast %342 : vector<16xf32> to vector<16x1xf32>
    %cst_129 = arith.constant 3.200000e+01 : f32
    %344 = vector.broadcast %cst_129 : f32 to vector<16x1xf32>
    %345 = arith.divf %343, %344 : vector<16x1xf32>
    %346 = vector.broadcast %345 : vector<16x1xf32> to vector<16x32xf32>
    %347 = arith.subf %339, %346 : vector<16x32xf32>
    %348 = arith.mulf %347, %347 : vector<16x32xf32>
    %cst_130 = arith.constant dense<0.000000e+00> : vector<16xf32>
    %349 = vector.multi_reduction <add>, %348, %cst_130 [1] : vector<16x32xf32> to vector<16xf32>
    %350 = vector.shape_cast %349 : vector<16xf32> to vector<16x1xf32>
    %cst_131 = arith.constant 3.200000e+01 : f32
    %351 = vector.broadcast %cst_131 : f32 to vector<16x1xf32>
    %352 = arith.divf %350, %351 : vector<16x1xf32>
    %353 = vector.broadcast %345 : vector<16x1xf32> to vector<16x32xf32>
    %354 = arith.subf %339, %353 : vector<16x32xf32>
    %cst_132 = arith.constant 9.99999974E-6 : f32
    %355 = vector.broadcast %cst_132 : f32 to vector<16x1xf32>
    %356 = arith.addf %352, %355 : vector<16x1xf32>
    %357 = math.rsqrt %356 : vector<16x1xf32>
    %358 = vector.broadcast %357 : vector<16x1xf32> to vector<16x32xf32>
    %359 = arith.mulf %354, %358 : vector<16x32xf32>
    %360 = vector.broadcast %340 : vector<1x32xf32> to vector<16x32xf32>
    %361 = arith.mulf %359, %360 : vector<16x32xf32>
    %362 = vector.broadcast %341 : vector<1x32xf32> to vector<16x32xf32>
    %363 = arith.addf %361, %362 : vector<16x32xf32>
    %c35 = arith.constant 35 : index
    %c0_133 = arith.constant 0 : index
    %364 = vector.load %arg3[%c35, %c0_133] : memref<37x32xf32, #tpu.memory_space<vmem>>, vector<1x32xf32>
    %365 = vector.broadcast %364 : vector<1x32xf32> to vector<16x32xf32>
    %366 = arith.mulf %363, %365 : vector<16x32xf32>
    %cst_134 = arith.constant dense<0.000000e+00> : vector<16xf32>
    %367 = vector.multi_reduction <add>, %366, %cst_134 [1] : vector<16x32xf32> to vector<16xf32>
    %368 = vector.shape_cast %367 : vector<16xf32> to vector<16x1xf32>
    %c36 = arith.constant 36 : index
    %c0_135 = arith.constant 0 : index
    %369 = vector.load %arg3[%c36, %c0_135] : memref<37x32xf32, #tpu.memory_space<vmem>>, vector<1x1xf32>
    %370 = vector.broadcast %369 : vector<1x1xf32> to vector<16x1xf32>
    %371 = arith.addf %368, %370 : vector<16x1xf32>
    %372 = math.exp %371 : vector<16x1xf32>
    %c0_136 = arith.constant 0 : index
    %c0_137 = arith.constant 0 : index
    %373 = vector.load %arg5[%c0_136, %c0_137] : memref<16x1xf32, #tpu.memory_space<vmem>>, vector<16x1xf32>
    tpu.vector_store %arg5[%c0_136, %c0_137], %372 {strides = array<i32>} : memref<16x1xf32, #tpu.memory_space<vmem>>, vector<16x1xf32>,
    return
  }
}

</mosaic_0001>

<bundles_post_ra>
// kernel: transformer_model.1
= control target key start
LH: loop header
LB: loop body
LE: loop exit
PB: predicated region body
PF: predicated region fallthrough
CT: control target
= control target key end

     0   :  { %vm41_vm0 = vcmask 1045504   ;;  %vm37_vm1 = vcmask 97280   ;;  %vm82_vm2 = vcmask 261120   ;;  %vm170_vm3 = vcmask 64512   ;;  %s7217_s22 = smov 120   ;;  %s7218_s23 = smov 112   ;;  %s9121_s1 = inlined_call_operand.vmem [shape: bf16[4368,32], index: 1, kind: input, shape index: {}]   ;;  %s9122_s0 = inlined_call_operand.vmem [shape: bf16[16,12], index: 0, kind: input, shape index: {}]   ;;  %s9123_s3 = inlined_call_operand.vmem [shape: f32[37,32], index: 3, kind: input, shape index: {}]   ;;  %s9124_s2 = inlined_call_operand.vmem [shape: bf16[64,2048], index: 2, kind: input, shape index: {}]   ;;  %s9125_s4 = inlined_call_operand.vmem [shape: f32[2,2048], index: 4, kind: input, shape index: {}]   ;;  %s9126_s5 = inlined_call_operand.vmem [shape: f32[16,1], index: 5, kind: output, shape index: {}]  }
   0x1   :  { %v5313_v0 = vld [vmem:[%s9121_s1] sm:$0xf]  ;;  %v6735_v1 = vld [vmem:[%s9121_s1] sm:$0x30]  ;;  %v6738_v5 = vld [vmem:[%s9121_s1 + $0x10] sm:$0xff]  ;;  %vm264_vm4 = vcmask 1043456  }
   0x2   :  { %v5314_v2 = vor.u32 %v6735_v1, %v5313_v0  ;;  %v6736_v4 = vld [vmem:[%s9122_s0] sm:$0xff]  ;;  %v6742_v7 = vld [vmem:[%s9121_s1 + $0x30] sm:$0xff]  ;;  %92 = vmatpush.bf16.msra.mxu1 %v6738_v5  ;;  %v6737_v8 = vld [vmem:[%s9121_s1 + $0x8] sm:$0xff]  ;;  %s7219_s24 = smov 104   ;;  %s7220_s25 = smov 8  }
   0x3   :  { %v6740_v6 = vld [vmem:[%s9121_s1 + $0x20] sm:$0xff]  ;;  %160 = vmatpush.bf16.msra.mxu3 %v6742_v7  ;;  %v6739_v9 = vld [vmem:[%s9121_s1 + $0x18] sm:$0xff]  ;;  %v6741_v10 = vld [vmem:[%s9121_s1 + $0x28] sm:$0xff]  ;;  %s7221_s26 = smov 16   ;;  %s7222_s27 = smov 24  }
   0x4   :  { %v43_v3 = vsel %vm41_vm0, %v5314_v2, 0  ;;  %126 = vmatpush.bf16.msra.mxu2 %v6740_v6  ;;  %v7110_v12 = vld [vmem:[%s9123_s3 + $0x10] ss:$0 sm:$0xff]  ;;  %v59_v14 = vld [vmem:[%s9123_s3] sm:$0xff]  ;;  %v60_v16 = vld [vmem:[%s9123_s3 + $0x8] sm:$0xff] }
   0x5   :  { %52 = vmatpush.bf16.msra.mxu0 %v43_v3  ;;  %v7111_v21 = vld [vmem:[%s9123_s3 + $0x11] ss:$0 sm:$0xff]  ;;  %v7112_v25 = vld [vmem:[%s9123_s3 + $0x12] ss:$0 sm:$0xff]  ;;  %v7113_v26 = vld [vmem:[%s9123_s3 + $0x13] ss:$0 sm:$0xff] }
   0x6   :  { %93 = vmatpush.bf16.msra.mxu1 %v6737_v8 }
   0x7   :  { %161 = vmatpush.bf16.msra.mxu3 %v6741_v10 }
   0x8   :  { %5315 = vmatmul.msk.bf16.vlgmr.msra.gmra.mxu0 %vm37_vm1, %v6736_v4  ;;  %127 = vmatpush.bf16.msra.mxu2 %v6739_v9 }
  0x85   :  { %v54_v11 = vpop.f32.mrf.mxu0 }
  0x86   :  { %v55_v13 = vadd.f32 %v7110_v12, %v54_v11 }
  0x88   :  { %v7290_v18 = vadd.f32 %v59_v14, %v55_v13 }
  0x8d   :  { %v56_v15 = vpop.f32.mrf.mxu0 }
  0x8e   :  { %v57_v17 = vadd.f32 %v7110_v12, %v56_v15 }
  0x90   :  { %v7292_v19 = vadd.f32 %v60_v16, %v57_v17 }
  0x92   :  { %v63_v20 = vpack.c.bf16 %v7292_v19, %v7290_v18 }
  0x94   :  { %5324 = vmatmul.msk.bf16.vlgmr.msra.gmra.mxu1 %vm82_vm2, %v63_v20  ;;  %5333 = vmatmul.msk.bf16.vlgmr.msra.gmra.mxu2 %vm82_vm2, %v63_v20 }
  0x95   :  { %5342 = vmatmul.msk.bf16.vlgmr.msra.gmra.mxu3 %vm82_vm2, %v63_v20 }
 0x111   :  { %v95_v22 = vpop.f32.mrf.mxu1 }
 0x112   :  { %v96_v23 = vadd.f32 %v7111_v21, %v95_v22 }
 0x114   :  { %v100_v24 = vpack.c.bf16 %v96_v23, %v96_v23 }
 0x116   :  { %v301_v27 = vunpack.c.l.b16 %v100_v24 }
 0x117   :  { %v129_v28 = vpop.f32.mrf.mxu2 }
 0x118   :  { %v302_v29 = vpack.c.b16 %v301_v27, %v301_v27  ;;  %v130_v30 = vadd.f32 %v7112_v25, %v129_v28  ;;  %v163_v31 = vpop.f32.mrf.mxu3 }
 0x119   :  { %v164_v32 = vadd.f32 %v7113_v26, %v163_v31  ;;  %v97_v33 = vpop.f32.mrf.mxu1 }
 0x11a   :  { %v134_v34 = vpack.c.bf16 %v130_v30, %v130_v30  ;;  %v98_v35 = vadd.f32 %v7111_v21, %v97_v33  ;;  %303 = vrot.lane.b32.xlu1 %v302_v29, %s7217_s22 }
 0x11b   :  { %v7309_v36 = vpack.c.bf16 %v164_v32, %v164_v32 }
 0x11c   :  { %v306_v37 = vunpack.c.l.b16 %v134_v34  ;;  %v101_v38 = vpack.c.bf16 %v98_v35, %v98_v35  ;;  %v175_v39 = vsel %vm170_vm3, %v134_v34, 0 }
 0x11d   :  { %184 = vmatpush.bf16.xpose.msrb.mxu0 %v175_v39  ;;  %v266_v40 = vsel %vm264_vm4, %v7309_v36, 0 }
 0x11e   :  { %v307_v41 = vpack.c.b16 %v306_v37, %v306_v37  ;;  %v330_v42 = vunpack.c.l.b16 %v101_v38  ;;  %275 = vmatpush.bf16.msrb.mxu2 %v266_v40 }
 0x11f   :  { %v131_v43 = vpop.f32.mrf.mxu2 }
 0x120   :  { %v132_v44 = vadd.f32 %v7112_v25, %v131_v43  ;;  %v165_v45 = vpop.f32.mrf.mxu3  ;;  %460 = vrot.lane.b32.xlu2 %v307_v41, %s7218_s23  ;;  %308 = vrot.lane.b32.xlu0 %v307_v41, %s7217_s22  ;;  %v331_v46 = vpack.c.b16 %v330_v42, %v330_v42 }
 0x121   :  { %v166_v47 = vadd.f32 %v7113_v26, %v165_v45 }
 0x122   :  { %v135_v48 = vpack.c.bf16 %v132_v44, %v132_v44  ;;  %332 = vrot.lane.b32.xlu1 %v331_v46, %s7217_s22 }
 0x123   :  { %v7317_v49 = vpack.c.bf16 %v166_v47, %v166_v47 }
 0x124   :  { %v335_v50 = vunpack.c.l.b16 %v135_v48  ;;  %5343 = vmatmul.msk.bf16.vlgmr.msrb.gmra.mxu0 %vm170_vm3, %v100_v24  ;;  %v194_v51 = vsel %vm170_vm3, %v135_v48, 0 }
 0x125   :  { %203 = vmatpush.bf16.xpose.msrb.mxu1 %v194_v51  ;;  %v285_v52 = vsel %vm264_vm4, %v7317_v49, 0 }
 0x126   :  { %294 = vmatpush.bf16.msrb.mxu3 %v285_v52  ;;  %v336_v53 = vpack.c.b16 %v335_v50, %v335_v50 }
 0x128   :  { %483 = vrot.lane.b32.xlu2 %v336_v53, %s7218_s23  ;;  %337 = vrot.lane.b32.xlu0 %v336_v53, %s7217_s22 }
 0x12a   :  { %481 = vrot.lane.b32.xlu1 %v331_v46, %s7218_s23 }
 0x12c   :  { %5344 = vmatmul.msk.bf16.vlgmr.msrb.gmra.mxu1 %vm170_vm3, %v101_v38 }
 0x130   :  { %600 = vrot.lane.b32.xlu2 %v307_v41, %s7219_s24  ;;  %458 = vrot.lane.b32.xlu0 %v302_v29, %s7218_s23 }
 0x132   :  { %598 = vrot.lane.b32.xlu1 %v302_v29, %s7219_s24 }
 0x138   :  { %621 = vrot.lane.b32.xlu2 %v331_v46, %s7219_s24  ;;  %623 = vrot.lane.b32.xlu0 %v336_v53, %s7219_s24  ;;  %v411_v53 = vunpack.c.l.b16 %v7309_v36 }
 0x17a   :  { %v461_v54 = vpop.permute.xlu2 %460 }
 0x17b   :  { %v466_v58 = vsel %vm170_vm3, %v461_v54, 0 }
 0x182   :  { %v484_v55 = vpop.permute.xlu2 %483 }
 0x183   :  { %v489_v0 = vsel %vm170_vm3, %v484_v55, 0  ;;  %v7367_v55 = vpack.c.b16 %v411_v53, %v411_v53 }
 0x18a   :  { %v601_v59 = vpop.permute.xlu2 %600 }
 0x18b   :  { %v606_v62 = vsel %vm170_vm3, %v601_v59, 0 }
 0x18c   :  { %v304_v60 = vpop.permute.xlu1 %303 }
 0x192   :  { %v309_v56 = vpop.permute.xlu0 %308  ;;  %v622_v15 = vpop.permute.xlu2 %621 }
 0x193   :  { %v314_v57 = vsel %vm170_vm3, %v309_v56, 0  ;;  %v435_v56 = vunpack.c.l.b16 %v7317_v49 }
 0x194   :  { %323 = vmatpush.bf16.xpose.msra.mxu0 %v314_v57  ;;  %v333_v2 = vpop.permute.xlu1 %332 }
 0x195   :  { %v7372_v57 = vpack.c.b16 %v435_v56, %v435_v56 }
 0x19a   :  { %v338_v61 = vpop.permute.xlu0 %337 }
 0x19b   :  { %v343_v63 = vsel %vm170_vm3, %v338_v61, 0  ;;  %5347 = vmatmul.msk.bf16.vlgmr.msra.gmra.mxu0 %vm170_vm3, %v304_v60 }
 0x19c   :  { %475 = vmatpush.bf16.xpose.msrb.mxu0 %v466_v58  ;;  %352 = vmatpush.bf16.xpose.msra.mxu1 %v343_v63  ;;  %v482_v12 = vpop.permute.xlu1 %481 }
 0x1a1   :  { %v186_v1 = vpop.f32.mrf.mxu0 }
 0x1a2   :  { %v209_v3 = vmul.f32 0.35355338, %v186_v1  ;;  %v459_v4 = vpop.permute.xlu0 %458 }
 0x1a3   :  { %5348 = vmatmul.msk.bf16.vlgmr.msra.gmra.mxu1 %vm170_vm3, %v333_v2 }
 0x1a4   :  { %615 = vmatpush.bf16.xpose.msra.mxu0 %v606_v62  ;;  %498 = vmatpush.bf16.xpose.msrb.mxu1 %v489_v0  ;;  %v211_v5 = vsel %vm170_vm3, %v209_v3, -inf  ;;  %v599_v14 = vpop.permute.xlu1 %598 }
 0x1a5   :  { %212 = vmax.xlane.f32.xlu0 %v211_v5 }
 0x1a9   :  { %v188_v6 = vpop.f32.mrf.mxu0  ;;  %v205_v7 = vpop.f32.mrf.mxu1 }
 0x1aa   :  { %v210_v8 = vmul.f32 0.35355338, %v205_v7  ;;  %v624_v9 = vpop.permute.xlu0 %623 }
 0x1ab   :  { %v629_v10 = vsel %vm170_vm3, %v624_v9, 0  ;;  %5351 = vmatmul.msk.bf16.vlgmr.msrb.gmra.mxu0 %vm170_vm3, %v459_v4 }
 0x1ac   :  { %638 = vmatpush.bf16.xpose.msra.mxu1 %v629_v10  ;;  %v214_v11 = vsel %vm170_vm3, %v210_v8, -inf }
 0x1ad   :  { %215 = vmax.xlane.f32.xlu1 %v214_v11 }
 0x1b1   :  { %v207_v13 = vpop.f32.mrf.mxu1 }
 0x1b3   :  { %5352 = vmatmul.msk.bf16.vlgmr.msrb.gmra.mxu1 %vm170_vm3, %v482_v12 }
 0x1bb   :  { %5355 = vmatmul.msk.bf16.vlgmr.msra.gmra.mxu0 %vm170_vm3, %v599_v14 }
 0x1c3   :  { %5356 = vmatmul.msk.bf16.vlgmr.msra.gmra.mxu1 %vm170_vm3, %v622_v15 }
 0x218   :  { %v213_v16 = vpop.xlane.xlu0 %212  ;;  %v325_v17 = vpop.f32.mrf.mxu0 }
 0x219   :  { %v217_v20 = vsub.f32 %v209_v3, %v213_v16  ;;  %v358_v21 = vmul.f32 0.35355338, %v325_v17 }
 0x21b   :  { %v219_v22 = vmul.f32 1.442695, %v217_v20  ;;  %v360_v23 = vsel %vm170_vm3, %v358_v21, -inf }
 0x21c   :  { %361 = vmax.xlane.f32.xlu2 %v360_v23 }
 0x21d   :  { %7131 = vpow2.f32 %v219_v22 }
 0x220   :  { %v354_v24 = vpop.f32.mrf.mxu1  ;;  %v216_v25 = vpop.xlane.xlu1 %215 }
 0x221   :  { %v359_v26 = vmul.f32 0.35355338, %v354_v24  ;;  %v218_v27 = vsub.f32 %v210_v8, %v216_v25  ;;  %v327_v28 = vpop.f32.mrf.mxu0 }
 0x223   :  { %v7347_v29 = vpop.eup %7131  ;;  %v221_v30 = vmul.f32 1.442695, %v218_v27  ;;  %v363_v31 = vsel %vm170_vm3, %v359_v26, -inf }
 0x224   :  { %364 = vmax.xlane.f32.xlu2 %v363_v31  ;;  %v223_v32 = vsel %vm170_vm3, %v7347_v29, 0.0 }
 0x225   :  { %7133 = vpow2.f32 %v221_v30  ;;  %224 = vadd.xlane.f32.xlu1 %v223_v32 }
 0x228   :  { %v356_v33 = vpop.f32.mrf.mxu1 }
 0x229   :  { %v477_v34 = vpop.f32.mrf.mxu0 }
 0x22a   :  { %v504_v35 = vmul.f32 0.35355338, %v477_v34 }
 0x22b   :  { %v7352_v37 = vpop.eup %7133 }
 0x22c   :  { %v506_v38 = vsel %vm170_vm3, %v504_v35, -inf  ;;  %v226_v39 = vsel %vm170_vm3, %v7352_v37, 0.0 }
 0x22d   :  { %507 = vmax.xlane.f32.xlu0 %v506_v38  ;;  %227 = vadd.xlane.f32.xlu2 %v226_v39 }
 0x230   :  { %v500_v40 = vpop.f32.mrf.mxu1 }
 0x231   :  { %v479_v41 = vpop.f32.mrf.mxu0  ;;  %v505_v42 = vmul.f32 0.35355338, %v500_v40 }
 0x233   :  { %v509_v43 = vsel %vm170_vm3, %v505_v42, -inf }
 0x234   :  { %510 = vmax.xlane.f32.xlu1 %v509_v43 }
 0x238   :  { %v502_v44 = vpop.f32.mrf.mxu1 }
 0x239   :  { %v617_v45 = vpop.f32.mrf.mxu0 }
 0x23a   :  { %v7358_v46 = vmul.f32 0.35355338, %v617_v45 }
 0x23c   :  { %v646_v47 = vsel %vm170_vm3, %v7358_v46, -inf }
 0x23d   :  { %647 = vmax.xlane.f32.xlu2 %v646_v47 }
 0x240   :  { %v640_v48 = vpop.f32.mrf.mxu1 }
 0x241   :  { %v619_v50 = vpop.f32.mrf.mxu0  ;;  %v7362_v51 = vmul.f32 0.35355338, %v640_v48 }
 0x243   :  { %v649_v52 = vsel %vm170_vm3, %v7362_v51, -inf }
 0x244   :  { %650 = vmax.xlane.f32.xlu0 %v649_v52 }
 0x248   :  { %v642_v54 = vpop.f32.mrf.mxu1 }
 0x24d   :  { %413 = vrot.lane.b32.xlu1 %v7367_v55, %s7217_s22 }
 0x255   :  { %437 = vrot.lane.b32.xlu2 %v7372_v57, %s7217_s22 }
 0x28f   :  { %v362_v58 = vpop.xlane.xlu2 %361 }
 0x290   :  { %v366_v59 = vsub.f32 %v358_v21, %v362_v58 }
 0x292   :  { %v368_v60 = vmul.f32 1.442695, %v366_v59 }
 0x294   :  { %7135 = vpow2.f32 %v368_v60 }
 0x297   :  { %v365_v61 = vpop.xlane.xlu2 %364 }
 0x298   :  { %v367_v62 = vsub.f32 %v359_v26, %v365_v61  ;;  %v225_v36 = vpop.xlane.xlu1 %224 }
 0x299   :  { %7137 = vrcp.f32 %v225_v36  ;;  %v240_v8 = vand.u32 2147483648, %v225_v36  ;;  %v238_v12 = vand.u32 2147483647, %v225_v36  ;;  %vm234_vm6 = vweird.f32 %v225_v36 }
 0x29a   :  { %v7376_v63 = vpop.eup %7135  ;;  %v370_v0 = vmul.f32 1.442695, %v367_v62 }
 0x29b   :  { %v372_v1 = vsel %vm170_vm3, %v7376_v63, 0.0  ;;  %v241_v15 = vor.u32 1.1754944e-38, %v240_v8  ;;  %vm239_vm8 = vcmp.eq.f32.partialorder %v238_v12, 8.507059e+37 }
 0x29c   :  { %7139 = vpow2.f32 %v370_v0  ;;  %373 = vadd.xlane.f32.xlu0 %v372_v1 }
 0x29f   :  { %v7138_v49 = vpop.eup %7137 }
 0x2a0   :  { %v230_v2 = vmul.f32 %v7138_v49, %v225_v36  ;;  %v508_v3 = vpop.xlane.xlu0 %507  ;;  %v228_v4 = vpop.xlane.xlu2 %227  ;;  %vm235_vm5 = vweird.f32 %v7138_v49 }
 0x2a1   :  { %v512_v5 = vsub.f32 %v504_v35, %v508_v3  ;;  %7141 = vrcp.f32 %v228_v4  ;;  %vm236_vm7 = vmor %vm234_vm6, %vm235_vm5  ;;  %v253_v27 = vand.u32 2147483647, %v228_v4  ;;  %v255_v28 = vand.u32 2147483648, %v228_v4 }
 0x2a2   :  { %v7380_v6 = vpop.eup %7139  ;;  %v231_v7 = vsub.f32 1.0, %v230_v2  ;;  %vm249_vm10 = vweird.f32 %v228_v4 }
 0x2a3   :  { %v514_v9 = vmul.f32 1.442695, %v512_v5  ;;  %v375_v10 = vsel %vm170_vm3, %v7380_v6, 0.0  ;;  %v256_v34 = vor.u32 1.1754944e-38, %v255_v28  ;;  %vm254_vm12 = vcmp.eq.f32.partialorder %v253_v27, 8.507059e+37 }
 0x2a4   :  { %v232_v11 = vmul.f32 %v7138_v49, %v231_v7  ;;  %376 = vadd.xlane.f32.xlu1 %v375_v10 }
 0x2a5   :  { %7143 = vpow2.f32 %v514_v9 }
 0x2a6   :  { %v233_v13 = vadd.f32 %v7138_v49, %v232_v11 }
 0x2a7   :  { %v7142_v14 = vpop.eup %7141  ;;  %v511_v16 = vpop.xlane.xlu1 %510 }
 0x2a8   :  { %v245_v17 = vmul.f32 %v7142_v14, %v228_v4  ;;  %v513_v20 = vsub.f32 %v505_v42, %v511_v16  ;;  %v237_v21 = vsel %vm236_vm7, %v7138_v49, %v233_v13  ;;  %vm250_vm9 = vweird.f32 %v7142_v14 }
 0x2a9   :  { %v242_v22 = vsel %vm239_vm8, %v241_v15, %v237_v21  ;;  %vm251_vm11 = vmor %vm249_vm10, %vm250_vm9 }
 0x2aa   :  { %v246_v23 = vsub.f32 1.0, %v245_v17  ;;  %v516_v24 = vmul.f32 1.442695, %v513_v20  ;;  %v243_v25 = vmul.f32 %v7347_v29, %v242_v22 }
 0x2ab   :  { %v7385_v26 = vpop.eup %7143 }
 0x2ac   :  { %v247_v30 = vmul.f32 %v7142_v14, %v246_v23  ;;  %7145 = vpow2.f32 %v516_v24  ;;  %v518_v31 = vsel %vm170_vm3, %v7385_v26, 0.0  ;;  %v259_v32 = vpack.c.bf16 %v243_v25, %v243_v25 }
 0x2ad   :  { %519 = vadd.xlane.f32.xlu2 %v518_v31 }
 0x2ae   :  { %v248_v33 = vadd.f32 %v7142_v14, %v247_v30  ;;  %5345 = vmatmul.msk.bf16.vlgmr.msrb.gmra.mxu2 %vm170_vm3, %v259_v32 }
 0x2b0   :  { %v648_v29 = vpop.xlane.xlu2 %647  ;;  %v252_v35 = vsel %vm251_vm11, %v7142_v14, %v248_v33 }
 0x2b1   :  { %v652_v38 = vsub.f32 %v7358_v46, %v648_v29  ;;  %v257_v39 = vsel %vm254_vm12, %v256_v34, %v252_v35 }
 0x2b2   :  { %v7391_v40 = vpop.eup %7145  ;;  %v258_v41 = vmul.f32 %v7352_v37, %v257_v39 }
 0x2b3   :  { %v654_v42 = vmul.f32 1.442695, %v652_v38  ;;  %v521_v43 = vsel %vm170_vm3, %v7391_v40, 0.0 }
 0x2b4   :  { %522 = vadd.xlane.f32.xlu0 %v521_v43  ;;  %v260_v44 = vpack.c.bf16 %v258_v41, %v258_v41 }
 0x2b5   :  { %7147 = vpow2.f32 %v654_v42 }
 0x2b6   :  { %5346 = vmatmul.msk.bf16.vlgmr.msrb.gmra.mxu3 %vm170_vm3, %v260_v44 }
 0x2b7   :  { %v651_v45 = vpop.xlane.xlu0 %650 }
 0x2b8   :  { %v653_v47 = vsub.f32 %v7362_v51, %v651_v45  ;;  %v438_v48 = vpop.permute.xlu2 %437 }
 0x2b9   :  { %v443_v46 = vsel %vm264_vm4, %v438_v48, 0 }
 0x2ba   :  { %v656_v50 = vmul.f32 1.442695, %v653_v47  ;;  %452 = vmatpush.bf16.msra.mxu3 %v443_v46 }
 0x2bb   :  { %v7399_v52 = vpop.eup %7147 }
 0x2bc   :  { %7149 = vpow2.f32 %v656_v50  ;;  %v658_v37 = vsel %vm170_vm3, %v7399_v52, 0.0 }
 0x2bd   :  { %659 = vadd.xlane.f32.xlu0 %v658_v37  ;;  %577 = vrot.lane.b32.xlu1 %v7372_v57, %s7218_s23 }
 0x2bf   :  { %v414_v53 = vpop.permute.xlu1 %413 }
 0x2c0   :  { %v419_v54 = vsel %vm264_vm4, %v414_v53, 0 }
 0x2c1   :  { %428 = vmatpush.bf16.msra.mxu2 %v419_v54 }
 0x2c2   :  { %v7406_v51 = vpop.eup %7149 }
 0x2c3   :  { %v661_v56 = vsel %vm170_vm3, %v7406_v51, 0.0 }
 0x2c5   :  { %696 = vrot.lane.b32.xlu2 %v7367_v55, %s7219_s24  ;;  %662 = vadd.xlane.f32.xlu0 %v661_v56 }
 0x2c6   :  { %717 = vrot.lane.b32.xlu1 %v7372_v57, %s7219_s24 }
 0x2d9   :  { %556 = vrot.lane.b32.xlu0 %v7367_v55, %s7218_s23 }
 0x30f   :  { %v374_v58 = vpop.xlane.xlu0 %373 }
 0x310   :  { %7151 = vrcp.f32 %v374_v58  ;;  %v389_v36 = vand.u32 2147483648, %v374_v58  ;;  %v387_v1 = vand.u32 2147483647, %v374_v58  ;;  %vm383_vm14 = vweird.f32 %v374_v58 }
 0x312   :  { %v390_v3 = vor.u32 1.1754944e-38, %v389_v36  ;;  %vm388_vm0 = vcmp.eq.f32.partialorder %v387_v1, 8.507059e+37 }
 0x316   :  { %v7152_v59 = vpop.eup %7151 }
 0x317   :  { %v379_v60 = vmul.f32 %v7152_v59, %v374_v58  ;;  %v377_v61 = vpop.xlane.xlu1 %376  ;;  %vm384_vm13 = vweird.f32 %v7152_v59 }
 0x318   :  { %7153 = vrcp.f32 %v377_v61  ;;  %vm385_vm15 = vmor %vm383_vm14, %vm384_vm13  ;;  %v404_v8 = vand.u32 2147483648, %v377_v61  ;;  %v402_v10 = vand.u32 2147483647, %v377_v61  ;;  %vm398_vm5 = vweird.f32 %v377_v61 }
 0x319   :  { %v380_v62 = vsub.f32 1.0, %v379_v60 }
 0x31a   :  { %v405_v13 = vor.u32 1.1754944e-38, %v404_v8  ;;  %vm403_vm7 = vcmp.eq.f32.partialorder %v402_v10, 8.507059e+37 }
 0x31b   :  { %v381_v0 = vmul.f32 %v7152_v59, %v380_v62 }
 0x31d   :  { %v382_v49 = vadd.f32 %v7152_v59, %v381_v0 }
 0x31e   :  { %v7154_v2 = vpop.eup %7153 }
 0x31f   :  { %v386_v57 = vsel %vm385_vm15, %v7152_v59, %v382_v49  ;;  %v394_v4 = vmul.f32 %v7154_v2, %v377_v61  ;;  %vm399_vm1 = vweird.f32 %v7154_v2 }
 0x320   :  { %v391_v55 = vsel %vm388_vm0, %v390_v3, %v386_v57  ;;  %vm400_vm6 = vmor %vm398_vm5, %vm399_vm1  ;;  %v520_v15 = vpop.xlane.xlu2 %519 }
 0x321   :  { %v392_v5 = vmul.f32 %v7376_v63, %v391_v55  ;;  %v395_v7 = vsub.f32 1.0, %v394_v4  ;;  %vm529_vm13 = vweird.f32 %v520_v15  ;;  %v533_v58 = vand.u32 2147483647, %v520_v15 }
 0x323   :  { %v396_v9 = vmul.f32 %v7154_v2, %v395_v7  ;;  %v408_v11 = vpack.c.bf16 %v392_v5, %v392_v5  ;;  %vm534_vm0 = vcmp.eq.f32.partialorder %v533_v58, 8.507059e+37 }
 0x325   :  { %v397_v12 = vadd.f32 %v7154_v2, %v396_v9  ;;  %5349 = vmatmul.msk.bf16.vlgmr.msra.gmra.mxu2 %vm170_vm3, %v408_v11 }
 0x327   :  { %v401_v14 = vsel %vm400_vm6, %v7154_v2, %v397_v12  ;;  %v523_v16 = vpop.xlane.xlu0 %522 }
 0x328   :  { %v406_v17 = vsel %vm403_vm7, %v405_v13, %v401_v14  ;;  %7155 = vrcp.f32 %v523_v16  ;;  %v550_v31 = vand.u32 2147483648, %v523_v16  ;;  %vm544_vm9 = vweird.f32 %v523_v16  ;;  %v697_v7 = vpop.permute.xlu2 %696 }
 0x329   :  { %v407_v63 = vmul.f32 %v7380_v6, %v406_v17  ;;  %7157 = vrcp.f32 %v520_v15  ;;  %v548_v6 = vand.u32 2147483647, %v523_v16  ;;  %v702_v13 = vsel %vm264_vm4, %v697_v7, 0 }
 0x32a   :  { %v551_v29 = vor.u32 1.1754944e-38, %v550_v31 }
 0x32b   :  { %v409_v20 = vpack.c.bf16 %v407_v63, %v407_v63  ;;  %vm549_vm11 = vcmp.eq.f32.partialorder %v548_v6, 8.507059e+37 }
 0x32d   :  { %5350 = vmatmul.msk.bf16.vlgmr.msra.gmra.mxu3 %vm170_vm3, %v409_v20 }
 0x32e   :  { %v7156_v21 = vpop.eup %7155 }
 0x32f   :  { %v540_v22 = vmul.f32 %v7156_v21, %v523_v16  ;;  %v578_v23 = vpop.permute.xlu1 %577  ;;  %v7158_v24 = vpop.eup %7157  ;;  %vm545_vm8 = vweird.f32 %v7156_v21 }
 0x330   :  { %v583_v25 = vsel %vm264_vm4, %v578_v23, 0  ;;  %v7421_v27 = vpop.xlane.xlu0 %659  ;;  %v525_v32 = vmul.f32 %v7158_v24, %v520_v15  ;;  %vm546_vm10 = vmor %vm544_vm9, %vm545_vm8  ;;  %vm530_vm12 = vweird.f32 %v7158_v24 }
 0x331   :  { %v541_v28 = vsub.f32 1.0, %v540_v22  ;;  %v7423_v30 = vpop.f32.mrf.mxu2  ;;  %592 = vmatpush.bf16.msrb.mxu3 %v583_v25  ;;  %vm531_vm14 = vmor %vm529_vm13, %vm530_vm12  ;;  %vm669_vm8 = vweird.f32 %v7421_v27  ;;  %vm767_vm12 = vcmask 195584  }
 0x332   :  { %v526_v35 = vsub.f32 1.0, %v525_v32 }
 0x333   :  { %v542_v33 = vmul.f32 %v7156_v21, %v541_v28 }
 0x334   :  { %v527_v48 = vmul.f32 %v7158_v24, %v526_v35 }
 0x335   :  { %v543_v34 = vadd.f32 %v7156_v21, %v542_v33 }
 0x336   :  { %v528_v37 = vadd.f32 %v7158_v24, %v527_v48 }
 0x337   :  { %v547_v38 = vsel %vm546_vm10, %v7156_v21, %v543_v34 }
 0x338   :  { %v552_v39 = vsel %vm549_vm11, %v551_v29, %v547_v38  ;;  %v718_v41 = vpop.permute.xlu1 %717  ;;  %v663_v42 = vpop.xlane.xlu0 %662  ;;  %v532_v60 = vsel %vm531_vm14, %v7158_v24, %v528_v37  ;;  %vm764_vm11 = vcmask 130048  }
 0x339   :  { %v553_v43 = vmul.f32 %v7391_v40, %v552_v39  ;;  %v723_v44 = vsel %vm264_vm4, %v718_v41, 0  ;;  %7159 = vrcp.f32 %v663_v42  ;;  %v279_v45 = vpop.f32.mrf.mxu2  ;;  %v7427_v47 = vpop.f32.mrf.mxu3  ;;  %v535_v40 = vand.u32 2147483648, %v520_v15  ;;  %v6744_v39 = vld [vmem:[%s9121_s1 + $0x70] sm:$0xff]  ;;  %v6743_v41 = vld [vmem:[%s9121_s1 + $0x68] sm:$0xff] }
 0x33a   :  { %732 = vmatpush.bf16.msra.mxu3 %v723_v44  ;;  %7161 = vrcp.f32 %v7421_v27  ;;  %v690_v61 = vand.u32 2147483648, %v663_v42  ;;  %v688_v0 = vand.u32 2147483647, %v663_v42  ;;  %vm684_vm1 = vweird.f32 %v663_v42  ;;  %798 = vmatpush.bf16.msrb.mxu0 %v6744_v39  ;;  %v5378_v39 = vld [vmem:[%s9124_s2 + $0x8] sm:$0xf] }
 0x33b   :  { %v555_v46 = vpack.c.bf16 %v553_v43, %v553_v43  ;;  %v536_v1 = vor.u32 1.1754944e-38, %v535_v40 }
 0x33c   :  { %v691_v3 = vor.u32 1.1754944e-38, %v690_v61  ;;  %vm689_vm6 = vcmp.eq.f32.partialorder %v688_v0, 8.507059e+37 }
 0x33d   :  { %5354 = vmatmul.msk.bf16.vlgmr.msrb.gmra.mxu3 %vm170_vm3, %v555_v46  ;;  %v537_v2 = vsel %vm534_vm0, %v536_v1, %v532_v60 }
 0x33e   :  { %v538_v5 = vmul.f32 %v7385_v26, %v537_v2  ;;  %v675_v26 = vand.u32 2147483648, %v7421_v27  ;;  %799 = vmatpush.bf16.msrb.mxu0 %v6743_v41 }
 0x33f   :  { %v7160_v50 = vpop.eup %7159 }
 0x340   :  { %v680_v53 = vmul.f32 %v7160_v50, %v663_v42  ;;  %v7162_v54 = vpop.eup %7161  ;;  %vm685_vm15 = vweird.f32 %v7160_v50  ;;  %v554_v14 = vpack.c.bf16 %v538_v5, %v538_v5  ;;  %v676_v17 = vor.u32 1.1754944e-38, %v675_v26 }
 0x341   :  { %v298_v56 = vpop.f32.mrf.mxu3  ;;  %v665_v62 = vmul.f32 %v7162_v54, %v7421_v27  ;;  %vm686_vm5 = vmor %vm684_vm1, %vm685_vm15  ;;  %vm670_vm7 = vweird.f32 %v7162_v54 }
 0x342   :  { %v681_v59 = vsub.f32 1.0, %v680_v53  ;;  %vm671_vm9 = vmor %vm669_vm8, %vm670_vm7 }
 0x343   :  { %v666_v57 = vsub.f32 1.0, %v665_v62 }
 0x344   :  { %v682_v36 = vmul.f32 %v7160_v50, %v681_v59 }
 0x345   :  { %v667_v10 = vmul.f32 %v7162_v54, %v666_v57  ;;  %v7223_v57 = vmov 32.0  }
 0x346   :  { %v683_v49 = vadd.f32 %v7160_v50, %v682_v36  ;;  %7163 = vrcp.f32 %v7223_v57 }
 0x347   :  { %v668_v15 = vadd.f32 %v7162_v54, %v667_v10 }
 0x348   :  { %v687_v4 = vsel %vm686_vm5, %v7160_v50, %v683_v49 }
 0x349   :  { %v692_v55 = vsel %vm689_vm6, %v691_v3, %v687_v4  ;;  %v672_v16 = vsel %vm671_vm9, %v7162_v54, %v668_v15 }
 0x34a   :  { %v693_v8 = vmul.f32 %v7406_v51, %v692_v55  ;;  %v673_v51 = vand.u32 2147483647, %v7421_v27 }
 0x34b   :  { %v557_v9 = vpop.permute.xlu0 %556 }
 0x34c   :  { %v562_v11 = vsel %vm264_vm4, %v557_v9, 0  ;;  %v695_v12 = vpack.c.bf16 %v693_v8, %v693_v8  ;;  %vm674_vm10 = vcmp.eq.f32.partialorder %v673_v51, 8.507059e+37  ;;  %v7164_v4 = vpop.eup %7163 }
 0x34d   :  { %571 = vmatpush.bf16.msrb.mxu2 %v562_v11  ;;  %v677_v63 = vsel %vm674_vm10, %v676_v17, %v672_v16  ;;  %v817_v55 = vmul.f32 32.0, %v7164_v4  ;;  %vm821_vm13 = vweird.f32 %v7164_v4  ;;  %v5402_v16 = vld [vmem:[%s9124_s2 + $0x80] sm:$0xf] }
 0x34e   :  { %5358 = vmatmul.msk.bf16.vlgmr.msra.gmra.mxu3 %vm170_vm3, %v695_v12  ;;  %v678_v20 = vmul.f32 %v7399_v52, %v677_v63  ;;  %v6757_v17 = vld [vmem:[%s9124_s2 + $0xbc] sm:$0xf0]  ;;  %v6753_v63 = vld [vmem:[%s9124_s2 + $0x84] sm:$0xf] }
 0x34f   :  { %v818_v5 = vsub.f32 1.0, %v817_v55  ;;  %v5394_v55 = vld [vmem:[%s9124_s2 + $0x18] sm:$0xf] }
 0x350   :  { %5353 = vmatmul.msk.bf16.vlgmr.msrb.gmra.mxu2 %vm170_vm3, %v554_v14  ;;  %v694_v21 = vpack.c.bf16 %v678_v20, %v678_v20  ;;  %v5403_v20 = vor.u32 %v6757_v17, %v5402_v16 }
 0x351   :  { %711 = vmatpush.bf16.msra.mxu2 %v702_v13  ;;  %v819_v7 = vmul.f32 %v7164_v4, %v818_v5  ;;  %v6752_v5 = vld [vmem:[%s9124_s2 + $0x54] sm:$0xf0] }
 0x352   :  { %991 = vmatpush.bf16.msrb.mxu1 %v5403_v20 }
 0x353   :  { %v820_v8 = vadd.f32 %v7164_v4, %v819_v7 }
 0x355   :  { %v7468_v9 = vsel %vm821_vm13, %v7164_v4, %v820_v8  ;;  %v5388_v4 = vld [vmem:[%s9124_s2 + $0x50] sm:$0xf0]  ;;  %v5395_v8 = vor.u32 %v6752_v5, %v5394_v55  ;;  %v6831_v55 = vld [vmem:[%s9124_s2 + $0x6c] sm:$0xf0] }
 0x360   :  { %5357 = vmatmul.msk.bf16.vlgmr.msra.gmra.mxu2 %vm170_vm3, %v694_v21  ;;  %v5404_v21 = vld [vmem:[%s9124_s2 + $0xc0] sm:$0xf0] }
 0x3a8   :  { %v430_v22 = vpop.f32.mrf.mxu2 }
 0x3b0   :  { %v432_v23 = vpop.f32.mrf.mxu2  ;;  %v454_v24 = vpop.f32.mrf.mxu3 }
 0x3b1   :  { %v7080_v25 = vpack.i.bf16 %v454_v24, %v430_v22  ;;  %v5410_v22 = vld [vmem:[%s9124_s2 + $0x88] sm:$0xf] }
 0x3b2   :  { %v6758_v23 = vld [vmem:[%s9124_s2 + $0xc4] sm:$0xf0] }
 0x3b3   :  { %7081 = vrot.lane.b32.xlu2 %v7080_v25, %s7220_s25  ;;  %v5407_v25 = vor.u32 %v6753_v63, %v5404_v21 }
 0x3b5   :  { %1005 = vmatpush.bf16.msrb.mxu2 %v5407_v25 }
 0x3b8   :  { %v456_v28 = vpop.f32.mrf.mxu3 }
 0x3b9   :  { %v5411_v28 = vor.u32 %v6758_v23, %v5410_v22  ;;  %v7115_v22 = vld [vmem:[%s9123_s3 + $0x15] ss:$0 sm:$0xff] }
 0x3bb   :  { %1019 = vmatpush.bf16.msrb.mxu3 %v5411_v28  ;;  %v7116_v28 = vld [vmem:[%s9123_s3 + $0x16] ss:$0 sm:$0xff] }
 0x3c0   :  { %v594_v31 = vpop.f32.mrf.mxu3 }
 0x3c8   :  { %v596_v27 = vpop.f32.mrf.mxu3 }
 0x3c9   :  { %v5412_v27 = vld [vmem:[%s9124_s2 + $0xc8] sm:$0xf0] }
 0x3d1   :  { %v734_v32 = vpop.f32.mrf.mxu3 }
 0x3d3   :  { %v573_v33 = vpop.f32.mrf.mxu2 }
 0x3d4   :  { %v7085_v6 = vpack.i.bf16 %v594_v31, %v573_v33  ;;  %v6754_v31 = vld [vmem:[%s9124_s2 + $0x8c] sm:$0xf] }
 0x3d5   :  { %v5415_v33 = vor.u32 %v6754_v31, %v5412_v27 }
 0x3d6   :  { %7086 = vrot.lane.b32.xlu1 %v7085_v6, %s7221_s26  ;;  %v5370_v6 = vld [vmem:[%s9124_s2] sm:$0xf] }
 0x3d7   :  { %1033 = vmatpush.bf16.msra.mxu0 %v5415_v33  ;;  %v5475_v33 = vld [vmem:[%s9124_s2 + $0xa0] sm:$0xf] }
 0x3d9   :  { %v736_v52 = vpop.f32.mrf.mxu3 }
 0x3da   :  { %v6749_v52 = vld [vmem:[%s9124_s2 + $0x3c] sm:$0xf0] }
 0x3db   :  { %v575_v34 = vpop.f32.mrf.mxu2 }
 0x3dc   :  { %v6745_v34 = vld [vmem:[%s9124_s2 + $0x4] sm:$0xf] }
 0x3e3   :  { %v713_v29 = vpop.f32.mrf.mxu2 }
 0x3e4   :  { %v7090_v35 = vpack.i.bf16 %v734_v32, %v713_v29 }
 0x3e6   :  { %7091 = vrot.lane.b32.xlu0 %v7090_v35, %s7222_s27  ;;  %v5371_v35 = vor.u32 %v6749_v52, %v5370_v6  ;;  %v6833_v6 = vld [vmem:[%s9124_s2 + $0xa4] sm:$0xf] }
 0x3e7   :  { %v5477_v52 = vld [vmem:[%s9124_s2 + $0xe0] sm:$0xf0] }
 0x3e8   :  { %992 = vmatpush.bf16.msrb.mxu1 %v5371_v35  ;;  %v6838_v35 = vld [vmem:[%s9124_s2 + $0xe4] sm:$0xf0] }
 0x3eb   :  { %v715_v38 = vpop.f32.mrf.mxu2 }
 0x3ec   :  { %v5372_v38 = vld [vmem:[%s9124_s2 + $0x40] sm:$0xf0] }
 0x3ed   :  { %v5375_v41 = vor.u32 %v6745_v34, %v5372_v38  ;;  %v6834_v38 = vld [vmem:[%s9124_s2 + $0xac] sm:$0xf] }
 0x3ef   :  { %1006 = vmatpush.bf16.msrb.mxu2 %v5375_v41 }
 0x40d   :  { %v7082_v42 = vpop.permute.xlu2 %7081 }
 0x40e   :  { %v7084_v44 = vunpack.i.h.bf16 %v7082_v42  ;;  %v7083_v45 = vunpack.i.l.bf16 %v7082_v42  ;;  %v6750_v42 = vld [vmem:[%s9124_s2 + $0x44] sm:$0xf0] }
 0x410   :  { %v763_v37 = vsel %vm170_vm3, %v7427_v47, %v7084_v44  ;;  %v762_v53 = vsel %vm170_vm3, %v7423_v30, %v7083_v45  ;;  %v7114_v47 = vld [vmem:[%s9123_s3 + $0x14] ss:$0 sm:$0xff]  ;;  %v5380_v44 = vld [vmem:[%s9124_s2 + $0x48] sm:$0xf0]  ;;  %v5379_v45 = vor.u32 %v6750_v42, %v5378_v39 }
 0x411   :  { %v5485_v39 = vld [vmem:[%s9124_s2 + $0xe8] sm:$0xf0] }
 0x412   :  { %1020 = vmatpush.bf16.msrb.mxu3 %v5379_v45  ;;  %v6829_v45 = vld [vmem:[%s9124_s2 + $0x5c] sm:$0xf0] }
 0x448   :  { %v7087_v43 = vpop.permute.xlu1 %7086 }
 0x449   :  { %v7089_v48 = vunpack.i.h.bf16 %v7087_v43  ;;  %v7088_v46 = vunpack.i.l.bf16 %v7087_v43  ;;  %v6746_v43 = vld [vmem:[%s9124_s2 + $0xc] sm:$0xf] }
 0x44b   :  { %v765_v56 = vsel %vm764_vm11, %v762_v53, %v7088_v46  ;;  %v766_v58 = vsel %vm764_vm11, %v763_v37, %v7089_v48  ;;  %v5383_v48 = vor.u32 %v6746_v43, %v5380_v44  ;;  %v6759_v37 = vld [vmem:[%s9124_s2 + $0xcc] sm:$0xf0]  ;;  %v6755_v53 = vld [vmem:[%s9124_s2 + $0x94] sm:$0xf]  ;;  %v5480_v43 = vor.u32 %v6833_v6, %v5477_v52  ;;  %v5443_v44 = vld [vmem:[%s9124_s2 + $0x20] sm:$0xf] }
 0x44c   :  { %v6844_v6 = vld [vmem:[%s9121_s1 + $0x2a0] sm:$0xff] }
 0x44d   :  { %1034 = vmatpush.bf16.msra.mxu0 %v5383_v48  ;;  %v6868_v52 = vld [vmem:[%s9121_s1 + $0x360] sm:$0xff] }
 0x458   :  { %v7092_v50 = vpop.permute.xlu0 %7091 }
 0x459   :  { %v7094_v54 = vunpack.i.h.bf16 %v7092_v50  ;;  %v7093_v40 = vunpack.i.l.bf16 %v7092_v50  ;;  %v5418_v50 = vld [vmem:[%s9124_s2 + $0x90] sm:$0xf] }
 0x45b   :  { %v768_v59 = vsel %vm767_vm12, %v765_v56, %v7093_v40  ;;  %v769_v60 = vsel %vm767_vm12, %v766_v58, %v7094_v54  ;;  %v5419_v40 = vor.u32 %v6759_v37, %v5418_v50  ;;  %v5420_v56 = vld [vmem:[%s9124_s2 + $0xd0] sm:$0xf0]  ;;  %v5426_v58 = vld [vmem:[%s9124_s2 + $0x98] sm:$0xf]  ;;  %v6825_v50 = vld [vmem:[%s9124_s2 + $0x24] sm:$0xf] }
 0x45c   :  { %v770_v61 = vpack.c.bf16 %v769_v60, %v768_v59  ;;  %v6760_v59 = vld [vmem:[%s9124_s2 + $0xd4] sm:$0xf0]  ;;  %v5423_v60 = vor.u32 %v6755_v53, %v5420_v56  ;;  %v5445_v37 = vld [vmem:[%s9124_s2 + $0x60] sm:$0xf0]  ;;  %v5451_v53 = vld [vmem:[%s9124_s2 + $0x28] sm:$0xf] }
 0x45d   :  { %1047 = vmatpush.bf16.msra.mxu1 %v5419_v40  ;;  %v6826_v40 = vld [vmem:[%s9124_s2 + $0x2c] sm:$0xf] }
 0x45e   :  { %5367 = vmatmul.msk.bf16.vlgmr.msrb.gmra.mxu0 %vm82_vm2, %v770_v61  ;;  %v5427_v61 = vor.u32 %v6760_v59, %v5426_v58  ;;  %1061 = vmatpush.bf16.msra.mxu2 %v5423_v60  ;;  %v5453_v56 = vld [vmem:[%s9124_s2 + $0x68] sm:$0xf0]  ;;  %v5444_v58 = vor.u32 %v6829_v45, %v5443_v44  ;;  %v5448_v59 = vor.u32 %v6825_v50, %v5445_v37  ;;  %v6866_v44 = vld [vmem:[%s9121_s1 + $0x350] sm:$0xff]  ;;  %v6851_v45 = vld [vmem:[%s9121_s1 + $0x2d8] sm:$0xff] }
 0x45f   :  { %v6865_v50 = vld [vmem:[%s9121_s1 + $0x348] sm:$0xff]  ;;  %v6880_v37 = vld [vmem:[%s9121_s1 + $0x3c0] sm:$0xff] }
 0x460   :  { %1075 = vmatpush.bf16.msra.mxu3 %v5427_v61  ;;  %v5456_v61 = vor.u32 %v6826_v40, %v5453_v56  ;;  %v6858_v40 = vld [vmem:[%s9121_s1 + $0x310] sm:$0xff]  ;;  %v6879_v56 = vld [vmem:[%s9121_s1 + $0x3b8] sm:$0xff] }
 0x464   :  { %1076 = vmatpush.bf16.msra.mxu3 %v5395_v8  ;;  %v6827_v8 = vld [vmem:[%s9124_s2 + $0x34] sm:$0xf] }
 0x4db   :  { %v801_v62 = vpop.f32.mrf.mxu0 }
 0x4dc   :  { %v802_v36 = vadd.f32 %v7114_v47, %v801_v62  ;;  %v5428_v62 = vld [vmem:[%s9124_s2 + $0xd8] sm:$0xf0] }
 0x4de   :  { %v806_v30 = vadd.f32 %v802_v36, %v7290_v18  ;;  %v5386_v36 = vld [vmem:[%s9124_s2 + $0x10] sm:$0xf] }
 0x4e0   :  { %v810_v0 = vsel %vm82_vm2, %v806_v30, 0.0 }
 0x4e1   :  { %811 = vadd.xlane.f32.xlu2 %v810_v0 }
 0x4e3   :  { %v803_v1 = vpop.f32.mrf.mxu0 }
 0x4e4   :  { %v804_v49 = vadd.f32 %v7114_v47, %v803_v1  ;;  %v6756_v47 = vld [vmem:[%s9124_s2 + $0x9c] sm:$0xf] }
 0x4e5   :  { %v5431_v1 = vor.u32 %v6756_v47, %v5428_v62  ;;  %v5491_v47 = vld [vmem:[%s9124_s2 + $0xb0] sm:$0xf] }
 0x4e6   :  { %v807_v2 = vadd.f32 %v804_v49, %v7292_v19  ;;  %v6751_v49 = vld [vmem:[%s9124_s2 + $0x4c] sm:$0xf0] }
 0x4e7   :  { %v5387_v57 = vor.u32 %v6751_v49, %v5386_v36  ;;  %1089 = vmatpush.bf16.msrb.mxu0 %v5431_v1  ;;  %v6839_v62 = vld [vmem:[%s9124_s2 + $0xec] sm:$0xf0]  ;;  %v6835_v36 = vld [vmem:[%s9124_s2 + $0xb4] sm:$0xf]  ;;  %v6840_v1 = vld [vmem:[%s9124_s2 + $0xf4] sm:$0xf0] }
 0x4e8   :  { %v813_v3 = vsel %vm82_vm2, %v807_v2, 0.0  ;;  %v6836_v49 = vld [vmem:[%s9124_s2 + $0xbc] sm:$0xf] }
 0x4e9   :  { %814 = vadd.xlane.f32.xlu1 %v813_v3  ;;  %1048 = vmatpush.bf16.msra.mxu1 %v5387_v57 }
 0x554   :  { %v812_v18 = vpop.xlane.xlu2 %811 }
 0x555   :  { %v823_v10 = vmul.f32 %v7468_v9, %v812_v18  ;;  %v6748_v18 = vld [vmem:[%s9124_s2 + $0x1c] sm:$0xf] }
 0x557   :  { %v7471_v11 = vsub.f32 %v806_v30, %v823_v10  ;;  %v5396_v10 = vld [vmem:[%s9124_s2 + $0x58] sm:$0xf0] }
 0x559   :  { %v827_v19 = vmul.f32 %v7471_v11, %v7471_v11 }
 0x55b   :  { %v829_v12 = vsel %vm82_vm2, %v827_v19, 0.0 }
 0x55c   :  { %v815_v13 = vpop.xlane.xlu1 %814  ;;  %830 = vadd.xlane.f32.xlu0 %v829_v12  ;;  %v5399_v12 = vor.u32 %v6748_v18, %v5396_v10  ;;  %v5461_v18 = vld [vmem:[%s9124_s2 + $0x70] sm:$0xf0]  ;;  %v5467_v10 = vld [vmem:[%s9124_s2 + $0x38] sm:$0xf] }
 0x55d   :  { %v824_v14 = vmul.f32 %v7468_v9, %v815_v13 }
 0x55e   :  { %1090 = vmatpush.bf16.msrb.mxu0 %v5399_v12  ;;  %v6828_v12 = vld [vmem:[%s9124_s2 + $0x3c] sm:$0xf] }
 0x55f   :  { %v7477_v15 = vsub.f32 %v807_v2, %v824_v14  ;;  %v6747_v2 = vld [vmem:[%s9124_s2 + $0x14] sm:$0xf] }
 0x560   :  { %v5391_v7 = vor.u32 %v6747_v2, %v5388_v4  ;;  %v5501_v2 = vld [vmem:[%s9124_s2 + $0xf8] sm:$0xf0]  ;;  %v5459_v4 = vld [vmem:[%s9124_s2 + $0x30] sm:$0xf] }
 0x561   :  { %v828_v26 = vmul.f32 %v7477_v15, %v7477_v15 }
 0x562   :  { %1062 = vmatpush.bf16.msra.mxu2 %v5391_v7  ;;  %v5504_v7 = vor.u32 %v6836_v49, %v5501_v2  ;;  %v6901_v49 = vld [vmem:[%s9121_s1 + $0x468] sm:$0xff]  ;;  %v6886_v2 = vld [vmem:[%s9121_s1 + $0x3f0] sm:$0xff] }
 0x563   :  { %v832_v51 = vsel %vm82_vm2, %v828_v26, 0.0 }
 0x564   :  { %833 = vadd.xlane.f32.xlu2 %v832_v51 }
 0x5cf   :  { %v831_v24 = vpop.xlane.xlu0 %830 }
 0x5d0   :  { %v835_v32 = vmul.f32 %v831_v24, %v7468_v9 }
 0x5d2   :  { %v7516_v29 = vadd.f32 1e-05, %v835_v32 }
 0x5d4   :  { %7165 = vrsqrt.f32 %v7516_v29  ;;  %vm845_vm15 = vweird.f32 %v7516_v29 }
 0x5d7   :  { %v834_v46 = vpop.xlane.xlu2 %833 }
 0x5d8   :  { %v836_v54 = vmul.f32 %v834_v46, %v7468_v9  ;;  %v5488_v46 = vor.u32 %v6834_v38, %v5485_v39  ;;  %v6843_v38 = vld [vmem:[%s9121_s1 + $0x298] sm:$0xff] }
 0x5d9   :  { %v6867_v39 = vld [vmem:[%s9121_s1 + $0x358] sm:$0xff] }
 0x5da   :  { %v7166_v30 = vpop.eup %7165  ;;  %v838_v0 = vadd.f32 1e-05, %v836_v54  ;;  %v6830_v54 = vld [vmem:[%s9124_s2 + $0x64] sm:$0xf0] }
 0x5db   :  { %v840_v3 = vmul.f32 %v7166_v30, %v7516_v29  ;;  %vm846_vm14 = vweird.f32 %v7166_v30  ;;  %v5452_v60 = vor.u32 %v6830_v54, %v5451_v53  ;;  %v6904_v53 = vld [vmem:[%s9121_s1 + $0x480] sm:$0xff]  ;;  %v6850_v54 = vld [vmem:[%s9121_s1 + $0x2d0] sm:$0xff] }
 0x5dc   :  { %7167 = vrsqrt.f32 %v838_v0  ;;  %vm847_vm0 = vmor %vm845_vm15, %vm846_vm14  ;;  %vm855_vm5 = vweird.f32 %v838_v0 }
 0x5dd   :  { %v841_v19 = vmul.f32 %v7166_v30, %v840_v3  ;;  %v5492_v3 = vor.u32 %v6839_v62, %v5491_v47  ;;  %v6896_v47 = vld [vmem:[%s9121_s1 + $0x440] sm:$0xff]  ;;  %v6878_v62 = vld [vmem:[%s9121_s1 + $0x3b0] sm:$0xff] }
 0x5df   :  { %v842_v13 = vmul.f32 0.5, %v841_v19  ;;  %v6832_v19 = vld [vmem:[%s9124_s2 + $0x74] sm:$0xf0] }
 0x5e1   :  { %v843_v14 = vsub.f32 1.5, %v842_v13  ;;  %v5469_v13 = vld [vmem:[%s9124_s2 + $0x78] sm:$0xf0] }
 0x5e2   :  { %v7168_v26 = vpop.eup %7167 }
 0x5e3   :  { %v844_v51 = vmul.f32 %v7166_v30, %v843_v14  ;;  %v850_v16 = vmul.f32 %v7168_v26, %v838_v0  ;;  %vm856_vm1 = vweird.f32 %v7168_v26  ;;  %v5499_v0 = vld [vmem:[%s9124_s2 + $0xb8] sm:$0xf]  ;;  %v5460_v14 = vor.u32 %v6831_v55, %v5459_v4  ;;  %v6876_v55 = vld [vmem:[%s9121_s1 + $0x3a0] sm:$0xff] }
 0x5e4   :  { %vm857_vm6 = vmor %vm855_vm5, %vm856_vm1  ;;  %v5500_v5 = vor.u32 %v6840_v1, %v5499_v0  ;;  %v6895_v0 = vld [vmem:[%s9121_s1 + $0x438] sm:$0xff]  ;;  %v6877_v1 = vld [vmem:[%s9121_s1 + $0x3a8] sm:$0xff] }
 0x5e5   :  { %v851_v17 = vmul.f32 %v7168_v26, %v850_v16  ;;  %v848_v63 = vsel %vm847_vm0, %v7166_v30, %v844_v51  ;;  %v5493_v30 = vld [vmem:[%s9124_s2 + $0xf0] sm:$0xf0]  ;;  %v5468_v51 = vor.u32 %v6832_v19, %v5467_v10  ;;  %v5472_v16 = vor.u32 %v6828_v12, %v5469_v13  ;;  %v6899_v10 = vld [vmem:[%s9121_s1 + $0x458] sm:$0xff]  ;;  %v6884_v13 = vld [vmem:[%s9121_s1 + $0x3e0] sm:$0xff] }
 0x5e6   :  { %v859_v23 = vmul.f32 %v848_v63, %v7471_v11  ;;  %v6837_v11 = vld [vmem:[%s9124_s2 + $0xdc] sm:$0xf0]  ;;  %v5496_v57 = vor.u32 %v6835_v36, %v5493_v30  ;;  %v6902_v36 = vld [vmem:[%s9121_s1 + $0x470] sm:$0xff]  ;;  %v6887_v30 = vld [vmem:[%s9121_s1 + $0x3f8] sm:$0xff] }
 0x5e7   :  { %v852_v20 = vmul.f32 0.5, %v851_v17  ;;  %v5476_v42 = vor.u32 %v6837_v11, %v5475_v33  ;;  %v6848_v17 = vld [vmem:[%s9121_s1 + $0x2c0] sm:$0xff]  ;;  %v6854_v33 = vld [vmem:[%s9121_s1 + $0x2f0] sm:$0xff] }
 0x5e8   :  { %v862_v31 = vmul.f32 %v7115_v22, %v859_v23  ;;  %v6872_v63 = vld [vmem:[%s9121_s1 + $0x380] sm:$0xff]  ;;  %v6871_v23 = vld [vmem:[%s9121_s1 + $0x378] sm:$0xff]  ;;  %v6862_v11 = vld [vmem:[%s9121_s1 + $0x330] sm:$0xff] }
 0x5e9   :  { %v853_v21 = vsub.f32 1.5, %v852_v20  ;;  %v6856_v20 = vld [vmem:[%s9121_s1 + $0x300] sm:$0xff] }
 0x5ea   :  { %v7608_v34 = vadd.f32 %v7116_v28, %v862_v31  ;;  %v6870_v31 = vld [vmem:[%s9121_s1 + $0x370] sm:$0xff] }
 0x5eb   :  { %v854_v24 = vmul.f32 %v7168_v26, %v853_v21  ;;  %v6864_v21 = vld [vmem:[%s9121_s1 + $0x340] sm:$0xff] }
 0x5ed   :  { %v858_v25 = vsel %vm857_vm6, %v7168_v26, %v854_v24  ;;  %v5464_v26 = vor.u32 %v6827_v8, %v5461_v18  ;;  %v6855_v24 = vld [vmem:[%s9121_s1 + $0x2f8] sm:$0xff]  ;;  %v6893_v8 = vld [vmem:[%s9121_s1 + $0x428] sm:$0xff] }
 0x5ee   :  { %v860_v27 = vmul.f32 %v858_v25, %v7477_v15  ;;  %v5483_v15 = vld [vmem:[%s9124_s2 + $0xa8] sm:$0xf]  ;;  %v6863_v25 = vld [vmem:[%s9121_s1 + $0x338] sm:$0xff] }
 0x5ef   :  { %v5484_v48 = vor.u32 %v6838_v35, %v5483_v15  ;;  %v6853_v15 = vld [vmem:[%s9121_s1 + $0x2e8] sm:$0xff]  ;;  %v6875_v18 = vld [vmem:[%s9121_s1 + $0x398] sm:$0xff] }
 0x5f0   :  { %v863_v32 = vmul.f32 %v7115_v22, %v860_v27  ;;  %v6847_v22 = vld [vmem:[%s9121_s1 + $0x2b8] sm:$0xff]  ;;  %v6845_v27 = vld [vmem:[%s9121_s1 + $0x2a8] sm:$0xff] }
 0x5f1   :  { %v6861_v35 = vld [vmem:[%s9121_s1 + $0x328] sm:$0xff] }
 0x5f2   :  { %v7610_v29 = vadd.f32 %v7116_v28, %v863_v32  ;;  %v6846_v28 = vld [vmem:[%s9121_s1 + $0x2b0] sm:$0xff]  ;;  %v6869_v32 = vld [vmem:[%s9121_s1 + $0x368] sm:$0xff] }
 0x5f4   :  { %v7623_v41 = vpack.c.bf16 %v7610_v29, %v7608_v34 }
 0x5f6   :  { %5432 = vmatmul.msk.bf16.vlgmr.msrb.gmra.mxu1 %vm82_vm2, %v7623_v41  ;;  %5433 = vmatmul.msk.bf16.vlgmr.msrb.gmra.mxu2 %vm82_vm2, %v7623_v41 }
 0x5f7   :  { %5434 = vmatmul.msk.bf16.vlgmr.msrb.gmra.mxu3 %vm82_vm2, %v7623_v41  ;;  %5435 = vmatmul.msk.bf16.vlgmr.msra.gmra.mxu0 %vm82_vm2, %v7623_v41 }
 0x5f8   :  { %1370 = vmatpush.bf16.msrb.mxu1 %v5476_v42  ;;  %1384 = vmatpush.bf16.msrb.mxu2 %v5480_v43  ;;  %v6860_v42 = vld [vmem:[%s9121_s1 + $0x320] sm:$0xff]  ;;  %v6842_v43 = vld [vmem:[%s9121_s1 + $0x290] sm:$0xff] }
 0x5f9   :  { %1398 = vmatpush.bf16.msrb.mxu3 %v5484_v48  ;;  %1412 = vmatpush.bf16.msra.mxu0 %v5488_v46  ;;  %v6859_v48 = vld [vmem:[%s9121_s1 + $0x318] sm:$0xff]  ;;  %v6841_v46 = vld [vmem:[%s9121_s1 + $0x288] sm:$0xff] }
 0x5fc   :  { %1371 = vmatpush.bf16.msrb.mxu1 %v5444_v58  ;;  %1385 = vmatpush.bf16.msrb.mxu2 %v5448_v59  ;;  %v6903_v58 = vld [vmem:[%s9121_s1 + $0x478] sm:$0xff]  ;;  %v6849_v59 = vld [vmem:[%s9121_s1 + $0x2c8] sm:$0xff] }
 0x5fd   :  { %1399 = vmatpush.bf16.msrb.mxu3 %v5452_v60  ;;  %1413 = vmatpush.bf16.msra.mxu0 %v5456_v61  ;;  %v6857_v60 = vld [vmem:[%s9121_s1 + $0x308] sm:$0xff]  ;;  %v6888_v61 = vld [vmem:[%s9121_s1 + $0x400] sm:$0xff] }
 0x606   :  { %5436 = vmatmul.msk.bf16.vlgmr.msra.gmra.mxu1 %vm82_vm2, %v7623_v41  ;;  %5437 = vmatmul.msk.bf16.vlgmr.msra.gmra.mxu2 %vm82_vm2, %v7623_v41 }
 0x607   :  { %5438 = vmatmul.msk.bf16.vlgmr.msra.gmra.mxu3 %vm82_vm2, %v7623_v41  ;;  %5439 = vmatmul.msk.bf16.vlgmr.msrb.gmra.mxu0 %vm82_vm2, %v7623_v41 }
 0x608   :  { %1426 = vmatpush.bf16.msra.mxu1 %v5492_v3  ;;  %1440 = vmatpush.bf16.msra.mxu2 %v5496_v57  ;;  %v6894_v3 = vld [vmem:[%s9121_s1 + $0x430] sm:$0xff] }
 0x609   :  { %1454 = vmatpush.bf16.msra.mxu3 %v5500_v5  ;;  %1468 = vmatpush.bf16.msrb.mxu0 %v5504_v7  ;;  %v6900_v5 = vld [vmem:[%s9121_s1 + $0x460] sm:$0xff]  ;;  %v6885_v7 = vld [vmem:[%s9121_s1 + $0x3e8] sm:$0xff] }
 0x60c   :  { %1427 = vmatpush.bf16.msra.mxu1 %v5460_v14  ;;  %1441 = vmatpush.bf16.msra.mxu2 %v5464_v26  ;;  %v6892_v14 = vld [vmem:[%s9121_s1 + $0x420] sm:$0xff] }
 0x60d   :  { %1455 = vmatpush.bf16.msra.mxu3 %v5468_v51  ;;  %1469 = vmatpush.bf16.msrb.mxu0 %v5472_v16  ;;  %v6874_v16 = vld [vmem:[%s9121_s1 + $0x390] sm:$0xff] }
 0x616   :  { %5505 = vmatmul.msk.bf16.vlgmr.msrb.gmra.mxu1 %vm82_vm2, %v7623_v41  ;;  %5506 = vmatmul.msk.bf16.vlgmr.msrb.gmra.mxu2 %vm82_vm2, %v7623_v41 }
 0x617   :  { %5507 = vmatmul.msk.bf16.vlgmr.msrb.gmra.mxu3 %vm82_vm2, %v7623_v41  ;;  %5508 = vmatmul.msk.bf16.vlgmr.msra.gmra.mxu0 %vm82_vm2, %v7623_v41 }
 0x618   :  { %2012 = vmatpush.bf16.msrb.mxu1 %v6848_v17  ;;  %2054 = vmatpush.bf16.msra.mxu0 %v6872_v63  ;;  %v6898_v17 = vld [vmem:[%s9121_s1 + $0x450] sm:$0xff]  ;;  %v6883_v63 = vld [vmem:[%s9121_s1 + $0x3d8] sm:$0xff] }
 0x619   :  { %2026 = vmatpush.bf16.msrb.mxu2 %v6856_v20  ;;  %2040 = vmatpush.bf16.msrb.mxu3 %v6864_v21  ;;  %v6891_v20 = vld [vmem:[%s9121_s1 + $0x418] sm:$0xff]  ;;  %v6873_v21 = vld [vmem:[%s9121_s1 + $0x388] sm:$0xff] }
 0x61c   :  { %2013 = vmatpush.bf16.msrb.mxu1 %v6847_v22  ;;  %2055 = vmatpush.bf16.msra.mxu0 %v6871_v23  ;;  %v6897_v22 = vld [vmem:[%s9121_s1 + $0x448] sm:$0xff] }
 0x61d   :  { %2027 = vmatpush.bf16.msrb.mxu2 %v6855_v24  ;;  %2041 = vmatpush.bf16.msrb.mxu3 %v6863_v25 }
 0x620   :  { %2014 = vmatpush.bf16.msrb.mxu1 %v6846_v28  ;;  %2056 = vmatpush.bf16.msra.mxu0 %v6870_v31  ;;  %v6882_v28 = vld [vmem:[%s9121_s1 + $0x3d0] sm:$0xff] }
 0x621   :  { %2028 = vmatpush.bf16.msrb.mxu2 %v6854_v33  ;;  %2042 = vmatpush.bf16.msrb.mxu3 %v6862_v11  ;;  %v6890_v31 = vld [vmem:[%s9121_s1 + $0x410] sm:$0xff]  ;;  %v6889_v33 = vld [vmem:[%s9121_s1 + $0x408] sm:$0xff] }
 0x624   :  { %2015 = vmatpush.bf16.msrb.mxu1 %v6845_v27  ;;  %2057 = vmatpush.bf16.msra.mxu0 %v6869_v32  ;;  %v6881_v32 = vld [vmem:[%s9121_s1 + $0x3c8] sm:$0xff] }
 0x625   :  { %2029 = vmatpush.bf16.msrb.mxu2 %v6853_v15  ;;  %2043 = vmatpush.bf16.msrb.mxu3 %v6861_v35 }
 0x626   :  { %5509 = vmatmul.msk.bf16.vlgmr.msra.gmra.mxu1 %vm82_vm2, %v7623_v41  ;;  %5510 = vmatmul.msk.bf16.vlgmr.msra.gmra.mxu2 %vm82_vm2, %v7623_v41 }
 0x627   :  { %5511 = vmatmul.msk.bf16.vlgmr.msra.gmra.mxu3 %vm82_vm2, %v7623_v41  ;;  %5512 = vmatmul.msk.bf16.vlgmr.msrb.gmra.mxu0 %vm82_vm2, %v7623_v41  ;;  %v6852_v41 = vld [vmem:[%s9121_s1 + $0x2e0] sm:$0xff] }
 0x628   :  { %2016 = vmatpush.bf16.msrb.mxu1 %v6844_v6  ;;  %2058 = vmatpush.bf16.msra.mxu0 %v6868_v52 }
 0x629   :  { %2030 = vmatpush.bf16.msrb.mxu2 %v6852_v41  ;;  %2044 = vmatpush.bf16.msrb.mxu3 %v6860_v42 }
 0x62c   :  { %2017 = vmatpush.bf16.msrb.mxu1 %v6843_v38  ;;  %2059 = vmatpush.bf16.msra.mxu0 %v6867_v39  ;;  %v7956_v39 = vld [vmem:[%s9125_s4 + $0x10] ss:$2 sm:$0xff] }
 0x62d   :  { %2031 = vmatpush.bf16.msrb.mxu2 %v6851_v45  ;;  %2045 = vmatpush.bf16.msrb.mxu3 %v6859_v48 }
 0x630   :  { %2018 = vmatpush.bf16.msrb.mxu1 %v6842_v43  ;;  %2060 = vmatpush.bf16.msra.mxu0 %v6866_v44  ;;  %v1268_v43 = vperm.slane %v7956_v39, 0  ;;  %v1271_v44 = vperm.slane %v7956_v39, 3 }
 0x631   :  { %2032 = vmatpush.bf16.msrb.mxu2 %v6850_v54  ;;  %2046 = vmatpush.bf16.msrb.mxu3 %v6858_v40 }
 0x634   :  { %2019 = vmatpush.bf16.msrb.mxu1 %v6841_v46  ;;  %2061 = vmatpush.bf16.msra.mxu0 %v6865_v50 }
 0x635   :  { %2033 = vmatpush.bf16.msrb.mxu2 %v6849_v59  ;;  %2047 = vmatpush.bf16.msrb.mxu3 %v6857_v60 }
 0x638   :  { %2068 = vmatpush.bf16.msra.mxu1 %v6880_v37  ;;  %2110 = vmatpush.bf16.msrb.mxu0 %v6904_v53  ;;  %v1269_v53 = vperm.slane %v7956_v39, 1 }
 0x639   :  { %2082 = vmatpush.bf16.msra.mxu2 %v6888_v61  ;;  %2096 = vmatpush.bf16.msra.mxu3 %v6896_v47 }
 0x63c   :  { %2069 = vmatpush.bf16.msra.mxu1 %v6879_v56  ;;  %2111 = vmatpush.bf16.msrb.mxu0 %v6903_v58  ;;  %v1270_v56 = vperm.slane %v7956_v39, 2 }
 0x63d   :  { %2083 = vmatpush.bf16.msra.mxu2 %v6887_v30  ;;  %2097 = vmatpush.bf16.msra.mxu3 %v6895_v0  ;;  %v6792_v0 = vld [vmem:[%s9121_s1 + $0x180] sm:$0xff] }
 0x640   :  { %2070 = vmatpush.bf16.msra.mxu1 %v6878_v62  ;;  %2112 = vmatpush.bf16.msrb.mxu0 %v6902_v36  ;;  %v6768_v62 = vld [vmem:[%s9121_s1 + $0xc0] sm:$0xff] }
 0x641   :  { %2084 = vmatpush.bf16.msra.mxu2 %v6886_v2  ;;  %2098 = vmatpush.bf16.msra.mxu3 %v6894_v3 }
 0x644   :  { %2071 = vmatpush.bf16.msra.mxu1 %v6877_v1  ;;  %2113 = vmatpush.bf16.msrb.mxu0 %v6901_v49 }
 0x645   :  { %2085 = vmatpush.bf16.msra.mxu2 %v6885_v7  ;;  %2099 = vmatpush.bf16.msra.mxu3 %v6893_v8  ;;  %v6767_v8 = vld [vmem:[%s9121_s1 + $0xb8] sm:$0xff] }
 0x648   :  { %2072 = vmatpush.bf16.msra.mxu1 %v6876_v55  ;;  %2114 = vmatpush.bf16.msrb.mxu0 %v6900_v5 }
 0x649   :  { %2086 = vmatpush.bf16.msra.mxu2 %v6884_v13  ;;  %2100 = vmatpush.bf16.msra.mxu3 %v6892_v14  ;;  %v6791_v14 = vld [vmem:[%s9121_s1 + $0x178] sm:$0xff] }
 0x64c   :  { %2073 = vmatpush.bf16.msra.mxu1 %v6875_v18  ;;  %2115 = vmatpush.bf16.msrb.mxu0 %v6899_v10 }
 0x64d   :  { %2087 = vmatpush.bf16.msra.mxu2 %v6883_v63  ;;  %2101 = vmatpush.bf16.msra.mxu3 %v6891_v20  ;;  %v6776_v63 = vld [vmem:[%s9121_s1 + $0x100] sm:$0xff] }
 0x650   :  { %2074 = vmatpush.bf16.msra.mxu1 %v6874_v16  ;;  %2116 = vmatpush.bf16.msrb.mxu0 %v6898_v17 }
 0x651   :  { %2088 = vmatpush.bf16.msra.mxu2 %v6882_v28  ;;  %2102 = vmatpush.bf16.msra.mxu3 %v6890_v31  ;;  %v1275_v31 = vperm.slane %v7956_v39, 7 }
 0x654   :  { %2075 = vmatpush.bf16.msra.mxu1 %v6873_v21  ;;  %2117 = vmatpush.bf16.msrb.mxu0 %v6897_v22  ;;  %v1272_v21 = vperm.slane %v7956_v39, 4  ;;  %v6784_v22 = vld [vmem:[%s9121_s1 + $0x140] sm:$0xff] }
 0x655   :  { %2089 = vmatpush.bf16.msra.mxu2 %v6881_v32  ;;  %2103 = vmatpush.bf16.msra.mxu3 %v6889_v33  ;;  %v6766_v32 = vld [vmem:[%s9121_s1 + $0xb0] sm:$0xff] }
 0x656   :  { %v6790_v33 = vld [vmem:[%s9121_s1 + $0x170] sm:$0xff] }
 0x673   :  { %v7867_v57 = vpop.f32.mrf.mxu1 }
 0x674   :  { %v7869_v4 = vpop.f32.mrf.mxu0 }
 0x679   :  { %v7889_v19 = vpop.f32.mrf.mxu2 }
 0x67a   :  { %v7891_v12 = vpop.f32.mrf.mxu3 }
 0x67b   :  { %v7899_v26 = vpop.f32.mrf.mxu1 }
 0x67c   :  { %v7901_v51 = vpop.f32.mrf.mxu0 }
 0x681   :  { %v7921_v23 = vpop.f32.mrf.mxu2 }
 0x682   :  { %v7923_v24 = vpop.f32.mrf.mxu3 }
 0x683   :  { %v7925_v25 = vpop.f32.mrf.mxu1 }
 0x684   :  { %v7933_v27 = vpop.f32.mrf.mxu0 }
 0x689   :  { %v7941_v11 = vpop.f32.mrf.mxu2 }
 0x68a   :  { %v7943_v6 = vpop.f32.mrf.mxu3 }
 0x68b   :  { %v7945_v52 = vpop.f32.mrf.mxu1 }
 0x68c   :  { %v7947_v15 = vpop.f32.mrf.mxu0 }
 0x691   :  { %v7949_v35 = vpop.f32.mrf.mxu2 }
 0x692   :  { %v7951_v38 = vpop.f32.mrf.mxu3 }
 0x693   :  { %v1373_v41 = vpop.f32.mrf.mxu1 }
 0x694   :  { %v1415_v42 = vpop.f32.mrf.mxu0  ;;  %v1374_v48 = vadd.f32 %v1373_v41, %v1268_v43 }
 0x695   :  { %v1416_v50 = vadd.f32 %v1415_v42, %v1271_v44  ;;  %v6775_v42 = vld [vmem:[%s9121_s1 + $0xf8] sm:$0xff] }
 0x696   :  { %v1476_v59 = vmax.f32 %v1374_v48, 0.0 }
 0x697   :  { %v1479_v61 = vmax.f32 %v1416_v50, 0.0  ;;  %v6765_v50 = vld [vmem:[%s9121_s1 + $0xa8] sm:$0xff] }
 0x699   :  { %v1387_v45 = vpop.f32.mrf.mxu2 }
 0x69a   :  { %v1401_v46 = vpop.f32.mrf.mxu3  ;;  %v1388_v36 = vadd.f32 %v1387_v45, %v1269_v53  ;;  %v6783_v45 = vld [vmem:[%s9121_s1 + $0x138] sm:$0xff] }
 0x69b   :  { %v1375_v37 = vpop.f32.mrf.mxu1  ;;  %v1402_v1 = vadd.f32 %v1401_v46, %v1270_v56 }
 0x69c   :  { %v1376_v54 = vadd.f32 %v1375_v37, %v1268_v43  ;;  %v1417_v40 = vpop.f32.mrf.mxu0  ;;  %v1477_v18 = vmax.f32 %v1388_v36, 0.0  ;;  %v1273_v37 = vperm.slane %v7956_v39, 5 }
 0x69d   :  { %v1418_v58 = vadd.f32 %v1417_v40, %v1271_v44  ;;  %v1478_v16 = vmax.f32 %v1402_v1, 0.0  ;;  %v6789_v40 = vld [vmem:[%s9121_s1 + $0x168] sm:$0xff]  ;;  %v6788_v1 = vld [vmem:[%s9121_s1 + $0x160] sm:$0xff] }
 0x69e   :  { %v1484_v60 = vmax.f32 %v1376_v54, 0.0 }
 0x69f   :  { %v1487_v47 = vmax.f32 %v1418_v58, 0.0 }
 0x6a0   :  { %v1620_v30 = vpack.c.bf16 %v1484_v60, %v1476_v59  ;;  %v6774_v59 = vld [vmem:[%s9121_s1 + $0xf0] sm:$0xff] }
 0x6a1   :  { %v1623_v49 = vpack.c.bf16 %v1487_v47, %v1479_v61  ;;  %v1389_v2 = vpop.f32.mrf.mxu2  ;;  %v6782_v47 = vld [vmem:[%s9121_s1 + $0x130] sm:$0xff] }
 0x6a2   :  { %v1390_v3 = vadd.f32 %v1389_v2, %v1269_v53  ;;  %v1403_v55 = vpop.f32.mrf.mxu3  ;;  %2020 = vmatmul.bf16.vlgmr.msrb.gmra.mxu1 %v1620_v30 }
 0x6a3   :  { %v1404_v5 = vadd.f32 %v1403_v55, %v1270_v56  ;;  %2062 = vmatmul.bf16.vlgmr.msra.gmra.mxu0 %v1623_v49  ;;  %2508 = vmatpush.bf16.msrb.mxu1 %v6768_v62  ;;  %v1429_v7 = vpop.f32.mrf.mxu1  ;;  %v1274_v56 = vperm.slane %v7956_v39, 6  ;;  %v6764_v39 = vld [vmem:[%s9121_s1 + $0xa0] sm:$0xff]  ;;  %v6773_v55 = vld [vmem:[%s9121_s1 + $0xe8] sm:$0xff] }
 0x6a4   :  { %v1485_v10 = vmax.f32 %v1390_v3, 0.0  ;;  %2550 = vmatpush.bf16.msra.mxu0 %v6792_v0  ;;  %v1471_v13 = vpop.f32.mrf.mxu0  ;;  %v1430_v43 = vadd.f32 %v1429_v7, %v1272_v21 }
 0x6a5   :  { %v1486_v17 = vmax.f32 %v1404_v5, 0.0  ;;  %v1472_v48 = vadd.f32 %v1471_v13, %v1275_v31  ;;  %v6763_v13 = vld [vmem:[%s9121_s1 + $0x98] sm:$0xff] }
 0x6a6   :  { %v1621_v20 = vpack.c.bf16 %v1485_v10, %v1477_v18  ;;  %v1480_v60 = vmax.f32 %v1430_v43, 0.0  ;;  %v8023_v18 = vld [vmem:[%s9125_s4] ss:$2 sm:$0xff]  ;;  %v6786_v43 = vld [vmem:[%s9121_s1 + $0x150] sm:$0xff] }
 0x6a7   :  { %v1622_v28 = vpack.c.bf16 %v1486_v17, %v1478_v16  ;;  %2509 = vmatpush.bf16.msrb.mxu1 %v6767_v8  ;;  %v1483_v62 = vmax.f32 %v1472_v48, 0.0  ;;  %v6781_v8 = vld [vmem:[%s9121_s1 + $0x128] sm:$0xff]  ;;  %v6787_v17 = vld [vmem:[%s9121_s1 + $0x158] sm:$0xff] }
 0x6a8   :  { %2551 = vmatpush.bf16.msra.mxu0 %v6791_v14  ;;  %2034 = vmatmul.bf16.vlgmr.msrb.gmra.mxu2 %v1621_v20 }
 0x6a9   :  { %2048 = vmatmul.bf16.vlgmr.msrb.gmra.mxu3 %v1622_v28  ;;  %2522 = vmatpush.bf16.msrb.mxu2 %v6776_v63  ;;  %v1443_v41 = vpop.f32.mrf.mxu2 }
 0x6aa   :  { %2536 = vmatpush.bf16.msrb.mxu3 %v6784_v22  ;;  %v1457_v44 = vpop.f32.mrf.mxu3  ;;  %v1444_v30 = vadd.f32 %v1443_v41, %v1273_v37  ;;  %v886_v22 = vperm.slane %v8023_v18, 0  ;;  %v6762_v41 = vld [vmem:[%s9121_s1 + $0x90] sm:$0xff] }
 0x6ab   :  { %2510 = vmatpush.bf16.msrb.mxu1 %v6766_v32  ;;  %v1431_v46 = vpop.f32.mrf.mxu1  ;;  %v1458_v49 = vadd.f32 %v1457_v44, %v1274_v56  ;;  %v889_v32 = vperm.slane %v8023_v18, 3 }
 0x6ac   :  { %2552 = vmatpush.bf16.msra.mxu0 %v6790_v33  ;;  %v1432_v53 = vadd.f32 %v1431_v46, %v1272_v21  ;;  %v1473_v54 = vpop.f32.mrf.mxu0  ;;  %v1481_v14 = vmax.f32 %v1444_v30, 0.0  ;;  %v6772_v21 = vld [vmem:[%s9121_s1 + $0xe0] sm:$0xff]  ;;  %v995_v48 = vadd.f32 %v7867_v57, %v886_v22  ;;  %v6785_v57 = vld [vmem:[%s9121_s1 + $0x148] sm:$0xff] }
 0x6ad   :  { %v1474_v58 = vadd.f32 %v1473_v54, %v1275_v31  ;;  %2523 = vmatpush.bf16.msrb.mxu2 %v6775_v42  ;;  %v1482_v63 = vmax.f32 %v1458_v49, 0.0  ;;  %v6780_v31 = vld [vmem:[%s9121_s1 + $0x120] sm:$0xff]  ;;  %v997_v42 = vadd.f32 %v7899_v26, %v886_v22  ;;  %v1039_v44 = vadd.f32 %v7901_v51, %v889_v32  ;;  %v6779_v26 = vld [vmem:[%s9121_s1 + $0x118] sm:$0xff]  ;;  %v6761_v51 = vld [vmem:[%s9121_s1 + $0x88] sm:$0xff] }
 0x6ae   :  { %v1488_v61 = vmax.f32 %v1432_v53, 0.0  ;;  %2537 = vmatpush.bf16.msrb.mxu3 %v6783_v45  ;;  %v6771_v45 = vld [vmem:[%s9121_s1 + $0xd8] sm:$0xff]  ;;  %v1037_v46 = vadd.f32 %v7869_v4, %v889_v32  ;;  %v6800_v53 = vld [vmem:[%s9121_s1 + $0x1c0] sm:$0xff]  ;;  %v888_v54 = vperm.slane %v8023_v18, 2 }
 0x6af   :  { %v1491_v36 = vmax.f32 %v1474_v58, 0.0  ;;  %2511 = vmatpush.bf16.msrb.mxu1 %v6765_v50  ;;  %v887_v50 = vperm.slane %v8023_v18, 1  ;;  %v1108_v4 = vmax.f32 %v1039_v44, 0.0  ;;  %v1097_v58 = vmax.f32 %v995_v48, 0.0  ;;  %v6820_v22 = vld [vmem:[%s9121_s1 + $0x260] sm:$0xff]  ;;  %v6795_v32 = vld [vmem:[%s9121_s1 + $0x198] sm:$0xff] }
 0x6b0   :  { %v1624_v0 = vpack.c.bf16 %v1488_v61, %v1480_v60  ;;  %2553 = vmatpush.bf16.msra.mxu0 %v6789_v40  ;;  %v6824_v40 = vld [vmem:[%s9121_s1 + $0x280] sm:$0xff]  ;;  %v6778_v60 = vld [vmem:[%s9121_s1 + $0x110] sm:$0xff]  ;;  %v1100_v61 = vmax.f32 %v1037_v46, 0.0  ;;  %v893_v44 = vperm.slane %v8023_v18, 7 }
 0x6b1   :  { %v1627_v2 = vpack.c.bf16 %v1491_v36, %v1483_v62  ;;  %2524 = vmatpush.bf16.msrb.mxu2 %v6774_v59  ;;  %v1445_v3 = vpop.f32.mrf.mxu2  ;;  %v1011_v59 = vadd.f32 %v7921_v23, %v887_v50  ;;  %v1009_v62 = vadd.f32 %v7889_v19, %v887_v50  ;;  %v1023_v23 = vadd.f32 %v7891_v12, %v888_v54  ;;  %v6769_v19 = vld [vmem:[%s9121_s1 + $0xc8] sm:$0xff]  ;;  %v6808_v12 = vld [vmem:[%s9121_s1 + $0x200] sm:$0xff] }
 0x6b2   :  { %2538 = vmatpush.bf16.msrb.mxu3 %v6782_v47  ;;  %v1446_v5 = vadd.f32 %v1445_v3, %v1273_v37  ;;  %v1459_v7 = vpop.f32.mrf.mxu3  ;;  %2076 = vmatmul.bf16.vlgmr.msra.gmra.mxu1 %v1624_v0  ;;  %v1105_v37 = vmax.f32 %v997_v42, 0.0  ;;  %v1025_v47 = vadd.f32 %v7923_v24, %v888_v54  ;;  %v1244_v30 = vpack.c.bf16 %v1108_v4, %v1100_v61  ;;  %v6823_v0 = vld [vmem:[%s9121_s1 + $0x278] sm:$0xff] }
 0x6b3   :  { %v1460_v10 = vadd.f32 %v1459_v7, %v1274_v56  ;;  %2118 = vmatmul.bf16.vlgmr.msrb.gmra.mxu0 %v1627_v2  ;;  %2512 = vmatpush.bf16.msrb.mxu1 %v6764_v39  ;;  %v6770_v56 = vld [vmem:[%s9121_s1 + $0xd0] sm:$0xff]  ;;  %v6799_v39 = vld [vmem:[%s9121_s1 + $0x1b8] sm:$0xff]  ;;  %v1106_v24 = vmax.f32 %v1011_v59, 0.0  ;;  %v6816_v2 = vld [vmem:[%s9121_s1 + $0x240] sm:$0xff]  ;;  %v1098_v3 = vmax.f32 %v1009_v62, 0.0  ;;  %v890_v42 = vperm.slane %v8023_v18, 4 }
 0x6b4   :  { %v1489_v16 = vmax.f32 %v1446_v5, 0.0  ;;  %2554 = vmatpush.bf16.msra.mxu0 %v6788_v1  ;;  %v1241_v36 = vpack.c.bf16 %v1105_v37, %v1097_v58  ;;  %v6777_v1 = vld [vmem:[%s9121_s1 + $0x108] sm:$0xff]  ;;  %v1107_v49 = vmax.f32 %v1025_v47, 0.0  ;;  %v1099_v5 = vmax.f32 %v1023_v23, 0.0  ;;  %v6822_v7 = vld [vmem:[%s9121_s1 + $0x270] sm:$0xff]  ;;  %v6811_v37 = vld [vmem:[%s9121_s1 + $0x218] sm:$0xff] }
 0x6b5   :  { %v1490_v20 = vmax.f32 %v1460_v10, 0.0  ;;  %2525 = vmatpush.bf16.msrb.mxu2 %v6773_v55  ;;  %v6798_v55 = vld [vmem:[%s9121_s1 + $0x1b0] sm:$0xff]  ;;  %v6807_v10 = vld [vmem:[%s9121_s1 + $0x1f8] sm:$0xff]  ;;  %v1053_v48 = vadd.f32 %v7945_v52, %v890_v42  ;;  %v1095_v46 = vadd.f32 %v7947_v15, %v893_v44  ;;  %v1051_v50 = vadd.f32 %v7925_v25, %v890_v42  ;;  %v6817_v25 = vld [vmem:[%s9121_s1 + $0x248] sm:$0xff] }
 0x6b6   :  { %v1625_v28 = vpack.c.bf16 %v1489_v16, %v1481_v14  ;;  %2539 = vmatpush.bf16.msrb.mxu3 %v6781_v8  ;;  %v1242_v8 = vpack.c.bf16 %v1106_v24, %v1098_v3  ;;  %v6815_v14 = vld [vmem:[%s9121_s1 + $0x238] sm:$0xff]  ;;  %v6797_v16 = vld [vmem:[%s9121_s1 + $0x1a8] sm:$0xff]  ;;  %v1093_v52 = vadd.f32 %v7933_v27, %v893_v44  ;;  %v891_v15 = vperm.slane %v8023_v18, 5  ;;  %v6802_v27 = vld [vmem:[%s9121_s1 + $0x1d0] sm:$0xff] }
 0x6b7   :  { %v1626_v33 = vpack.c.bf16 %v1490_v20, %v1482_v63  ;;  %2513 = vmatpush.bf16.msrb.mxu1 %v6763_v13  ;;  %v1243_v13 = vpack.c.bf16 %v1107_v49, %v1099_v5  ;;  %v6806_v63 = vld [vmem:[%s9121_s1 + $0x1f0] sm:$0xff]  ;;  %v892_v54 = vperm.slane %v8023_v18, 6  ;;  %v1112_v4 = vmax.f32 %v1095_v46, 0.0 }
 0x6b8   :  { %2555 = vmatpush.bf16.msra.mxu0 %v6787_v17  ;;  %2090 = vmatmul.bf16.vlgmr.msra.gmra.mxu2 %v1625_v28  ;;  %v6821_v17 = vld [vmem:[%s9121_s1 + $0x268] sm:$0xff]  ;;  %v6814_v20 = vld [vmem:[%s9121_s1 + $0x230] sm:$0xff]  ;;  %v1104_v59 = vmax.f32 %v1093_v52, 0.0  ;;  %v1065_v18 = vadd.f32 %v7941_v11, %v891_v15 }
 0x6b9   :  { %2104 = vmatmul.bf16.vlgmr.msra.gmra.mxu3 %v1626_v33  ;;  %2526 = vmatpush.bf16.msrb.mxu2 %v6772_v21  ;;  %v6796_v21 = vld [vmem:[%s9121_s1 + $0x1a0] sm:$0xff]  ;;  %v6805_v28 = vld [vmem:[%s9121_s1 + $0x1e8] sm:$0xff]  ;;  %v6819_v33 = vld [vmem:[%s9121_s1 + $0x258] sm:$0xff]  ;;  %v1079_v47 = vadd.f32 %v7943_v6, %v892_v54 }
 0x6ba   :  { %2540 = vmatpush.bf16.msrb.mxu3 %v6780_v31  ;;  %v6813_v31 = vld [vmem:[%s9121_s1 + $0x228] sm:$0xff]  ;;  %v6810_v58 = vld [vmem:[%s9121_s1 + $0x210] sm:$0xff]  ;;  %v1248_v62 = vpack.c.bf16 %v1112_v4, %v1104_v59  ;;  %v1102_v11 = vmax.f32 %v1065_v18, 0.0 }
 0x6bb   :  { %2514 = vmatpush.bf16.msrb.mxu1 %v6762_v41  ;;  %v6804_v41 = vld [vmem:[%s9121_s1 + $0x1e0] sm:$0xff]  ;;  %v1103_v23 = vmax.f32 %v1079_v47, 0.0 }
 0x6bc   :  { %2556 = vmatpush.bf16.msra.mxu0 %v6786_v43  ;;  %v6812_v43 = vld [vmem:[%s9121_s1 + $0x220] sm:$0xff] }
 0x6bd   :  { %2527 = vmatpush.bf16.msrb.mxu2 %v6771_v45  ;;  %v6794_v45 = vld [vmem:[%s9121_s1 + $0x190] sm:$0xff] }
 0x6be   :  { %2541 = vmatpush.bf16.msrb.mxu3 %v6779_v26  ;;  %v6818_v26 = vld [vmem:[%s9121_s1 + $0x250] sm:$0xff] }
 0x6bf   :  { %2515 = vmatpush.bf16.msrb.mxu1 %v6761_v51  ;;  %v6803_v51 = vld [vmem:[%s9121_s1 + $0x1d8] sm:$0xff] }
 0x6c0   :  { %2557 = vmatpush.bf16.msra.mxu0 %v6785_v57  ;;  %v6793_v57 = vld [vmem:[%s9121_s1 + $0x188] sm:$0xff] }
 0x6c1   :  { %2528 = vmatpush.bf16.msrb.mxu2 %v6770_v56  ;;  %v1067_v56 = vadd.f32 %v7949_v35, %v891_v15  ;;  %v6801_v35 = vld [vmem:[%s9121_s1 + $0x1c8] sm:$0xff] }
 0x6c2   :  { %2542 = vmatpush.bf16.msrb.mxu3 %v6778_v60  ;;  %2516 = vmatmul.bf16.vlgmr.msrb.gmra.mxu1 %v1241_v36  ;;  %v1081_v60 = vadd.f32 %v7951_v38, %v892_v54  ;;  %v6809_v38 = vld [vmem:[%s9121_s1 + $0x208] sm:$0xff] }
 0x6c3   :  { %2564 = vmatpush.bf16.msra.mxu1 %v6800_v53  ;;  %2558 = vmatmul.bf16.vlgmr.msra.gmra.mxu0 %v1244_v30  ;;  %v1109_v53 = vmax.f32 %v1053_v48, 0.0  ;;  %v1110_v36 = vmax.f32 %v1067_v56, 0.0 }
 0x6c4   :  { %2606 = vmatpush.bf16.msrb.mxu0 %v6824_v40  ;;  %v1101_v40 = vmax.f32 %v1051_v50, 0.0 }
 0x6c5   :  { %2529 = vmatpush.bf16.msrb.mxu2 %v6769_v19  ;;  %v1246_v30 = vpack.c.bf16 %v1110_v36, %v1102_v11 }
 0x6c6   :  { %2543 = vmatpush.bf16.msrb.mxu3 %v6777_v1  ;;  %v1245_v61 = vpack.c.bf16 %v1109_v53, %v1101_v40 }
 0x6c7   :  { %2565 = vmatpush.bf16.msra.mxu1 %v6799_v39  ;;  %v1111_v39 = vmax.f32 %v1081_v60, 0.0 }
 0x6c8   :  { %2607 = vmatpush.bf16.msrb.mxu0 %v6823_v0  ;;  %2530 = vmatmul.bf16.vlgmr.msrb.gmra.mxu2 %v1242_v8 }
 0x6c9   :  { %2578 = vmatpush.bf16.msra.mxu2 %v6808_v12  ;;  %2544 = vmatmul.bf16.vlgmr.msrb.gmra.mxu3 %v1243_v13  ;;  %v1247_v6 = vpack.c.bf16 %v1111_v39, %v1103_v23 }
 0x6ca   :  { %2592 = vmatpush.bf16.msra.mxu3 %v6816_v2 }
 0x6cb   :  { %2566 = vmatpush.bf16.msra.mxu1 %v6798_v55 }
 0x6cc   :  { %2608 = vmatpush.bf16.msrb.mxu0 %v6822_v7 }
 0x6cd   :  { %2579 = vmatpush.bf16.msra.mxu2 %v6807_v10 }
 0x6ce   :  { %2593 = vmatpush.bf16.msra.mxu3 %v6815_v14 }
 0x6cf   :  { %2567 = vmatpush.bf16.msra.mxu1 %v6797_v16 }
 0x6d0   :  { %2609 = vmatpush.bf16.msrb.mxu0 %v6821_v17 }
 0x6d1   :  { %2580 = vmatpush.bf16.msra.mxu2 %v6806_v63 }
 0x6d2   :  { %2594 = vmatpush.bf16.msra.mxu3 %v6814_v20 }
 0x6d3   :  { %2568 = vmatpush.bf16.msra.mxu1 %v6796_v21 }
 0x6d4   :  { %2610 = vmatpush.bf16.msrb.mxu0 %v6820_v22 }
 0x6d5   :  { %2581 = vmatpush.bf16.msra.mxu2 %v6805_v28 }
 0x6d6   :  { %2595 = vmatpush.bf16.msra.mxu3 %v6813_v31 }
 0x6d7   :  { %2569 = vmatpush.bf16.msra.mxu1 %v6795_v32 }
 0x6d8   :  { %2611 = vmatpush.bf16.msrb.mxu0 %v6819_v33 }
 0x6d9   :  { %2582 = vmatpush.bf16.msra.mxu2 %v6804_v41 }
 0x6da   :  { %2596 = vmatpush.bf16.msra.mxu3 %v6812_v43 }
 0x6db   :  { %2570 = vmatpush.bf16.msra.mxu1 %v6794_v45 }
 0x6dc   :  { %2612 = vmatpush.bf16.msrb.mxu0 %v6818_v26 }
 0x6dd   :  { %2583 = vmatpush.bf16.msra.mxu2 %v6803_v51 }
 0x6de   :  { %2597 = vmatpush.bf16.msra.mxu3 %v6811_v37 }
 0x6df   :  { %2571 = vmatpush.bf16.msra.mxu1 %v6793_v57 }
 0x6e0   :  { %2613 = vmatpush.bf16.msrb.mxu0 %v6817_v25 }
 0x6e1   :  { %2584 = vmatpush.bf16.msra.mxu2 %v6802_v27 }
 0x6e2   :  { %2598 = vmatpush.bf16.msra.mxu3 %v6810_v58  ;;  %2572 = vmatmul.bf16.vlgmr.msra.gmra.mxu1 %v1245_v61 }
 0x6e3   :  { %2614 = vmatmul.bf16.vlgmr.msrb.gmra.mxu0 %v1248_v62  ;;  %v7117_v62 = vld [vmem:[%s9123_s3 + $0x17] ss:$0 sm:$0xff] }
 0x6e5   :  { %2585 = vmatpush.bf16.msra.mxu2 %v6801_v35 }
 0x6e6   :  { %2599 = vmatpush.bf16.msra.mxu3 %v6809_v38 }
 0x6e8   :  { %2586 = vmatmul.bf16.vlgmr.msra.gmra.mxu2 %v1246_v30 }
 0x6e9   :  { %2600 = vmatmul.bf16.vlgmr.msra.gmra.mxu3 %v1247_v6 }
 0x71f   :  { %v2021_v0 = vpop.f32.mrf.mxu1 }
 0x720   :  { %v2063_v1 = vpop.f32.mrf.mxu0 }
 0x727   :  { %v2023_v12 = vpop.f32.mrf.mxu1 }
 0x728   :  { %v2065_v3 = vpop.f32.mrf.mxu0 }
 0x72b   :  { %v2035_v19 = vpop.f32.mrf.mxu2 }
 0x72c   :  { %v2049_v24 = vpop.f32.mrf.mxu3  ;;  %v2036_v5 = vadd.f32 %v2035_v19, %v2021_v0 }
 0x72e   :  { %v2050_v13 = vadd.f32 %v2049_v24, %v2036_v5 }
 0x72f   :  { %v2077_v55 = vpop.f32.mrf.mxu1 }
 0x730   :  { %v2119_v10 = vpop.f32.mrf.mxu0  ;;  %v2064_v16 = vadd.f32 %v2063_v1, %v2050_v13 }
 0x732   :  { %v2078_v20 = vadd.f32 %v2077_v55, %v2064_v16 }
 0x733   :  { %v2037_v49 = vpop.f32.mrf.mxu2 }
 0x734   :  { %v2051_v2 = vpop.f32.mrf.mxu3  ;;  %v2038_v17 = vadd.f32 %v2037_v49, %v2023_v12 }
 0x736   :  { %v2052_v21 = vadd.f32 %v2051_v2, %v2038_v17 }
 0x737   :  { %v2079_v14 = vpop.f32.mrf.mxu1 }
 0x738   :  { %v2121_v28 = vpop.f32.mrf.mxu0  ;;  %v2066_v33 = vadd.f32 %v2065_v3, %v2052_v21 }
 0x73a   :  { %v2080_v42 = vadd.f32 %v2079_v14, %v2066_v33  ;;  %v6909_v33 = vld [vmem:[%s9121_s1 + $0x58] sm:$0xff] }
 0x73b   :  { %v2091_v7 = vpop.f32.mrf.mxu2 }
 0x73c   :  { %v2105_v8 = vpop.f32.mrf.mxu3  ;;  %v2092_v31 = vadd.f32 %v2091_v7, %v2078_v20  ;;  %v6910_v20 = vld [vmem:[%s9121_s1 + $0x60] sm:$0xff] }
 0x73d   :  { %2774 = vmatpush.bf16.msrb.mxu3 %v6910_v20 }
 0x73e   :  { %v2106_v41 = vadd.f32 %v2105_v8, %v2092_v31  ;;  %v6905_v31 = vld [vmem:[%s9121_s1 + $0x38] sm:$0xff] }
 0x73f   :  { %v2517_v32 = vpop.f32.mrf.mxu1 }
 0x740   :  { %v2120_v44 = vadd.f32 %v2119_v10, %v2106_v41  ;;  %v2559_v26 = vpop.f32.mrf.mxu0 }
 0x741   :  { %2775 = vmatpush.bf16.msrb.mxu3 %v6909_v33 }
 0x742   :  { %v2518_v51 = vadd.f32 %v2517_v32, %v2120_v44  ;;  %v6907_v32 = vld [vmem:[%s9121_s1 + $0x48] sm:$0xff] }
 0x743   :  { %v2093_v63 = vpop.f32.mrf.mxu2 }
 0x744   :  { %v2107_v22 = vpop.f32.mrf.mxu3  ;;  %v2094_v45 = vadd.f32 %v2093_v63, %v2080_v42  ;;  %v6908_v63 = vld [vmem:[%s9121_s1 + $0x50] sm:$0xff] }
 0x745   :  { %2740 = vmatpush.bf16.msrb.mxu2 %v6908_v63 }
 0x746   :  { %v2108_v50 = vadd.f32 %v2107_v22, %v2094_v45 }
 0x747   :  { %v2519_v46 = vpop.f32.mrf.mxu1 }
 0x748   :  { %v2122_v52 = vadd.f32 %v2121_v28, %v2108_v50  ;;  %v2561_v25 = vpop.f32.mrf.mxu0 }
 0x749   :  { %2741 = vmatpush.bf16.msrb.mxu2 %v6907_v32 }
 0x74a   :  { %v2520_v4 = vadd.f32 %v2519_v46, %v2122_v52 }
 0x74b   :  { %v2531_v43 = vpop.f32.mrf.mxu2 }
 0x74c   :  { %v2545_v48 = vpop.f32.mrf.mxu3  ;;  %v2532_v37 = vadd.f32 %v2531_v43, %v2518_v51 }
 0x74e   :  { %v2546_v15 = vadd.f32 %v2545_v48, %v2532_v37 }
 0x750   :  { %v2560_v40 = vadd.f32 %v2559_v26, %v2546_v15 }
 0x753   :  { %v2533_v57 = vpop.f32.mrf.mxu2 }
 0x754   :  { %v2547_v53 = vpop.f32.mrf.mxu3  ;;  %v2534_v27 = vadd.f32 %v2533_v57, %v2520_v4 }
 0x756   :  { %v2548_v59 = vadd.f32 %v2547_v53, %v2534_v27 }
 0x758   :  { %v2562_v36 = vadd.f32 %v2561_v25, %v2548_v59  ;;  %v7118_v25 = vld [vmem:[%s9123_s3 + $0x18] ss:$0 sm:$0xff] }
 0x75f   :  { %v2573_v54 = vpop.f32.mrf.mxu1 }
 0x760   :  { %v2574_v56 = vadd.f32 %v2573_v54, %v2560_v40  ;;  %v2615_v61 = vpop.f32.mrf.mxu0  ;;  %v7119_v40 = vld [vmem:[%s9123_s3 + $0x19] ss:$0 sm:$0xff] }
 0x767   :  { %v2575_v35 = vpop.f32.mrf.mxu1 }
 0x768   :  { %v2576_v39 = vadd.f32 %v2575_v35, %v2562_v36  ;;  %v2617_v1 = vpop.f32.mrf.mxu0 }
 0x76b   :  { %v2587_v58 = vpop.f32.mrf.mxu2 }
 0x76c   :  { %v2588_v60 = vadd.f32 %v2587_v58, %v2574_v56  ;;  %v2601_v18 = vpop.f32.mrf.mxu3 }
 0x76e   :  { %v2602_v47 = vadd.f32 %v2601_v18, %v2588_v60 }
 0x770   :  { %v2616_v38 = vadd.f32 %v2615_v61, %v2602_v47  ;;  %v7120_v47 = vld [vmem:[%s9123_s3 + $0x1a] ss:$0 sm:$0xff] }
 0x772   :  { %v2622_v11 = vadd.f32 %v7117_v62, %v2616_v38  ;;  %v7121_v38 = vld [vmem:[%s9123_s3 + $0x1b] ss:$0 sm:$0xff] }
 0x773   :  { %v2589_v23 = vpop.f32.mrf.mxu2 }
 0x774   :  { %v2590_v30 = vadd.f32 %v2589_v23, %v2576_v39  ;;  %v2624_v6 = vadd.f32 %v2622_v11, %v7608_v34  ;;  %v2603_v0 = vpop.f32.mrf.mxu3  ;;  %v7122_v39 = vld [vmem:[%s9123_s3 + $0x1c] ss:$0 sm:$0xff] }
 0x776   :  { %v2604_v19 = vadd.f32 %v2603_v0, %v2590_v30  ;;  %v2628_v24 = vsel %vm82_vm2, %v2624_v6, 0.0 }
 0x777   :  { %2629 = vadd.xlane.f32.xlu1 %v2628_v24 }
 0x778   :  { %v2618_v12 = vadd.f32 %v2617_v1, %v2604_v19 }
 0x77a   :  { %v2623_v49 = vadd.f32 %v7117_v62, %v2618_v12 }
 0x77c   :  { %v2625_v2 = vadd.f32 %v2623_v49, %v7610_v29  ;;  %v6906_v29 = vld [vmem:[%s9121_s1 + $0x40] sm:$0xff] }
 0x77d   :  { %2706 = vmatpush.bf16.msrb.mxu1 %v6906_v29 }
 0x77e   :  { %v2631_v3 = vsel %vm82_vm2, %v2625_v2, 0.0 }
 0x77f   :  { %2632 = vadd.xlane.f32.xlu0 %v2631_v3 }
 0x781   :  { %2707 = vmatpush.bf16.msrb.mxu1 %v6905_v31 }
 0x7ea   :  { %v2630_v55 = vpop.xlane.xlu1 %2629 }
 0x7eb   :  { %v2634_v5 = vmul.f32 %v2630_v55, %v7468_v9 }
 0x7ed   :  { %v2636_v7 = vsub.f32 %v2624_v6, %v2634_v5 }
 0x7ef   :  { %v2638_v8 = vmul.f32 %v2636_v7, %v2636_v7 }
 0x7f1   :  { %v2640_v34 = vsel %vm82_vm2, %v2638_v8, 0.0 }
 0x7f2   :  { %v2633_v10 = vpop.xlane.xlu0 %2632  ;;  %2641 = vadd.xlane.f32.xlu2 %v2640_v34 }
 0x7f3   :  { %v2635_v13 = vmul.f32 %v2633_v10, %v7468_v9 }
 0x7f5   :  { %v2637_v14 = vsub.f32 %v2625_v2, %v2635_v13 }
 0x7f7   :  { %v2639_v16 = vmul.f32 %v2637_v14, %v2637_v14 }
 0x7f9   :  { %v2643_v17 = vsel %vm82_vm2, %v2639_v16, 0.0 }
 0x7fa   :  { %2644 = vadd.xlane.f32.xlu1 %v2643_v17 }
 0x865   :  { %v2642_v21 = vpop.xlane.xlu2 %2641 }
 0x866   :  { %v2646_v22 = vmul.f32 %v2642_v21, %v7468_v9 }
 0x868   :  { %v2648_v28 = vadd.f32 1e-05, %v2646_v22 }
 0x86a   :  { %7169 = vrsqrt.f32 %v2648_v28  ;;  %vm2656_vm8 = vweird.f32 %v2648_v28 }
 0x86d   :  { %v2645_v41 = vpop.xlane.xlu1 %2644 }
 0x86e   :  { %v2647_v42 = vmul.f32 %v2645_v41, %v7468_v9 }
 0x870   :  { %v7170_v43 = vpop.eup %7169  ;;  %v2649_v44 = vadd.f32 1e-05, %v2647_v42 }
 0x871   :  { %v2651_v45 = vmul.f32 %v7170_v43, %v2648_v28  ;;  %vm2657_vm7 = vweird.f32 %v7170_v43 }
 0x872   :  { %7171 = vrsqrt.f32 %v2649_v44  ;;  %vm2658_vm9 = vmor %vm2656_vm8, %vm2657_vm7  ;;  %vm2666_vm13 = vweird.f32 %v2649_v44 }
 0x873   :  { %v2652_v48 = vmul.f32 %v7170_v43, %v2651_v45 }
 0x875   :  { %v2653_v26 = vmul.f32 0.5, %v2652_v48 }
 0x877   :  { %v2654_v46 = vsub.f32 1.5, %v2653_v26 }
 0x878   :  { %v7172_v51 = vpop.eup %7171 }
 0x879   :  { %v2655_v50 = vmul.f32 %v7170_v43, %v2654_v46  ;;  %v2661_v37 = vmul.f32 %v7172_v51, %v2649_v44  ;;  %vm2667_vm10 = vweird.f32 %v7172_v51 }
 0x87a   :  { %vm2668_vm14 = vmor %vm2666_vm13, %vm2667_vm10 }
 0x87b   :  { %v2662_v52 = vmul.f32 %v7172_v51, %v2661_v37  ;;  %v2659_v57 = vsel %vm2658_vm9, %v7170_v43, %v2655_v50 }
 0x87c   :  { %v2670_v54 = vmul.f32 %v2659_v57, %v2636_v7 }
 0x87d   :  { %v2663_v15 = vmul.f32 0.5, %v2662_v52 }
 0x87e   :  { %v2673_v56 = vmul.f32 %v7118_v25, %v2670_v54 }
 0x87f   :  { %v2664_v53 = vsub.f32 1.5, %v2663_v15 }
 0x880   :  { %v8224_v60 = vadd.f32 %v7119_v40, %v2673_v56 }
 0x881   :  { %v2665_v4 = vmul.f32 %v7172_v51, %v2664_v53 }
 0x883   :  { %v2669_v27 = vsel %vm2668_vm14, %v7172_v51, %v2665_v4 }
 0x884   :  { %v2671_v58 = vmul.f32 %v2669_v27, %v2637_v14 }
 0x886   :  { %v2674_v59 = vmul.f32 %v7118_v25, %v2671_v58 }
 0x888   :  { %v8226_v18 = vadd.f32 %v7119_v40, %v2674_v59 }
 0x88a   :  { %v2678_v61 = vpack.c.bf16 %v8226_v18, %v8224_v60 }
 0x88c   :  { %6033 = vmatmul.msk.bf16.vlgmr.msrb.gmra.mxu1 %vm82_vm2, %v2678_v61  ;;  %6042 = vmatmul.msk.bf16.vlgmr.msrb.gmra.mxu2 %vm82_vm2, %v2678_v61 }
 0x88d   :  { %6051 = vmatmul.msk.bf16.vlgmr.msrb.gmra.mxu3 %vm82_vm2, %v2678_v61 }
 0x909   :  { %v2709_v62 = vpop.f32.mrf.mxu1 }
 0x90a   :  { %v2710_v35 = vadd.f32 %v7120_v47, %v2709_v62 }
 0x90c   :  { %v2714_v36 = vpack.c.bf16 %v2710_v35, %v2710_v35 }
 0x90e   :  { %v2913_v11 = vunpack.c.l.b16 %v2714_v36 }
 0x90f   :  { %v2743_v23 = vpop.f32.mrf.mxu2 }
 0x910   :  { %v2914_v30 = vpack.c.b16 %v2913_v11, %v2913_v11  ;;  %v2744_v6 = vadd.f32 %v7121_v38, %v2743_v23  ;;  %v2777_v0 = vpop.f32.mrf.mxu3 }
 0x911   :  { %v2778_v19 = vadd.f32 %v7122_v39, %v2777_v0  ;;  %v2711_v24 = vpop.f32.mrf.mxu1 }
 0x912   :  { %v2748_v1 = vpack.c.bf16 %v2744_v6, %v2744_v6  ;;  %v2712_v12 = vadd.f32 %v7120_v47, %v2711_v24  ;;  %2915 = vrot.lane.b32.xlu1 %v2914_v30, %s7217_s22 }
 0x913   :  { %v8243_v49 = vpack.c.bf16 %v2778_v19, %v2778_v19 }
 0x914   :  { %v2788_v2 = vsel %vm170_vm3, %v2748_v1, 0  ;;  %v2918_v3 = vunpack.c.l.b16 %v2748_v1  ;;  %v2715_v7 = vpack.c.bf16 %v2712_v12, %v2712_v12 }
 0x915   :  { %v2878_v55 = vsel %vm264_vm4, %v8243_v49, 0  ;;  %2797 = vmatpush.bf16.xpose.msra.mxu0 %v2788_v2 }
 0x916   :  { %v2919_v5 = vpack.c.b16 %v2918_v3, %v2918_v3  ;;  %2887 = vmatpush.bf16.msra.mxu2 %v2878_v55  ;;  %v2942_v14 = vunpack.c.l.b16 %v2715_v7 }
 0x917   :  { %v2745_v8 = vpop.f32.mrf.mxu2 }
 0x918   :  { %v2746_v34 = vadd.f32 %v7121_v38, %v2745_v8  ;;  %v2779_v10 = vpop.f32.mrf.mxu3  ;;  %2920 = vrot.lane.b32.xlu0 %v2919_v5, %s7217_s22  ;;  %v2943_v22 = vpack.c.b16 %v2942_v14, %v2942_v14 }
 0x919   :  { %v2780_v13 = vadd.f32 %v7122_v39, %v2779_v10 }
 0x91a   :  { %v2749_v16 = vpack.c.bf16 %v2746_v34, %v2746_v34  ;;  %3070 = vrot.lane.b32.xlu1 %v2914_v30, %s7218_s23 }
 0x91b   :  { %v8250_v17 = vpack.c.bf16 %v2780_v13, %v2780_v13 }
 0x91c   :  { %v2947_v29 = vunpack.c.l.b16 %v2749_v16  ;;  %6052 = vmatmul.msk.bf16.vlgmr.msra.gmra.mxu0 %vm170_vm3, %v2714_v36  ;;  %v2807_v63 = vsel %vm170_vm3, %v2749_v16, 0 }
 0x91d   :  { %2816 = vmatpush.bf16.xpose.msra.mxu1 %v2807_v63  ;;  %v2897_v20 = vsel %vm264_vm4, %v8250_v17, 0 }
 0x91e   :  { %2906 = vmatpush.bf16.msra.mxu3 %v2897_v20  ;;  %v2948_v21 = vpack.c.b16 %v2947_v29, %v2947_v29 }
 0x920   :  { %2949 = vrot.lane.b32.xlu2 %v2948_v21, %s7217_s22  ;;  %2944 = vrot.lane.b32.xlu0 %v2943_v22, %s7217_s22 }
 0x922   :  { %3235 = vrot.lane.b32.xlu1 %v2948_v21, %s7219_s24 }
 0x924   :  { %6053 = vmatmul.msk.bf16.vlgmr.msra.gmra.mxu1 %vm170_vm3, %v2715_v7 }
 0x928   :  { %3072 = vrot.lane.b32.xlu2 %v2919_v5, %s7218_s23  ;;  %3095 = vrot.lane.b32.xlu0 %v2948_v21, %s7218_s23  ;;  %v3023_v21 = vunpack.c.l.b16 %v8243_v49 }
 0x930   :  { %3093 = vrot.lane.b32.xlu2 %v2943_v22, %s7218_s23  ;;  %3212 = vrot.lane.b32.xlu0 %v2919_v5, %s7219_s24 }
 0x938   :  { %3233 = vrot.lane.b32.xlu0 %v2943_v22, %s7219_s24  ;;  %3210 = vrot.lane.b32.xlu2 %v2914_v30, %s7219_s24 }
 0x97a   :  { %v2950_v28 = vpop.permute.xlu2 %2949 }
 0x97b   :  { %v2955_v31 = vsel %vm170_vm3, %v2950_v28, 0  ;;  %v8301_v28 = vpack.c.b16 %v3023_v21, %v3023_v21 }
 0x97c   :  { %2964 = vmatpush.bf16.xpose.msrb.mxu1 %v2955_v31 }
 0x982   :  { %v3073_v33 = vpop.permute.xlu2 %3072 }
 0x983   :  { %v3078_v43 = vsel %vm170_vm3, %v3073_v33, 0  ;;  %v3047_v33 = vunpack.c.l.b16 %v8250_v17 }
 0x984   :  { %v2916_v32 = vpop.permute.xlu1 %2915 }
 0x98a   :  { %v2921_v41 = vpop.permute.xlu0 %2920  ;;  %v3094_v53 = vpop.permute.xlu2 %3093 }
 0x98b   :  { %v2926_v42 = vsel %vm170_vm3, %v2921_v41, 0  ;;  %v8306_v41 = vpack.c.b16 %v3047_v33, %v3047_v33 }
 0x98c   :  { %2935 = vmatpush.bf16.xpose.msrb.mxu0 %v2926_v42  ;;  %v3071_v44 = vpop.permute.xlu1 %3070 }
 0x992   :  { %v2945_v45 = vpop.permute.xlu0 %2944  ;;  %v3211_v56 = vpop.permute.xlu2 %3210 }
 0x993   :  { %6056 = vmatmul.msk.bf16.vlgmr.msrb.gmra.mxu0 %vm170_vm3, %v2916_v32  ;;  %6057 = vmatmul.msk.bf16.vlgmr.msrb.gmra.mxu1 %vm170_vm3, %v2945_v45 }
 0x994   :  { %3087 = vmatpush.bf16.xpose.msra.mxu0 %v3078_v43  ;;  %v3236_v48 = vpop.permute.xlu1 %3235 }
 0x995   :  { %v3241_v37 = vsel %vm170_vm3, %v3236_v48, 0 }
 0x999   :  { %v2799_v26 = vpop.f32.mrf.mxu0 }
 0x99a   :  { %v2822_v46 = vmul.f32 0.35355338, %v2799_v26  ;;  %v3096_v51 = vpop.permute.xlu0 %3095 }
 0x99b   :  { %v3101_v50 = vsel %vm170_vm3, %v3096_v51, 0 }
 0x99c   :  { %3110 = vmatpush.bf16.xpose.msra.mxu1 %v3101_v50  ;;  %v2824_v52 = vsel %vm170_vm3, %v2822_v46, -inf }
 0x99d   :  { %2825 = vmax.xlane.f32.xlu1 %v2824_v52 }
 0x9a1   :  { %v2801_v57 = vpop.f32.mrf.mxu0  ;;  %v2818_v15 = vpop.f32.mrf.mxu1 }
 0x9a2   :  { %v2823_v25 = vmul.f32 0.35355338, %v2818_v15  ;;  %v3213_v54 = vpop.permute.xlu0 %3212 }
 0x9a3   :  { %v3218_v4 = vsel %vm170_vm3, %v3213_v54, 0  ;;  %6060 = vmatmul.msk.bf16.vlgmr.msra.gmra.mxu0 %vm170_vm3, %v3071_v44  ;;  %6061 = vmatmul.msk.bf16.vlgmr.msra.gmra.mxu1 %vm170_vm3, %v3094_v53 }
 0x9a4   :  { %3250 = vmatpush.bf16.xpose.msrb.mxu1 %v3241_v37  ;;  %3227 = vmatpush.bf16.xpose.msrb.mxu0 %v3218_v4  ;;  %v2827_v27 = vsel %vm170_vm3, %v2823_v25, -inf }
 0x9a5   :  { %2828 = vmax.xlane.f32.xlu2 %v2827_v27 }
 0x9a9   :  { %v2820_v40 = vpop.f32.mrf.mxu1 }
 0x9aa   :  { %v3234_v58 = vpop.permute.xlu0 %3233 }
 0x9b3   :  { %6064 = vmatmul.msk.bf16.vlgmr.msrb.gmra.mxu0 %vm170_vm3, %v3211_v56  ;;  %6065 = vmatmul.msk.bf16.vlgmr.msrb.gmra.mxu1 %vm170_vm3, %v3234_v58 }
 0xa10   :  { %v2966_v59 = vpop.f32.mrf.mxu1  ;;  %v2826_v61 = vpop.xlane.xlu1 %2825 }
 0xa11   :  { %v2971_v47 = vmul.f32 0.35355338, %v2966_v59  ;;  %v2830_v62 = vsub.f32 %v2822_v46, %v2826_v61  ;;  %v2937_v35 = vpop.f32.mrf.mxu0 }
 0xa12   :  { %v2970_v36 = vmul.f32 0.35355338, %v2937_v35 }
 0xa13   :  { %v2832_v38 = vmul.f32 1.442695, %v2830_v62  ;;  %v2975_v39 = vsel %vm170_vm3, %v2971_v47, -inf }
 0xa14   :  { %2976 = vmax.xlane.f32.xlu1 %v2975_v39  ;;  %v2972_v11 = vsel %vm170_vm3, %v2970_v36, -inf }
 0xa15   :  { %7173 = vpow2.f32 %v2832_v38  ;;  %2973 = vmax.xlane.f32.xlu0 %v2972_v11 }
 0xa18   :  { %v2968_v23 = vpop.f32.mrf.mxu1  ;;  %v2829_v30 = vpop.xlane.xlu2 %2828 }
 0xa19   :  { %v2831_v6 = vsub.f32 %v2823_v25, %v2829_v30  ;;  %v2939_v0 = vpop.f32.mrf.mxu0 }
 0xa1b   :  { %v8282_v19 = vpop.eup %7173  ;;  %v2834_v24 = vmul.f32 1.442695, %v2831_v6 }
 0xa1c   :  { %v2836_v1 = vsel %vm170_vm3, %v8282_v19, 0.0 }
 0xa1d   :  { %7175 = vpow2.f32 %v2834_v24  ;;  %2837 = vadd.xlane.f32.xlu0 %v2836_v1 }
 0xa20   :  { %v3112_v12 = vpop.f32.mrf.mxu1 }
 0xa21   :  { %v3089_v2 = vpop.f32.mrf.mxu0  ;;  %v3117_v3 = vmul.f32 0.35355338, %v3112_v12 }
 0xa22   :  { %v3116_v55 = vmul.f32 0.35355338, %v3089_v2 }
 0xa23   :  { %v8286_v5 = vpop.eup %7175  ;;  %v3121_v7 = vsel %vm170_vm3, %v3117_v3, -inf }
 0xa24   :  { %v3118_v8 = vsel %vm170_vm3, %v3116_v55, -inf  ;;  %v2839_v34 = vsel %vm170_vm3, %v8286_v5, 0.0 }
 0xa25   :  { %3119 = vmax.xlane.f32.xlu2 %v3118_v8  ;;  %2840 = vadd.xlane.f32.xlu1 %v2839_v34 }
 0xa26   :  { %3122 = vmax.xlane.f32.xlu0 %v3121_v7 }
 0xa28   :  { %v3114_v10 = vpop.f32.mrf.mxu1 }
 0xa29   :  { %v3091_v13 = vpop.f32.mrf.mxu0 }
 0xa30   :  { %v3252_v14 = vpop.f32.mrf.mxu1 }
 0xa31   :  { %v3229_v16 = vpop.f32.mrf.mxu0  ;;  %v8292_v29 = vmul.f32 0.35355338, %v3252_v14 }
 0xa32   :  { %v8294_v63 = vmul.f32 0.35355338, %v3229_v16 }
 0xa33   :  { %v3261_v20 = vsel %vm170_vm3, %v8292_v29, -inf }
 0xa34   :  { %3262 = vmax.xlane.f32.xlu2 %v3261_v20  ;;  %v3258_v22 = vsel %vm170_vm3, %v8294_v63, -inf }
 0xa35   :  { %3259 = vmax.xlane.f32.xlu1 %v3258_v22 }
 0xa38   :  { %v3254_v31 = vpop.f32.mrf.mxu1 }
 0xa39   :  { %v3231_v32 = vpop.f32.mrf.mxu0 }
 0xa3a   :  { %3025 = vrot.lane.b32.xlu0 %v8301_v28, %s7217_s22 }
 0xa4e   :  { %3049 = vrot.lane.b32.xlu1 %v8306_v41, %s7217_s22 }
 0xa87   :  { %v2977_v49 = vpop.xlane.xlu1 %2976 }
 0xa88   :  { %v2979_v42 = vsub.f32 %v2971_v47, %v2977_v49  ;;  %v2974_v43 = vpop.xlane.xlu0 %2973 }
 0xa89   :  { %v2978_v44 = vsub.f32 %v2970_v36, %v2974_v43 }
 0xa8a   :  { %v2982_v45 = vmul.f32 1.442695, %v2979_v42 }
 0xa8b   :  { %v2980_v48 = vmul.f32 1.442695, %v2978_v44 }
 0xa8c   :  { %7177 = vpow2.f32 %v2982_v45 }
 0xa8d   :  { %7179 = vpow2.f32 %v2980_v48 }
 0xa90   :  { %v2838_v26 = vpop.xlane.xlu0 %2837 }
 0xa91   :  { %7181 = vrcp.f32 %v2838_v26  ;;  %v2853_v27 = vand.u32 2147483648, %v2838_v26  ;;  %v2851_v58 = vand.u32 2147483647, %v2838_v26  ;;  %vm2847_vm0 = vweird.f32 %v2838_v26 }
 0xa92   :  { %v8310_v46 = vpop.eup %7177 }
 0xa93   :  { %v8312_v51 = vpop.eup %7179  ;;  %v2987_v17 = vsel %vm170_vm3, %v8310_v46, 0.0  ;;  %v2854_v62 = vor.u32 1.1754944e-38, %v2853_v27  ;;  %vm2852_vm5 = vcmp.eq.f32.partialorder %v2851_v58, 8.507059e+37 }
 0xa94   :  { %2988 = vadd.xlane.f32.xlu0 %v2987_v17  ;;  %v2984_v50 = vsel %vm170_vm3, %v8312_v51, 0.0 }
 0xa95   :  { %2985 = vadd.xlane.f32.xlu2 %v2984_v50 }
 0xa97   :  { %v7182_v37 = vpop.eup %7181 }
 0xa98   :  { %v2843_v52 = vmul.f32 %v7182_v37, %v2838_v26  ;;  %v3120_v57 = vpop.xlane.xlu2 %3119  ;;  %v2841_v15 = vpop.xlane.xlu1 %2840  ;;  %vm2848_vm15 = vweird.f32 %v7182_v37 }
 0xa99   :  { %v3124_v53 = vsub.f32 %v3116_v55, %v3120_v57  ;;  %7183 = vrcp.f32 %v2841_v15  ;;  %v3123_v25 = vpop.xlane.xlu0 %3122  ;;  %vm2849_vm1 = vmor %vm2847_vm0, %vm2848_vm15  ;;  %v2866_v30 = vand.u32 2147483647, %v2841_v15  ;;  %v2868_v6 = vand.u32 2147483648, %v2841_v15 }
 0xa9a   :  { %v2844_v54 = vsub.f32 1.0, %v2843_v52  ;;  %v3125_v4 = vsub.f32 %v3117_v3, %v3123_v25  ;;  %vm2862_vm7 = vweird.f32 %v2841_v15 }
 0xa9b   :  { %v3126_v40 = vmul.f32 1.442695, %v3124_v53  ;;  %vm2867_vm9 = vcmp.eq.f32.partialorder %v2866_v30, 8.507059e+37 }
 0xa9c   :  { %v2845_v56 = vmul.f32 %v7182_v37, %v2844_v54  ;;  %v3128_v59 = vmul.f32 1.442695, %v3125_v4 }
 0xa9d   :  { %7185 = vpow2.f32 %v3126_v40 }
 0xa9e   :  { %v2846_v61 = vadd.f32 %v7182_v37, %v2845_v56  ;;  %7187 = vpow2.f32 %v3128_v59 }
 0xa9f   :  { %v7184_v47 = vpop.eup %7183 }
 0xaa0   :  { %v2850_v35 = vsel %vm2849_vm1, %v7182_v37, %v2846_v61  ;;  %v2858_v36 = vmul.f32 %v7184_v47, %v2841_v15  ;;  %vm2863_vm6 = vweird.f32 %v7184_v47 }
 0xaa1   :  { %v2855_v38 = vsel %vm2852_vm5, %v2854_v62, %v2850_v35  ;;  %vm2864_vm8 = vmor %vm2862_vm7, %vm2863_vm6 }
 0xaa2   :  { %v2856_v39 = vmul.f32 %v8282_v19, %v2855_v38  ;;  %v2859_v11 = vsub.f32 1.0, %v2858_v36  ;;  %v2869_v19 = vor.u32 1.1754944e-38, %v2868_v6 }
 0xaa3   :  { %v8319_v23 = vpop.eup %7185 }
 0xaa4   :  { %v8321_v0 = vpop.eup %7187  ;;  %v2872_v24 = vpack.c.bf16 %v2856_v39, %v2856_v39  ;;  %v2860_v1 = vmul.f32 %v7184_v47, %v2859_v11  ;;  %v3130_v12 = vsel %vm170_vm3, %v8319_v23, 0.0 }
 0xaa5   :  { %3131 = vadd.xlane.f32.xlu1 %v3130_v12  ;;  %v3133_v2 = vsel %vm170_vm3, %v8321_v0, 0.0 }
 0xaa6   :  { %v2861_v3 = vadd.f32 %v7184_v47, %v2860_v1  ;;  %3134 = vadd.xlane.f32.xlu2 %v3133_v2  ;;  %6054 = vmatmul.msk.bf16.vlgmr.msra.gmra.mxu2 %vm170_vm3, %v2872_v24 }
 0xaa7   :  { %v3263_v7 = vpop.xlane.xlu2 %3262 }
 0xaa8   :  { %v2865_v55 = vsel %vm2864_vm8, %v7184_v47, %v2861_v3  ;;  %v3260_v8 = vpop.xlane.xlu1 %3259  ;;  %3168 = vrot.lane.b32.xlu0 %v8301_v28, %s7218_s23  ;;  %v3265_v14 = vsub.f32 %v8292_v29, %v3263_v7 }
 0xaa9   :  { %v2870_v34 = vsel %vm2867_vm9, %v2869_v19, %v2865_v55  ;;  %v3264_v10 = vsub.f32 %v8294_v63, %v3260_v8 }
 0xaaa   :  { %v2871_v13 = vmul.f32 %v8286_v5, %v2870_v34  ;;  %v3268_v31 = vmul.f32 1.442695, %v3265_v14 }
 0xaab   :  { %v3266_v16 = vmul.f32 1.442695, %v3264_v10 }
 0xaac   :  { %v2873_v20 = vpack.c.bf16 %v2871_v13, %v2871_v13  ;;  %v3026_v21 = vpop.permute.xlu0 %3025 }
 0xaad   :  { %7189 = vpow2.f32 %v3266_v16  ;;  %v3031_v22 = vsel %vm264_vm4, %v3026_v21, 0 }
 0xaae   :  { %3040 = vmatpush.bf16.msrb.mxu2 %v3031_v22  ;;  %6055 = vmatmul.msk.bf16.vlgmr.msra.gmra.mxu3 %vm170_vm3, %v2873_v20  ;;  %7191 = vpow2.f32 %v3268_v31 }
 0xab0   :  { %3329 = vrot.lane.b32.xlu0 %v8306_v41, %s7219_s24 }
 0xab3   :  { %v8337_v32 = vpop.eup %7189 }
 0xab4   :  { %v3270_v5 = vsel %vm170_vm3, %v8337_v32, 0.0  ;;  %v8341_v29 = vpop.eup %7191 }
 0xab5   :  { %3271 = vadd.xlane.f32.xlu2 %v3270_v5  ;;  %v3273_v63 = vsel %vm170_vm3, %v8341_v29, 0.0 }
 0xabd   :  { %3274 = vadd.xlane.f32.xlu2 %v3273_v63 }
 0xabe   :  { %3308 = vrot.lane.b32.xlu1 %v8301_v28, %s7219_s24 }
 0xac0   :  { %v3050_v33 = vpop.permute.xlu1 %3049 }
 0xac1   :  { %v3055_v49 = vsel %vm264_vm4, %v3050_v33, 0 }
 0xac2   :  { %3064 = vmatpush.bf16.msrb.mxu3 %v3055_v49 }
 0xad5   :  { %3189 = vrot.lane.b32.xlu2 %v8306_v41, %s7218_s23 }
 0xb07   :  { %v2989_v42 = vpop.xlane.xlu0 %2988 }
 0xb08   :  { %7193 = vrcp.f32 %v2989_v42  ;;  %v2986_v43 = vpop.xlane.xlu2 %2985  ;;  %v3016_v50 = vand.u32 2147483648, %v2989_v42  ;;  %v3014_v28 = vand.u32 2147483647, %v2989_v42  ;;  %vm3010_vm14 = vweird.f32 %v2989_v42 }
 0xb09   :  { %7195 = vrcp.f32 %v2986_v43  ;;  %v3001_v57 = vand.u32 2147483648, %v2986_v43  ;;  %v2999_v53 = vand.u32 2147483647, %v2986_v43  ;;  %vm2995_vm0 = vweird.f32 %v2986_v43 }
 0xb0a   :  { %v3017_v41 = vor.u32 1.1754944e-38, %v3016_v50  ;;  %vm3015_vm1 = vcmp.eq.f32.partialorder %v3014_v28, 8.507059e+37 }
 0xb0b   :  { %v3002_v27 = vor.u32 1.1754944e-38, %v3001_v57  ;;  %vm3000_vm6 = vcmp.eq.f32.partialorder %v2999_v53, 8.507059e+37 }
 0xb0e   :  { %v7194_v44 = vpop.eup %7193 }
 0xb0f   :  { %v7196_v45 = vpop.eup %7195  ;;  %v3006_v48 = vmul.f32 %v7194_v44, %v2989_v42  ;;  %vm3011_vm10 = vweird.f32 %v7194_v44 }
 0xb10   :  { %v2991_v26 = vmul.f32 %v7196_v45, %v2986_v43  ;;  %vm2996_vm13 = vweird.f32 %v7196_v45  ;;  %vm3012_vm15 = vmor %vm3010_vm14, %vm3011_vm10 }
 0xb11   :  { %v3007_v17 = vsub.f32 1.0, %v3006_v48  ;;  %vm2997_vm5 = vmor %vm2995_vm0, %vm2996_vm13 }
 0xb12   :  { %v2992_v37 = vsub.f32 1.0, %v2991_v26 }
 0xb13   :  { %v3008_v52 = vmul.f32 %v7194_v44, %v3007_v17 }
 0xb14   :  { %v2993_v15 = vmul.f32 %v7196_v45, %v2992_v37 }
 0xb15   :  { %v3009_v25 = vadd.f32 %v7194_v44, %v3008_v52 }
 0xb16   :  { %v2994_v54 = vadd.f32 %v7196_v45, %v2993_v15 }
 0xb17   :  { %v3013_v4 = vsel %vm3012_vm15, %v7194_v44, %v3009_v25 }
 0xb18   :  { %v3018_v40 = vsel %vm3015_vm1, %v3017_v41, %v3013_v4  ;;  %v2998_v56 = vsel %vm2997_vm5, %v7196_v45, %v2994_v54  ;;  %v3132_v58 = vpop.xlane.xlu1 %3131 }
 0xb19   :  { %v3019_v59 = vmul.f32 %v8310_v46, %v3018_v40  ;;  %v3003_v61 = vsel %vm3000_vm6, %v3002_v27, %v2998_v56  ;;  %7197 = vrcp.f32 %v3132_v58  ;;  %v3135_v47 = vpop.xlane.xlu2 %3134  ;;  %v3147_v1 = vand.u32 2147483648, %v3132_v58 }
 0xb1a   :  { %v3004_v62 = vmul.f32 %v8312_v51, %v3003_v61  ;;  %7199 = vrcp.f32 %v3135_v47  ;;  %v3169_v35 = vpop.permute.xlu0 %3168  ;;  %v3145_v51 = vand.u32 2147483647, %v3132_v58  ;;  %vm3141_vm8 = vweird.f32 %v3132_v58 }
 0xb1b   :  { %v3021_v36 = vpack.c.bf16 %v3019_v59, %v3019_v59  ;;  %v3174_v39 = vsel %vm264_vm4, %v3169_v35, 0  ;;  %v3148_v19 = vor.u32 1.1754944e-38, %v3147_v1  ;;  %v3162_v20 = vand.u32 2147483648, %v3135_v47 }
 0xb1c   :  { %v3020_v38 = vpack.c.bf16 %v3004_v62, %v3004_v62  ;;  %3183 = vmatpush.bf16.msra.mxu2 %v3174_v39  ;;  %vm3146_vm10 = vcmp.eq.f32.partialorder %v3145_v51, 8.507059e+37  ;;  %vm3156_vm14 = vweird.f32 %v3135_v47  ;;  %v3160_v22 = vand.u32 2147483647, %v3135_v47 }
 0xb1d   :  { %6059 = vmatmul.msk.bf16.vlgmr.msrb.gmra.mxu3 %vm170_vm3, %v3021_v36  ;;  %v3163_v43 = vor.u32 1.1754944e-38, %v3162_v20 }
 0xb1e   :  { %6058 = vmatmul.msk.bf16.vlgmr.msrb.gmra.mxu2 %vm170_vm3, %v3020_v38  ;;  %vm3161_vm0 = vcmp.eq.f32.partialorder %v3160_v22, 8.507059e+37 }
 0xb1f   :  { %v7198_v11 = vpop.eup %7197 }
 0xb20   :  { %v7200_v30 = vpop.eup %7199  ;;  %v3137_v6 = vmul.f32 %v7198_v11, %v3132_v58  ;;  %vm3142_vm7 = vweird.f32 %v7198_v11 }
 0xb21   :  { %v3152_v46 = vmul.f32 %v7200_v30, %v3135_v47  ;;  %vm3143_vm9 = vmor %vm3141_vm8, %vm3142_vm7  ;;  %vm3157_vm13 = vweird.f32 %v7200_v30 }
 0xb22   :  { %v3138_v24 = vsub.f32 1.0, %v3137_v6  ;;  %vm3158_vm15 = vmor %vm3156_vm14, %vm3157_vm13  ;;  %v3330_v28 = vpop.permute.xlu0 %3329 }
 0xb23   :  { %v3153_v2 = vsub.f32 1.0, %v3152_v46  ;;  %v3335_v27 = vsel %vm264_vm4, %v3330_v28, 0 }
 0xb24   :  { %v3139_v12 = vmul.f32 %v7198_v11, %v3138_v24 }
 0xb25   :  { %v3154_v34 = vmul.f32 %v7200_v30, %v3153_v2 }
 0xb26   :  { %v3140_v3 = vadd.f32 %v7198_v11, %v3139_v12 }
 0xb27   :  { %v3155_v16 = vadd.f32 %v7200_v30, %v3154_v34  ;;  %v6912_v34 = vld [vmem:[%s9121_s1 + $0x80] sm:$0xff] }
 0xb28   :  { %v3144_v55 = vsel %vm3143_vm9, %v7198_v11, %v3140_v3  ;;  %v3272_v7 = vpop.xlane.xlu2 %3271  ;;  %3408 = vmatpush.bf16.msra.mxu0 %v6912_v34 }
 0xb29   :  { %v3149_v8 = vsel %vm3146_vm10, %v3148_v19, %v3144_v55  ;;  %7201 = vrcp.f32 %v3272_v7  ;;  %v8355_v10 = vpop.f32.mrf.mxu2  ;;  %v3159_v33 = vsel %vm3158_vm15, %v7200_v30, %v3155_v16  ;;  %v3287_v45 = vand.u32 2147483648, %v3272_v7 }
 0xb2a   :  { %v3150_v13 = vmul.f32 %v8319_v23, %v3149_v8  ;;  %v3164_v48 = vsel %vm3161_vm0, %v3163_v43, %v3159_v33  ;;  %v3285_v17 = vand.u32 2147483647, %v3272_v7  ;;  %vm3281_vm5 = vweird.f32 %v3272_v7 }
 0xb2b   :  { %v3165_v52 = vmul.f32 %v8321_v0, %v3164_v48  ;;  %v3288_v57 = vor.u32 1.1754944e-38, %v3287_v45 }
 0xb2c   :  { %v3166_v14 = vpack.c.bf16 %v3150_v13, %v3150_v13  ;;  %vm3286_vm7 = vcmp.eq.f32.partialorder %v3285_v17, 8.507059e+37  ;;  %v6911_v13 = vld [vmem:[%s9121_s1 + $0x78] sm:$0xff] }
 0xb2d   :  { %v3167_v58 = vpack.c.bf16 %v3165_v52, %v3165_v52  ;;  %3409 = vmatpush.bf16.msra.mxu0 %v6911_v13 }
 0xb2e   :  { %6062 = vmatmul.msk.bf16.vlgmr.msra.gmra.mxu2 %vm170_vm3, %v3166_v14 }
 0xb2f   :  { %v7202_v21 = vpop.eup %7201 }
 0xb30   :  { %v3277_v31 = vmul.f32 %v7202_v21, %v3272_v7  ;;  %v3275_v5 = vpop.xlane.xlu2 %3274  ;;  %v3309_v63 = vpop.permute.xlu1 %3308  ;;  %vm3282_vm1 = vweird.f32 %v7202_v21 }
 0xb31   :  { %7203 = vrcp.f32 %v3275_v5  ;;  %v2891_v49 = vpop.f32.mrf.mxu2  ;;  %v8359_v42 = vpop.f32.mrf.mxu3  ;;  %v3314_v44 = vsel %vm264_vm4, %v3309_v63, 0  ;;  %vm3283_vm6 = vmor %vm3281_vm5, %vm3282_vm1  ;;  %v3302_v47 = vand.u32 2147483648, %v3275_v5  ;;  %vm3296_vm9 = vweird.f32 %v3275_v5 }
 0xb32   :  { %v3278_v23 = vsub.f32 1.0, %v3277_v31  ;;  %3323 = vmatpush.bf16.msrb.mxu2 %v3314_v44  ;;  %v3300_v62 = vand.u32 2147483647, %v3275_v5 }
 0xb33   :  { %v3303_v36 = vor.u32 1.1754944e-38, %v3302_v47  ;;  %v6114_v47 = vld [vmem:[%s9124_s2 + $0x1c0] sm:$0xf0] }
 0xb34   :  { %v3279_v26 = vmul.f32 %v7202_v21, %v3278_v23 }
 0xb36   :  { %v3280_v50 = vadd.f32 %v7202_v21, %v3279_v26 }
 0xb37   :  { %v7204_v37 = vpop.eup %7203 }
 0xb38   :  { %v3284_v15 = vsel %vm3283_vm6, %v7202_v21, %v3280_v50  ;;  %v3292_v53 = vmul.f32 %v7204_v37, %v3275_v5  ;;  %v3190_v25 = vpop.permute.xlu2 %3189  ;;  %vm3297_vm8 = vweird.f32 %v7204_v37 }
 0xb39   :  { %v3289_v41 = vsel %vm3286_vm7, %v3288_v57, %v3284_v15  ;;  %v3195_v54 = vsel %vm264_vm4, %v3190_v25, 0  ;;  %v2910_v4 = vpop.f32.mrf.mxu3  ;;  %vm3298_vm10 = vmor %vm3296_vm9, %vm3297_vm8  ;;  %vm3301_vm4 = vcmp.eq.f32.partialorder %v3300_v62, 8.507059e+37  ;;  %v6120_v62 = vld [vmem:[%s9124_s2 + $0x188] sm:$0xf]  ;;  %vm5300_vm9 = vcmask 7168  }
 0xb3a   :  { %v3290_v40 = vmul.f32 %v8337_v32, %v3289_v41  ;;  %v3293_v56 = vsub.f32 1.0, %v3292_v53  ;;  %3204 = vmatpush.bf16.msra.mxu3 %v3195_v54 }
 0xb3c   :  { %v3306_v0 = vpack.c.bf16 %v3290_v40, %v3290_v40  ;;  %v3294_v59 = vmul.f32 %v7204_v37, %v3293_v56 }
 0xb3d   :  { %6063 = vmatmul.msk.bf16.vlgmr.msra.gmra.mxu3 %vm170_vm3, %v3167_v58  ;;  %v6112_v58 = vld [vmem:[%s9124_s2 + $0x180] sm:$0xf] }
 0xb3e   :  { %3344 = vmatpush.bf16.msrb.mxu3 %v3335_v27  ;;  %v3295_v61 = vadd.f32 %v7204_v37, %v3294_v59  ;;  %6066 = vmatmul.msk.bf16.vlgmr.msrb.gmra.mxu2 %vm170_vm3, %v3306_v0  ;;  %v6925_v0 = vld [vmem:[%s9124_s2 + $0x1bc] sm:$0xf0]  ;;  %v6921_v59 = vld [vmem:[%s9124_s2 + $0x184] sm:$0xf] }
 0xb40   :  { %v3299_v35 = vsel %vm3298_vm10, %v7204_v37, %v3295_v61  ;;  %v6113_v61 = vor.u32 %v6925_v0, %v6112_v58 }
 0xb41   :  { %v3304_v32 = vsel %vm3301_vm4, %v3303_v36, %v3299_v35  ;;  %v6926_v35 = vld [vmem:[%s9124_s2 + $0x1c4] sm:$0xf0] }
 0xb42   :  { %v3305_v38 = vmul.f32 %v8341_v29, %v3304_v32  ;;  %v6117_v32 = vor.u32 %v6921_v59, %v6114_v47  ;;  %3595 = vmatpush.bf16.msra.mxu1 %v6113_v61 }
 0xb44   :  { %v3307_v39 = vpack.c.bf16 %v3305_v38, %v3305_v38  ;;  %v6121_v38 = vor.u32 %v6926_v35, %v6120_v62  ;;  %3609 = vmatpush.bf16.msra.mxu2 %v6117_v32  ;;  %v7124_v62 = vld [vmem:[%s9123_s3 + $0x1e] ss:$0 sm:$0xff] }
 0xb46   :  { %3623 = vmatpush.bf16.msra.mxu3 %v6121_v38  ;;  %v7125_v38 = vld [vmem:[%s9123_s3 + $0x1f] ss:$0 sm:$0xff] }
 0xb4d   :  { %6067 = vmatmul.msk.bf16.vlgmr.msrb.gmra.mxu3 %vm170_vm3, %v3307_v39  ;;  %v6922_v39 = vld [vmem:[%s9124_s2 + $0x18c] sm:$0xf] }
 0xba0   :  { %v3066_v11 = vpop.f32.mrf.mxu3 }
 0xba1   :  { %v3042_v30 = vpop.f32.mrf.mxu2 }
 0xba2   :  { %v7095_v6 = vpack.i.bf16 %v3066_v11, %v3042_v30  ;;  %v6122_v11 = vld [vmem:[%s9124_s2 + $0x1c8] sm:$0xf0] }
 0xba4   :  { %7096 = vrot.lane.b32.xlu1 %v7095_v6, %s7220_s25  ;;  %v6125_v6 = vor.u32 %v6922_v39, %v6122_v11 }
 0xba6   :  { %3637 = vmatpush.bf16.msrb.mxu0 %v6125_v6  ;;  %v6185_v6 = vld [vmem:[%s9124_s2 + $0x1a0] sm:$0xf] }
 0xba8   :  { %v3068_v46 = vpop.f32.mrf.mxu3 }
 0xba9   :  { %v3044_v24 = vpop.f32.mrf.mxu2  ;;  %v6080_v46 = vld [vmem:[%s9124_s2 + $0x100] sm:$0xf] }
 0xbaa   :  { %v6917_v24 = vld [vmem:[%s9124_s2 + $0x13c] sm:$0xf0] }
 0xbb1   :  { %v3185_v1 = vpop.f32.mrf.mxu2 }
 0xbb9   :  { %v3187_v12 = vpop.f32.mrf.mxu2 }
 0xbc0   :  { %v3206_v51 = vpop.f32.mrf.mxu3 }
 0xbc1   :  { %v7100_v2 = vpack.i.bf16 %v3206_v51, %v3185_v1  ;;  %v3325_v3 = vpop.f32.mrf.mxu2  ;;  %v6913_v1 = vld [vmem:[%s9124_s2 + $0x104] sm:$0xf]  ;;  %v6081_v51 = vor.u32 %v6917_v24, %v6080_v46 }
 0xbc2   :  { %v7001_v46 = vld [vmem:[%s9124_s2 + $0x1a4] sm:$0xf] }
 0xbc3   :  { %7101 = vrot.lane.b32.xlu0 %v7100_v2, %s7221_s26  ;;  %v6082_v2 = vld [vmem:[%s9124_s2 + $0x140] sm:$0xf0]  ;;  %3596 = vmatpush.bf16.msra.mxu1 %v6081_v51  ;;  %v7006_v51 = vld [vmem:[%s9124_s2 + $0x1e4] sm:$0xf0] }
 0xbc4   :  { %v6187_v24 = vld [vmem:[%s9124_s2 + $0x1e0] sm:$0xf0] }
 0xbc8   :  { %v3208_v19 = vpop.f32.mrf.mxu3 }
 0xbc9   :  { %v3327_v55 = vpop.f32.mrf.mxu2  ;;  %v6085_v19 = vor.u32 %v6913_v1, %v6082_v2  ;;  %v7002_v2 = vld [vmem:[%s9124_s2 + $0x1ac] sm:$0xf] }
 0xbca   :  { %v6918_v55 = vld [vmem:[%s9124_s2 + $0x144] sm:$0xf0] }
 0xbcb   :  { %3610 = vmatpush.bf16.msra.mxu2 %v6085_v19 }
 0xbd0   :  { %v3346_v29 = vpop.f32.mrf.mxu3 }
 0xbd1   :  { %v7105_v7 = vpack.i.bf16 %v3346_v29, %v3325_v3  ;;  %v6088_v3 = vld [vmem:[%s9124_s2 + $0x108] sm:$0xf]  ;;  %v6914_v29 = vld [vmem:[%s9124_s2 + $0x10c] sm:$0xf] }
 0xbd3   :  { %7106 = vrot.lane.b32.xlu1 %v7105_v7, %s7222_s27  ;;  %v6090_v7 = vld [vmem:[%s9124_s2 + $0x148] sm:$0xf0] }
 0xbd4   :  { %v6093_v34 = vor.u32 %v6914_v29, %v6090_v7  ;;  %v6190_v29 = vor.u32 %v7001_v46, %v6187_v24  ;;  %v6153_v7 = vld [vmem:[%s9124_s2 + $0x120] sm:$0xf] }
 0xbd5   :  { %v7012_v46 = vld [vmem:[%s9121_s1 + $0x6a0] sm:$0xff] }
 0xbd6   :  { %3638 = vmatpush.bf16.msrb.mxu0 %v6093_v34  ;;  %v7036_v24 = vld [vmem:[%s9121_s1 + $0x760] sm:$0xff] }
 0xbd8   :  { %v3348_v8 = vpop.f32.mrf.mxu3 }
 0xbd9   :  { %v6089_v8 = vor.u32 %v6918_v55, %v6088_v3  ;;  %v6195_v3 = vld [vmem:[%s9124_s2 + $0x1e8] sm:$0xf0] }
 0xbdb   :  { %3624 = vmatpush.bf16.msra.mxu3 %v6089_v8  ;;  %v6997_v8 = vld [vmem:[%s9124_s2 + $0x15c] sm:$0xf0] }
 0xc16   :  { %v7097_v14 = vpop.permute.xlu1 %7096 }
 0xc17   :  { %v7099_v20 = vunpack.i.h.bf16 %v7097_v14  ;;  %v7098_v21 = vunpack.i.l.bf16 %v7097_v14  ;;  %v6128_v14 = vld [vmem:[%s9124_s2 + $0x190] sm:$0xf] }
 0xc19   :  { %v3375_v63 = vsel %vm170_vm3, %v8359_v42, %v7099_v20  ;;  %v3374_v33 = vsel %vm170_vm3, %v8355_v10, %v7098_v21  ;;  %v7123_v42 = vld [vmem:[%s9123_s3 + $0x1d] ss:$0 sm:$0xff]  ;;  %v6923_v20 = vld [vmem:[%s9124_s2 + $0x194] sm:$0xf] }
 0xc35   :  { %v7102_v16 = vpop.permute.xlu0 %7101 }
 0xc36   :  { %v7104_v22 = vunpack.i.h.bf16 %v7102_v16  ;;  %v7103_v31 = vunpack.i.l.bf16 %v7102_v16  ;;  %v6927_v16 = vld [vmem:[%s9124_s2 + $0x1cc] sm:$0xf0] }
 0xc38   :  { %v3376_v23 = vsel %vm764_vm11, %v3374_v33, %v7103_v31  ;;  %v3377_v44 = vsel %vm764_vm11, %v3375_v63, %v7104_v22  ;;  %v6129_v22 = vor.u32 %v6927_v16, %v6128_v14  ;;  %v6130_v31 = vld [vmem:[%s9124_s2 + $0x1d0] sm:$0xf0]  ;;  %v6928_v63 = vld [vmem:[%s9124_s2 + $0x1d4] sm:$0xf0]  ;;  %v6993_v14 = vld [vmem:[%s9124_s2 + $0x124] sm:$0xf] }
 0xc39   :  { %v6133_v33 = vor.u32 %v6923_v20, %v6130_v31  ;;  %v6155_v16 = vld [vmem:[%s9124_s2 + $0x160] sm:$0xf0]  ;;  %v6161_v20 = vld [vmem:[%s9124_s2 + $0x128] sm:$0xf]  ;;  %v6163_v31 = vld [vmem:[%s9124_s2 + $0x168] sm:$0xf0] }
 0xc3a   :  { %3651 = vmatpush.bf16.msrb.mxu1 %v6129_v22  ;;  %v6994_v22 = vld [vmem:[%s9124_s2 + $0x12c] sm:$0xf] }
 0xc3b   :  { %3665 = vmatpush.bf16.msrb.mxu2 %v6133_v33 }
 0xc45   :  { %v7107_v5 = vpop.permute.xlu1 %7106 }
 0xc46   :  { %v7109_v49 = vunpack.i.h.bf16 %v7107_v5  ;;  %v7108_v43 = vunpack.i.l.bf16 %v7107_v5  ;;  %v6136_v5 = vld [vmem:[%s9124_s2 + $0x198] sm:$0xf] }
 0xc48   :  { %v3378_v45 = vsel %vm767_vm12, %v3376_v23, %v7108_v43  ;;  %v3379_v48 = vsel %vm767_vm12, %v3377_v44, %v7109_v49  ;;  %v6137_v49 = vor.u32 %v6928_v63, %v6136_v5  ;;  %v6924_v43 = vld [vmem:[%s9124_s2 + $0x19c] sm:$0xf]  ;;  %v6096_v44 = vld [vmem:[%s9124_s2 + $0x110] sm:$0xf]  ;;  %v6154_v5 = vor.u32 %v6997_v8, %v6153_v7 }
 0xc49   :  { %v3380_v26 = vpack.c.bf16 %v3379_v48, %v3378_v45  ;;  %v6138_v23 = vld [vmem:[%s9124_s2 + $0x1d8] sm:$0xf0]  ;;  %v6158_v63 = vor.u32 %v6993_v14, %v6155_v16  ;;  %v7034_v7 = vld [vmem:[%s9121_s1 + $0x750] sm:$0xff]  ;;  %v7033_v14 = vld [vmem:[%s9121_s1 + $0x748] sm:$0xff] }
 0xc4a   :  { %3679 = vmatpush.bf16.msrb.mxu3 %v6137_v49  ;;  %v6166_v49 = vor.u32 %v6994_v22, %v6163_v31  ;;  %v7019_v8 = vld [vmem:[%s9121_s1 + $0x6d8] sm:$0xff]  ;;  %v7048_v16 = vld [vmem:[%s9121_s1 + $0x7c0] sm:$0xff]  ;;  %v7026_v22 = vld [vmem:[%s9121_s1 + $0x710] sm:$0xff] }
 0xc4b   :  { %6076 = vmatmul.msk.bf16.vlgmr.msra.gmra.mxu0 %vm82_vm2, %v3380_v26  ;;  %v6141_v26 = vor.u32 %v6924_v43, %v6138_v23  ;;  %v6201_v43 = vld [vmem:[%s9124_s2 + $0x1b0] sm:$0xf]  ;;  %v7047_v31 = vld [vmem:[%s9121_s1 + $0x7b8] sm:$0xff] }
 0xc4c   :  { %v7007_v23 = vld [vmem:[%s9124_s2 + $0x1ec] sm:$0xf0] }
 0xc4d   :  { %3693 = vmatpush.bf16.msra.mxu0 %v6141_v26  ;;  %v7008_v26 = vld [vmem:[%s9124_s2 + $0x1f4] sm:$0xf0] }
 0xcc8   :  { %v3411_v17 = vpop.f32.mrf.mxu0 }
 0xcc9   :  { %v3412_v50 = vadd.f32 %v7123_v42, %v3411_v17  ;;  %v6915_v17 = vld [vmem:[%s9124_s2 + $0x114] sm:$0xf] }
 0xccb   :  { %v3416_v10 = vadd.f32 %v3412_v50, %v8224_v60 }
 0xccd   :  { %v3420_v37 = vsel %vm82_vm2, %v3416_v10, 0.0 }
 0xcce   :  { %3421 = vadd.xlane.f32.xlu0 %v3420_v37  ;;  %v6098_v37 = vld [vmem:[%s9124_s2 + $0x150] sm:$0xf0] }
 0xcd0   :  { %v3413_v52 = vpop.f32.mrf.mxu0 }
 0xcd1   :  { %v3414_v28 = vadd.f32 %v7123_v42, %v3413_v52  ;;  %v6919_v42 = vld [vmem:[%s9124_s2 + $0x14c] sm:$0xf0]  ;;  %v6104_v52 = vld [vmem:[%s9124_s2 + $0x118] sm:$0xf] }
 0xcd3   :  { %v3417_v57 = vadd.f32 %v3414_v28, %v8226_v18  ;;  %v6920_v28 = vld [vmem:[%s9124_s2 + $0x154] sm:$0xf0] }
 0xcd5   :  { %v3423_v15 = vsel %vm82_vm2, %v3417_v57, 0.0 }
 0xcd6   :  { %3424 = vadd.xlane.f32.xlu2 %v3423_v15  ;;  %v6105_v15 = vor.u32 %v6920_v28, %v6104_v52  ;;  %v6999_v52 = vld [vmem:[%s9124_s2 + $0x16c] sm:$0xf0] }
 0xcd8   :  { %3680 = vmatpush.bf16.msrb.mxu3 %v6105_v15  ;;  %v6995_v15 = vld [vmem:[%s9124_s2 + $0x134] sm:$0xf] }
 0xd41   :  { %v3422_v53 = vpop.xlane.xlu0 %3421 }
 0xd42   :  { %v3426_v25 = vmul.f32 %v3422_v53, %v7468_v9  ;;  %v6916_v53 = vld [vmem:[%s9124_s2 + $0x11c] sm:$0xf] }
 0xd44   :  { %v8396_v41 = vsub.f32 %v3416_v10, %v3426_v25  ;;  %v6097_v10 = vor.u32 %v6919_v42, %v6096_v44  ;;  %v6106_v25 = vld [vmem:[%s9124_s2 + $0x158] sm:$0xf0]  ;;  %v7003_v44 = vld [vmem:[%s9124_s2 + $0x1b4] sm:$0xf] }
 0xd45   :  { %v7004_v42 = vld [vmem:[%s9124_s2 + $0x1bc] sm:$0xf] }
 0xd46   :  { %v3430_v54 = vmul.f32 %v8396_v41, %v8396_v41  ;;  %3652 = vmatpush.bf16.msrb.mxu1 %v6097_v10 }
 0xd48   :  { %v3432_v60 = vsel %vm82_vm2, %v3430_v54, 0.0 }
 0xd49   :  { %v3425_v4 = vpop.xlane.xlu2 %3424  ;;  %3433 = vadd.xlane.f32.xlu1 %v3432_v60  ;;  %v6109_v60 = vor.u32 %v6916_v53, %v6106_v25  ;;  %v6171_v53 = vld [vmem:[%s9124_s2 + $0x170] sm:$0xf0]  ;;  %v6177_v25 = vld [vmem:[%s9124_s2 + $0x138] sm:$0xf] }
 0xd4a   :  { %v3427_v27 = vmul.f32 %v3425_v4, %v7468_v9 }
 0xd4b   :  { %3694 = vmatpush.bf16.msra.mxu0 %v6109_v60  ;;  %v6996_v60 = vld [vmem:[%s9124_s2 + $0x13c] sm:$0xf] }
 0xd4c   :  { %v8402_v40 = vsub.f32 %v3417_v57, %v3427_v27  ;;  %v6101_v57 = vor.u32 %v6915_v17, %v6098_v37  ;;  %v6211_v17 = vld [vmem:[%s9124_s2 + $0x1f8] sm:$0xf0]  ;;  %v6169_v37 = vld [vmem:[%s9124_s2 + $0x130] sm:$0xf] }
 0xd4e   :  { %v3431_v18 = vmul.f32 %v8402_v40, %v8402_v40  ;;  %3666 = vmatpush.bf16.msrb.mxu2 %v6101_v57  ;;  %v6214_v57 = vor.u32 %v7004_v42, %v6211_v17  ;;  %v7069_v42 = vld [vmem:[%s9121_s1 + $0x868] sm:$0xff]  ;;  %v7054_v17 = vld [vmem:[%s9121_s1 + $0x7f0] sm:$0xff] }
 0xd50   :  { %v3435_v56 = vsel %vm82_vm2, %v3431_v18, 0.0 }
 0xd51   :  { %3436 = vadd.xlane.f32.xlu0 %v3435_v56 }
 0xdbc   :  { %v3434_v36 = vpop.xlane.xlu1 %3433 }
 0xdbd   :  { %v3438_v30 = vmul.f32 %v3434_v36, %v7468_v9 }
 0xdbf   :  { %v8441_v12 = vadd.f32 1e-05, %v3438_v30 }
 0xdc1   :  { %7205 = vrsqrt.f32 %v8441_v12  ;;  %vm3448_vm11 = vweird.f32 %v8441_v12 }
 0xdc4   :  { %v3437_v13 = vpop.xlane.xlu0 %3436 }
 0xdc5   :  { %v3439_v21 = vmul.f32 %v3437_v13, %v7468_v9  ;;  %v6198_v13 = vor.u32 %v7002_v2, %v6195_v3  ;;  %v7011_v2 = vld [vmem:[%s9121_s1 + $0x698] sm:$0xff] }
 0xdc6   :  { %v7035_v3 = vld [vmem:[%s9121_s1 + $0x758] sm:$0xff] }
 0xdc7   :  { %v7206_v45 = vpop.eup %7205  ;;  %v3441_v48 = vadd.f32 1e-05, %v3439_v21  ;;  %v6998_v21 = vld [vmem:[%s9124_s2 + $0x164] sm:$0xf0] }
 0xdc8   :  { %v3443_v50 = vmul.f32 %v7206_v45, %v8441_v12  ;;  %vm3449_vm3 = vweird.f32 %v7206_v45  ;;  %v6162_v33 = vor.u32 %v6998_v21, %v6161_v20  ;;  %v7072_v20 = vld [vmem:[%s9121_s1 + $0x880] sm:$0xff]  ;;  %v7018_v21 = vld [vmem:[%s9121_s1 + $0x6d0] sm:$0xff] }
 0xdc9   :  { %7207 = vrsqrt.f32 %v3441_v48  ;;  %vm3450_vm12 = vmor %vm3448_vm11, %vm3449_vm3  ;;  %vm3458_vm14 = vweird.f32 %v3441_v48 }
 0xdca   :  { %v3444_v54 = vmul.f32 %v7206_v45, %v3443_v50  ;;  %v6202_v50 = vor.u32 %v7007_v23, %v6201_v43  ;;  %v7064_v43 = vld [vmem:[%s9121_s1 + $0x840] sm:$0xff]  ;;  %v7046_v23 = vld [vmem:[%s9121_s1 + $0x7b0] sm:$0xff] }
 0xdcc   :  { %v3445_v4 = vmul.f32 0.5, %v3444_v54  ;;  %v7000_v54 = vld [vmem:[%s9124_s2 + $0x174] sm:$0xf0] }
 0xdce   :  { %v3446_v27 = vsub.f32 1.5, %v3445_v4  ;;  %v6179_v4 = vld [vmem:[%s9124_s2 + $0x178] sm:$0xf0] }
 0xdcf   :  { %v7208_v18 = vpop.eup %7207 }
 0xdd0   :  { %v3447_v56 = vmul.f32 %v7206_v45, %v3446_v27  ;;  %v3453_v58 = vmul.f32 %v7208_v18, %v3441_v48  ;;  %vm3459_vm13 = vweird.f32 %v7208_v18  ;;  %v6209_v48 = vld [vmem:[%s9124_s2 + $0x1b8] sm:$0xf]  ;;  %v6170_v27 = vor.u32 %v6999_v52, %v6169_v37 }
 0xdd1   :  { %vm3460_vm15 = vmor %vm3458_vm14, %vm3459_vm13  ;;  %v6210_v28 = vor.u32 %v7008_v26, %v6209_v48  ;;  %v7063_v48 = vld [vmem:[%s9121_s1 + $0x838] sm:$0xff]  ;;  %v7045_v26 = vld [vmem:[%s9121_s1 + $0x7a8] sm:$0xff] }
 0xdd2   :  { %v3454_v0 = vmul.f32 %v7208_v18, %v3453_v58  ;;  %v3451_v59 = vsel %vm3450_vm12, %v7206_v45, %v3447_v56  ;;  %v6203_v45 = vld [vmem:[%s9124_s2 + $0x1f0] sm:$0xf0]  ;;  %v6178_v56 = vor.u32 %v7000_v54, %v6177_v25  ;;  %v6182_v58 = vor.u32 %v6996_v60, %v6179_v4  ;;  %v7061_v25 = vld [vmem:[%s9121_s1 + $0x828] sm:$0xff]  ;;  %v7043_v60 = vld [vmem:[%s9121_s1 + $0x798] sm:$0xff] }
 0xdd3   :  { %v3462_v35 = vmul.f32 %v3451_v59, %v8396_v41  ;;  %v7005_v41 = vld [vmem:[%s9124_s2 + $0x1dc] sm:$0xf0]  ;;  %v6206_v10 = vor.u32 %v7003_v44, %v6203_v45  ;;  %v7070_v44 = vld [vmem:[%s9121_s1 + $0x870] sm:$0xff]  ;;  %v7055_v45 = vld [vmem:[%s9121_s1 + $0x7f8] sm:$0xff] }
 0xdd4   :  { %v3455_v61 = vmul.f32 0.5, %v3454_v0  ;;  %v6186_v55 = vor.u32 %v7005_v41, %v6185_v6  ;;  %v7016_v0 = vld [vmem:[%s9121_s1 + $0x6c0] sm:$0xff]  ;;  %v7022_v6 = vld [vmem:[%s9121_s1 + $0x6f0] sm:$0xff]  ;;  %v7067_v4 = vld [vmem:[%s9121_s1 + $0x858] sm:$0xff] }
 0xdd5   :  { %v3465_v39 = vmul.f32 %v7124_v62, %v3462_v35  ;;  %v7040_v59 = vld [vmem:[%s9121_s1 + $0x780] sm:$0xff]  ;;  %v7039_v35 = vld [vmem:[%s9121_s1 + $0x778] sm:$0xff]  ;;  %v7030_v41 = vld [vmem:[%s9121_s1 + $0x730] sm:$0xff] }
 0xdd6   :  { %v3456_v47 = vsub.f32 1.5, %v3455_v61  ;;  %v7024_v61 = vld [vmem:[%s9121_s1 + $0x700] sm:$0xff] }
 0xdd7   :  { %v8533_v1 = vadd.f32 %v7125_v38, %v3465_v39  ;;  %v7038_v39 = vld [vmem:[%s9121_s1 + $0x770] sm:$0xff] }
 0xdd8   :  { %v3457_v36 = vmul.f32 %v7208_v18, %v3456_v47  ;;  %v7032_v47 = vld [vmem:[%s9121_s1 + $0x740] sm:$0xff] }
 0xdda   :  { %v3461_v32 = vsel %vm3460_vm15, %v7208_v18, %v3457_v36  ;;  %v6174_v18 = vor.u32 %v6995_v15, %v6171_v53  ;;  %v7023_v36 = vld [vmem:[%s9121_s1 + $0x6f8] sm:$0xff]  ;;  %v7053_v53 = vld [vmem:[%s9121_s1 + $0x7e8] sm:$0xff] }
 0xddb   :  { %v3463_v11 = vmul.f32 %v3461_v32, %v8402_v40  ;;  %v6193_v40 = vld [vmem:[%s9124_s2 + $0x1a8] sm:$0xf]  ;;  %v7031_v32 = vld [vmem:[%s9121_s1 + $0x738] sm:$0xff] }
 0xddc   :  { %v6194_v34 = vor.u32 %v7006_v51, %v6193_v40  ;;  %v7021_v40 = vld [vmem:[%s9121_s1 + $0x6e8] sm:$0xff] }
 0xddd   :  { %v3466_v30 = vmul.f32 %v7124_v62, %v3463_v11  ;;  %v7015_v62 = vld [vmem:[%s9121_s1 + $0x6b8] sm:$0xff]  ;;  %v7013_v11 = vld [vmem:[%s9121_s1 + $0x6a8] sm:$0xff] }
 0xdde   :  { %v7029_v51 = vld [vmem:[%s9121_s1 + $0x728] sm:$0xff] }
 0xddf   :  { %v8535_v12 = vadd.f32 %v7125_v38, %v3466_v30  ;;  %v7014_v38 = vld [vmem:[%s9121_s1 + $0x6b0] sm:$0xff]  ;;  %v7037_v30 = vld [vmem:[%s9121_s1 + $0x768] sm:$0xff] }
 0xde1   :  { %v8548_v19 = vpack.c.bf16 %v8535_v12, %v8533_v1 }
 0xde3   :  { %6142 = vmatmul.msk.bf16.vlgmr.msra.gmra.mxu1 %vm82_vm2, %v8548_v19  ;;  %6143 = vmatmul.msk.bf16.vlgmr.msra.gmra.mxu2 %vm82_vm2, %v8548_v19 }
 0xde4   :  { %6144 = vmatmul.msk.bf16.vlgmr.msra.gmra.mxu3 %vm82_vm2, %v8548_v19  ;;  %6145 = vmatmul.msk.bf16.vlgmr.msrb.gmra.mxu0 %vm82_vm2, %v8548_v19 }
 0xde5   :  { %3974 = vmatpush.bf16.msra.mxu1 %v6186_v55  ;;  %3988 = vmatpush.bf16.msra.mxu2 %v6190_v29  ;;  %v7028_v55 = vld [vmem:[%s9121_s1 + $0x720] sm:$0xff]  ;;  %v7010_v29 = vld [vmem:[%s9121_s1 + $0x690] sm:$0xff] }
 0xde6   :  { %4002 = vmatpush.bf16.msra.mxu3 %v6194_v34  ;;  %4016 = vmatpush.bf16.msrb.mxu0 %v6198_v13  ;;  %v7027_v34 = vld [vmem:[%s9121_s1 + $0x718] sm:$0xff]  ;;  %v7009_v13 = vld [vmem:[%s9121_s1 + $0x688] sm:$0xff] }
 0xde9   :  { %3975 = vmatpush.bf16.msra.mxu1 %v6154_v5  ;;  %3989 = vmatpush.bf16.msra.mxu2 %v6158_v63  ;;  %v7071_v5 = vld [vmem:[%s9121_s1 + $0x878] sm:$0xff]  ;;  %v7017_v63 = vld [vmem:[%s9121_s1 + $0x6c8] sm:$0xff] }
 0xdea   :  { %4003 = vmatpush.bf16.msra.mxu3 %v6162_v33  ;;  %4017 = vmatpush.bf16.msrb.mxu0 %v6166_v49  ;;  %v7025_v33 = vld [vmem:[%s9121_s1 + $0x708] sm:$0xff]  ;;  %v7056_v49 = vld [vmem:[%s9121_s1 + $0x800] sm:$0xff] }
 0xdf3   :  { %6146 = vmatmul.msk.bf16.vlgmr.msrb.gmra.mxu1 %vm82_vm2, %v8548_v19  ;;  %6147 = vmatmul.msk.bf16.vlgmr.msrb.gmra.mxu2 %vm82_vm2, %v8548_v19 }
 0xdf4   :  { %6148 = vmatmul.msk.bf16.vlgmr.msrb.gmra.mxu3 %vm82_vm2, %v8548_v19  ;;  %6149 = vmatmul.msk.bf16.vlgmr.msra.gmra.mxu0 %vm82_vm2, %v8548_v19 }
 0xdf5   :  { %4030 = vmatpush.bf16.msrb.mxu1 %v6202_v50  ;;  %4044 = vmatpush.bf16.msrb.mxu2 %v6206_v10  ;;  %v7062_v50 = vld [vmem:[%s9121_s1 + $0x830] sm:$0xff]  ;;  %v8795_v10 = vld [vmem:[%s9125_s4 + $0x1] ss:$2 sm:$0xff] }
 0xdf6   :  { %4058 = vmatpush.bf16.msrb.mxu3 %v6210_v28  ;;  %4072 = vmatpush.bf16.msra.mxu0 %v6214_v57  ;;  %v7044_v28 = vld [vmem:[%s9121_s1 + $0x7a0] sm:$0xff]  ;;  %v3490_v15 = vperm.slane %v8795_v10, 0  ;;  %v3493_v54 = vperm.slane %v8795_v10, 3 }
 0xdf7   :  { %v7068_v57 = vld [vmem:[%s9121_s1 + $0x860] sm:$0xff] }
 0xdf9   :  { %4031 = vmatpush.bf16.msrb.mxu1 %v6170_v27  ;;  %4045 = vmatpush.bf16.msrb.mxu2 %v6174_v18 }
 0xdfa   :  { %4059 = vmatpush.bf16.msrb.mxu3 %v6178_v56  ;;  %4073 = vmatpush.bf16.msra.mxu0 %v6182_v58  ;;  %v7052_v58 = vld [vmem:[%s9121_s1 + $0x7e0] sm:$0xff] }
 0xe03   :  { %6215 = vmatmul.msk.bf16.vlgmr.msra.gmra.mxu1 %vm82_vm2, %v8548_v19  ;;  %6216 = vmatmul.msk.bf16.vlgmr.msra.gmra.mxu2 %vm82_vm2, %v8548_v19 }
 0xe04   :  { %6217 = vmatmul.msk.bf16.vlgmr.msra.gmra.mxu3 %vm82_vm2, %v8548_v19  ;;  %6218 = vmatmul.msk.bf16.vlgmr.msrb.gmra.mxu0 %vm82_vm2, %v8548_v19 }
 0xe05   :  { %4616 = vmatpush.bf16.msra.mxu1 %v7016_v0  ;;  %4658 = vmatpush.bf16.msrb.mxu0 %v7040_v59  ;;  %v7060_v0 = vld [vmem:[%s9121_s1 + $0x820] sm:$0xff] }
 0xe06   :  { %4630 = vmatpush.bf16.msra.mxu2 %v7024_v61  ;;  %4644 = vmatpush.bf16.msra.mxu3 %v7032_v47  ;;  %v3491_v47 = vperm.slane %v8795_v10, 1 }
 0xe09   :  { %4617 = vmatpush.bf16.msra.mxu1 %v7015_v62  ;;  %4659 = vmatpush.bf16.msrb.mxu0 %v7039_v35 }
 0xe0a   :  { %4631 = vmatpush.bf16.msra.mxu2 %v7023_v36  ;;  %4645 = vmatpush.bf16.msra.mxu3 %v7031_v32  ;;  %v7042_v36 = vld [vmem:[%s9121_s1 + $0x790] sm:$0xff] }
 0xe0b   :  { %v7066_v32 = vld [vmem:[%s9121_s1 + $0x850] sm:$0xff] }
 0xe0d   :  { %4618 = vmatpush.bf16.msra.mxu1 %v7014_v38  ;;  %4660 = vmatpush.bf16.msrb.mxu0 %v7038_v39  ;;  %v3492_v38 = vperm.slane %v8795_v10, 2 }
 0xe0e   :  { %4632 = vmatpush.bf16.msra.mxu2 %v7022_v6  ;;  %4646 = vmatpush.bf16.msra.mxu3 %v7030_v41  ;;  %v7051_v6 = vld [vmem:[%s9121_s1 + $0x7d8] sm:$0xff] }
 0xe0f   :  { %v7059_v41 = vld [vmem:[%s9121_s1 + $0x818] sm:$0xff] }
 0xe11   :  { %4619 = vmatpush.bf16.msra.mxu1 %v7013_v11  ;;  %4661 = vmatpush.bf16.msrb.mxu0 %v7037_v30 }
 0xe12   :  { %4633 = vmatpush.bf16.msra.mxu2 %v7021_v40  ;;  %4647 = vmatpush.bf16.msra.mxu3 %v7029_v51 }
 0xe13   :  { %6219 = vmatmul.msk.bf16.vlgmr.msrb.gmra.mxu1 %vm82_vm2, %v8548_v19  ;;  %6220 = vmatmul.msk.bf16.vlgmr.msrb.gmra.mxu2 %vm82_vm2, %v8548_v19 }
 0xe14   :  { %6221 = vmatmul.msk.bf16.vlgmr.msrb.gmra.mxu3 %vm82_vm2, %v8548_v19  ;;  %6222 = vmatmul.msk.bf16.vlgmr.msra.gmra.mxu0 %vm82_vm2, %v8548_v19  ;;  %v7020_v19 = vld [vmem:[%s9121_s1 + $0x6e0] sm:$0xff] }
 0xe15   :  { %4620 = vmatpush.bf16.msra.mxu1 %v7012_v46  ;;  %4662 = vmatpush.bf16.msrb.mxu0 %v7036_v24 }
 0xe16   :  { %4634 = vmatpush.bf16.msra.mxu2 %v7020_v19  ;;  %4648 = vmatpush.bf16.msra.mxu3 %v7028_v55 }
 0xe19   :  { %4621 = vmatpush.bf16.msra.mxu1 %v7011_v2  ;;  %4663 = vmatpush.bf16.msrb.mxu0 %v7035_v3  ;;  %v7041_v2 = vld [vmem:[%s9121_s1 + $0x788] sm:$0xff] }
 0xe1a   :  { %4635 = vmatpush.bf16.msra.mxu2 %v7019_v8  ;;  %4649 = vmatpush.bf16.msra.mxu3 %v7027_v34  ;;  %v7065_v3 = vld [vmem:[%s9121_s1 + $0x848] sm:$0xff] }
 0xe1d   :  { %4622 = vmatpush.bf16.msra.mxu1 %v7010_v29  ;;  %4664 = vmatpush.bf16.msrb.mxu0 %v7034_v7 }
 0xe1e   :  { %4636 = vmatpush.bf16.msra.mxu2 %v7018_v21  ;;  %4650 = vmatpush.bf16.msra.mxu3 %v7026_v22 }
 0xe21   :  { %4623 = vmatpush.bf16.msra.mxu1 %v7009_v13  ;;  %4665 = vmatpush.bf16.msrb.mxu0 %v7033_v14  ;;  %v7050_v14 = vld [vmem:[%s9121_s1 + $0x7d0] sm:$0xff] }
 0xe22   :  { %4637 = vmatpush.bf16.msra.mxu2 %v7017_v63  ;;  %4651 = vmatpush.bf16.msra.mxu3 %v7025_v33  ;;  %v3494_v33 = vperm.slane %v8795_v10, 4 }
 0xe25   :  { %4672 = vmatpush.bf16.msrb.mxu1 %v7048_v16  ;;  %4714 = vmatpush.bf16.msra.mxu0 %v7072_v20  ;;  %v7058_v16 = vld [vmem:[%s9121_s1 + $0x810] sm:$0xff] }
 0xe26   :  { %4686 = vmatpush.bf16.msrb.mxu2 %v7056_v49  ;;  %4700 = vmatpush.bf16.msrb.mxu3 %v7064_v43  ;;  %v3497_v43 = vperm.slane %v8795_v10, 7 }
 0xe29   :  { %4673 = vmatpush.bf16.msrb.mxu1 %v7047_v31  ;;  %4715 = vmatpush.bf16.msra.mxu0 %v7071_v5 }
 0xe2a   :  { %4687 = vmatpush.bf16.msrb.mxu2 %v7055_v45  ;;  %4701 = vmatpush.bf16.msrb.mxu3 %v7063_v48 }
 0xe2d   :  { %4674 = vmatpush.bf16.msrb.mxu1 %v7046_v23  ;;  %4716 = vmatpush.bf16.msra.mxu0 %v7070_v44  ;;  %v7049_v23 = vld [vmem:[%s9121_s1 + $0x7c8] sm:$0xff] }
 0xe2e   :  { %4688 = vmatpush.bf16.msrb.mxu2 %v7054_v17  ;;  %4702 = vmatpush.bf16.msrb.mxu3 %v7062_v50  ;;  %v7057_v44 = vld [vmem:[%s9121_s1 + $0x808] sm:$0xff]  ;;  %v3495_v50 = vperm.slane %v8795_v10, 5 }
 0xe31   :  { %4675 = vmatpush.bf16.msrb.mxu1 %v7045_v26  ;;  %4717 = vmatpush.bf16.msra.mxu0 %v7069_v42 }
 0xe32   :  { %4689 = vmatpush.bf16.msrb.mxu2 %v7053_v53  ;;  %4703 = vmatpush.bf16.msrb.mxu3 %v7061_v25 }
 0xe35   :  { %4676 = vmatpush.bf16.msrb.mxu1 %v7044_v28  ;;  %4718 = vmatpush.bf16.msra.mxu0 %v7068_v57  ;;  %v3496_v28 = vperm.slane %v8795_v10, 6 }
 0xe36   :  { %4690 = vmatpush.bf16.msrb.mxu2 %v7052_v58  ;;  %4704 = vmatpush.bf16.msrb.mxu3 %v7060_v0 }
 0xe39   :  { %4677 = vmatpush.bf16.msrb.mxu1 %v7043_v60  ;;  %4719 = vmatpush.bf16.msra.mxu0 %v7067_v4 }
 0xe3a   :  { %4691 = vmatpush.bf16.msrb.mxu2 %v7051_v6  ;;  %4705 = vmatpush.bf16.msrb.mxu3 %v7059_v41 }
 0xe3d   :  { %4678 = vmatpush.bf16.msrb.mxu1 %v7042_v36  ;;  %4720 = vmatpush.bf16.msra.mxu0 %v7066_v32 }
 0xe3e   :  { %4692 = vmatpush.bf16.msrb.mxu2 %v7050_v14  ;;  %4706 = vmatpush.bf16.msrb.mxu3 %v7058_v16  ;;  %v6936_v16 = vld [vmem:[%s9121_s1 + $0x4c0] sm:$0xff] }
 0xe41   :  { %4679 = vmatpush.bf16.msrb.mxu1 %v7041_v2  ;;  %4721 = vmatpush.bf16.msra.mxu0 %v7065_v3 }
 0xe42   :  { %4693 = vmatpush.bf16.msrb.mxu2 %v7049_v23  ;;  %4707 = vmatpush.bf16.msrb.mxu3 %v7057_v44 }
 0xe60   :  { %v3598_v37 = vpop.f32.mrf.mxu1 }
 0xe61   :  { %v3640_v52 = vpop.f32.mrf.mxu0  ;;  %v3599_v18 = vadd.f32 %v3598_v37, %v3490_v15 }
 0xe62   :  { %v3641_v59 = vadd.f32 %v3640_v52, %v3493_v54 }
 0xe63   :  { %v3701_v11 = vmax.f32 %v3599_v18, 0.0 }
 0xe64   :  { %v3704_v46 = vmax.f32 %v3641_v59, 0.0 }
 0xe66   :  { %v3612_v27 = vpop.f32.mrf.mxu2 }
 0xe67   :  { %v3626_v56 = vpop.f32.mrf.mxu3  ;;  %v3613_v40 = vadd.f32 %v3612_v27, %v3491_v47 }
 0xe68   :  { %v3600_v61 = vpop.f32.mrf.mxu1  ;;  %v3627_v19 = vadd.f32 %v3626_v56, %v3492_v38 }
 0xe69   :  { %v3601_v62 = vadd.f32 %v3600_v61, %v3490_v15  ;;  %v3642_v35 = vpop.f32.mrf.mxu0  ;;  %v3702_v20 = vmax.f32 %v3613_v40, 0.0  ;;  %v8874_v61 = vld [vmem:[%s9125_s4 + $0x11] ss:$2 sm:$0xff] }
 0xe6a   :  { %v3643_v39 = vadd.f32 %v3642_v35, %v3493_v54  ;;  %v3703_v31 = vmax.f32 %v3627_v19, 0.0  ;;  %v3873_v2 = vperm.slane %v8874_v61, 1 }
 0xe6b   :  { %v3709_v30 = vmax.f32 %v3601_v62, 0.0 }
 0xe6c   :  { %v3712_v24 = vmax.f32 %v3643_v39, 0.0  ;;  %v3872_v39 = vperm.slane %v8874_v61, 0 }
 0xe6d   :  { %v8837_v51 = vpack.c.bf16 %v3709_v30, %v3701_v11  ;;  %v3875_v30 = vperm.slane %v8874_v61, 3 }
 0xe6e   :  { %v8845_v55 = vpack.c.bf16 %v3712_v24, %v3704_v46  ;;  %v3614_v29 = vpop.f32.mrf.mxu2 }
 0xe6f   :  { %v3615_v7 = vadd.f32 %v3614_v29, %v3491_v47  ;;  %v3628_v8 = vpop.f32.mrf.mxu3  ;;  %v3874_v29 = vperm.slane %v8874_v61, 2 }
 0xe70   :  { %v3629_v34 = vadd.f32 %v3628_v8, %v3492_v38  ;;  %v3654_v13 = vpop.f32.mrf.mxu1 }
 0xe71   :  { %v3710_v21 = vmax.f32 %v3615_v7, 0.0  ;;  %v3696_v22 = vpop.f32.mrf.mxu0  ;;  %v3655_v48 = vadd.f32 %v3654_v13, %v3494_v33 }
 0xe72   :  { %v3711_v5 = vmax.f32 %v3629_v34, 0.0  ;;  %v3697_v42 = vadd.f32 %v3696_v22, %v3497_v43  ;;  %v6960_v22 = vld [vmem:[%s9121_s1 + $0x580] sm:$0xff] }
 0xe73   :  { %v8853_v63 = vpack.c.bf16 %v3710_v21, %v3702_v20  ;;  %v3705_v15 = vmax.f32 %v3655_v48, 0.0  ;;  %v6935_v48 = vld [vmem:[%s9121_s1 + $0x4b8] sm:$0xff] }
 0xe74   :  { %v8856_v49 = vpack.c.bf16 %v3711_v5, %v3703_v31  ;;  %v3708_v25 = vmax.f32 %v3697_v42, 0.0 }
 0xe76   :  { %v3668_v45 = vpop.f32.mrf.mxu2 }
 0xe77   :  { %v3682_v26 = vpop.f32.mrf.mxu3  ;;  %v3669_v60 = vadd.f32 %v3668_v45, %v3495_v50 }
 0xe78   :  { %v3656_v17 = vpop.f32.mrf.mxu1  ;;  %v3683_v27 = vadd.f32 %v3682_v26, %v3496_v28 }
 0xe79   :  { %v3657_v37 = vadd.f32 %v3656_v17, %v3494_v33  ;;  %v3698_v52 = vpop.f32.mrf.mxu0  ;;  %v3706_v47 = vmax.f32 %v3669_v60, 0.0  ;;  %v6934_v60 = vld [vmem:[%s9121_s1 + $0x4b0] sm:$0xff] }
 0xe7a   :  { %v3699_v57 = vadd.f32 %v3698_v52, %v3497_v43  ;;  %v3707_v36 = vmax.f32 %v3683_v27, 0.0  ;;  %v6958_v27 = vld [vmem:[%s9121_s1 + $0x570] sm:$0xff] }
 0xe7b   :  { %v3713_v53 = vmax.f32 %v3657_v37, 0.0 }
 0xe7c   :  { %v3716_v54 = vmax.f32 %v3699_v57, 0.0 }
 0xe7d   :  { %v8867_v4 = vpack.c.bf16 %v3713_v53, %v3705_v15  ;;  %v3876_v15 = vperm.slane %v8874_v61, 4  ;;  %v6952_v53 = vld [vmem:[%s9121_s1 + $0x540] sm:$0xff] }
 0xe7e   :  { %v8869_v18 = vpack.c.bf16 %v3716_v54, %v3708_v25  ;;  %v3670_v56 = vpop.f32.mrf.mxu2  ;;  %v3879_v54 = vperm.slane %v8874_v61, 7 }
 0xe7f   :  { %v3671_v58 = vadd.f32 %v3670_v56, %v3495_v50  ;;  %v3684_v0 = vpop.f32.mrf.mxu3  ;;  %v6959_v50 = vld [vmem:[%s9121_s1 + $0x578] sm:$0xff] }
 0xe80   :  { %v3685_v59 = vadd.f32 %v3684_v0, %v3496_v28  ;;  %v3977_v10 = vpop.f32.mrf.mxu1  ;;  %v6944_v28 = vld [vmem:[%s9121_s1 + $0x500] sm:$0xff] }
 0xe81   :  { %v3714_v62 = vmax.f32 %v3671_v58, 0.0  ;;  %v4019_v35 = vpop.f32.mrf.mxu0  ;;  %v3978_v41 = vadd.f32 %v3977_v10, %v3872_v39  ;;  %v6943_v58 = vld [vmem:[%s9121_s1 + $0x4f8] sm:$0xff] }
 0xe82   :  { %v3715_v32 = vmax.f32 %v3685_v59, 0.0  ;;  %v4020_v24 = vadd.f32 %v4019_v35, %v3875_v30  ;;  %v6951_v10 = vld [vmem:[%s9121_s1 + $0x538] sm:$0xff]  ;;  %v6933_v35 = vld [vmem:[%s9121_s1 + $0x4a8] sm:$0xff] }
 0xe83   :  { %v8876_v38 = vpack.c.bf16 %v3714_v62, %v3706_v47  ;;  %v4080_v8 = vmax.f32 %v3978_v41, 0.0 }
 0xe84   :  { %v8879_v11 = vpack.c.bf16 %v3715_v32, %v3707_v36  ;;  %v4083_v13 = vmax.f32 %v4020_v24, 0.0  ;;  %v3877_v36 = vperm.slane %v8874_v61, 5 }
 0xe86   :  { %v3991_v6 = vpop.f32.mrf.mxu2 }
 0xe87   :  { %v4005_v46 = vpop.f32.mrf.mxu3  ;;  %v3992_v20 = vadd.f32 %v3991_v6, %v3873_v2  ;;  %v3878_v6 = vperm.slane %v8874_v61, 6  ;;  %v6932_v61 = vld [vmem:[%s9121_s1 + $0x4a0] sm:$0xff] }
 0xe88   :  { %v3979_v40 = vpop.f32.mrf.mxu1  ;;  %v4006_v31 = vadd.f32 %v4005_v46, %v3874_v29  ;;  %v6942_v46 = vld [vmem:[%s9121_s1 + $0x4f0] sm:$0xff] }
 0xe89   :  { %v3980_v3 = vadd.f32 %v3979_v40, %v3872_v39  ;;  %v4021_v19 = vpop.f32.mrf.mxu0  ;;  %v4081_v26 = vmax.f32 %v3992_v20, 0.0 }
 0xe8a   :  { %v4022_v7 = vadd.f32 %v4021_v19, %v3875_v30  ;;  %v4082_v37 = vmax.f32 %v4006_v31, 0.0  ;;  %v6957_v30 = vld [vmem:[%s9121_s1 + $0x568] sm:$0xff] }
 0xe8b   :  { %v4088_v34 = vmax.f32 %v3980_v3, 0.0 }
 0xe8c   :  { %v4091_v14 = vmax.f32 %v4022_v7, 0.0 }
 0xe8d   :  { %v4224_v21 = vpack.c.bf16 %v4088_v34, %v4080_v8  ;;  %v6956_v8 = vld [vmem:[%s9121_s1 + $0x560] sm:$0xff] }
 0xe8e   :  { %v4227_v5 = vpack.c.bf16 %v4091_v14, %v4083_v13  ;;  %v3993_v33 = vpop.f32.mrf.mxu2 }
 0xe8f   :  { %v3994_v43 = vadd.f32 %v3993_v33, %v3873_v2  ;;  %v4007_v23 = vpop.f32.mrf.mxu3  ;;  %4624 = vmatmul.bf16.vlgmr.msra.gmra.mxu1 %v4224_v21  ;;  %v6950_v2 = vld [vmem:[%s9121_s1 + $0x530] sm:$0xff] }
 0xe90   :  { %v4008_v44 = vadd.f32 %v4007_v23, %v3874_v29  ;;  %4666 = vmatmul.bf16.vlgmr.msrb.gmra.mxu0 %v4227_v5  ;;  %5112 = vmatpush.bf16.msra.mxu1 %v6936_v16  ;;  %v4033_v45 = vpop.f32.mrf.mxu1  ;;  %v6941_v16 = vld [vmem:[%s9121_s1 + $0x4e8] sm:$0xff]  ;;  %v6931_v5 = vld [vmem:[%s9121_s1 + $0x498] sm:$0xff] }
 0xe91   :  { %v4089_v42 = vmax.f32 %v3994_v43, 0.0  ;;  %5154 = vmatpush.bf16.msrb.mxu0 %v6960_v22  ;;  %v4075_v17 = vpop.f32.mrf.mxu0  ;;  %v4034_v0 = vadd.f32 %v4033_v45, %v3876_v15  ;;  %v6949_v22 = vld [vmem:[%s9121_s1 + $0x528] sm:$0xff]  ;;  %v6955_v23 = vld [vmem:[%s9121_s1 + $0x558] sm:$0xff] }
 0xe92   :  { %v4090_v52 = vmax.f32 %v4008_v44, 0.0  ;;  %v4076_v47 = vadd.f32 %v4075_v17, %v3879_v54 }
 0xe93   :  { %v4225_v57 = vpack.c.bf16 %v4089_v42, %v4081_v26  ;;  %v4084_v24 = vmax.f32 %v4034_v0, 0.0  ;;  %v6948_v42 = vld [vmem:[%s9121_s1 + $0x520] sm:$0xff]  ;;  %v6945_v0 = vld [vmem:[%s9121_s1 + $0x508] sm:$0xff] }
 0xe94   :  { %v4226_v25 = vpack.c.bf16 %v4090_v52, %v4082_v37  ;;  %5113 = vmatpush.bf16.msra.mxu1 %v6935_v48  ;;  %v4087_v3 = vmax.f32 %v4076_v47, 0.0  ;;  %v6940_v48 = vld [vmem:[%s9121_s1 + $0x4e0] sm:$0xff]  ;;  %v6954_v37 = vld [vmem:[%s9121_s1 + $0x550] sm:$0xff]  ;;  %v6939_v52 = vld [vmem:[%s9121_s1 + $0x4d8] sm:$0xff] }
 0xe95   :  { %5155 = vmatpush.bf16.msrb.mxu0 %v6959_v50  ;;  %4638 = vmatmul.bf16.vlgmr.msra.gmra.mxu2 %v4225_v57  ;;  %v6930_v50 = vld [vmem:[%s9121_s1 + $0x490] sm:$0xff]  ;;  %v6929_v57 = vld [vmem:[%s9121_s1 + $0x488] sm:$0xff] }
 0xe96   :  { %4652 = vmatmul.bf16.vlgmr.msra.gmra.mxu3 %v4226_v25  ;;  %5126 = vmatpush.bf16.msra.mxu2 %v6944_v28  ;;  %v4047_v56 = vpop.f32.mrf.mxu2  ;;  %v6947_v28 = vld [vmem:[%s9121_s1 + $0x518] sm:$0xff]  ;;  %v6992_v25 = vld [vmem:[%s9121_s1 + $0x680] sm:$0xff]  ;;  %v6966_v47 = vld [vmem:[%s9121_s1 + $0x5b0] sm:$0xff] }
 0xe97   :  { %5140 = vmatpush.bf16.msra.mxu3 %v6952_v53  ;;  %v4061_v59 = vpop.f32.mrf.mxu3  ;;  %v4048_v29 = vadd.f32 %v4047_v56, %v3877_v36  ;;  %v6968_v53 = vld [vmem:[%s9121_s1 + $0x5c0] sm:$0xff]  ;;  %v6991_v56 = vld [vmem:[%s9121_s1 + $0x678] sm:$0xff] }
 0xe98   :  { %5114 = vmatpush.bf16.msra.mxu1 %v6934_v60  ;;  %v4035_v62 = vpop.f32.mrf.mxu1  ;;  %v4062_v34 = vadd.f32 %v4061_v59, %v3878_v6  ;;  %v6946_v60 = vld [vmem:[%s9121_s1 + $0x510] sm:$0xff]  ;;  %v6976_v59 = vld [vmem:[%s9121_s1 + $0x600] sm:$0xff] }
 0xe99   :  { %5156 = vmatpush.bf16.msrb.mxu0 %v6958_v27  ;;  %v4036_v32 = vadd.f32 %v4035_v62, %v3876_v15  ;;  %v4077_v39 = vpop.f32.mrf.mxu0  ;;  %v4085_v33 = vmax.f32 %v4048_v29, 0.0  ;;  %v6953_v15 = vld [vmem:[%s9121_s1 + $0x548] sm:$0xff]  ;;  %v6967_v27 = vld [vmem:[%s9121_s1 + $0x5b8] sm:$0xff] }
 0xe9a   :  { %v4078_v41 = vadd.f32 %v4077_v39, %v3879_v54  ;;  %5127 = vmatpush.bf16.msra.mxu2 %v6943_v58  ;;  %v4086_v44 = vmax.f32 %v4062_v34, 0.0  ;;  %v6938_v54 = vld [vmem:[%s9121_s1 + $0x4d0] sm:$0xff]  ;;  %v6937_v58 = vld [vmem:[%s9121_s1 + $0x4c8] sm:$0xff]  ;;  %v6983_v62 = vld [vmem:[%s9121_s1 + $0x638] sm:$0xff] }
 0xe9b   :  { %v4092_v40 = vmax.f32 %v4036_v32, 0.0  ;;  %5141 = vmatpush.bf16.msra.mxu3 %v6951_v10  ;;  %v6984_v10 = vld [vmem:[%s9121_s1 + $0x640] sm:$0xff]  ;;  %v6974_v32 = vld [vmem:[%s9121_s1 + $0x5f0] sm:$0xff]  ;;  %v6961_v29 = vld [vmem:[%s9121_s1 + $0x588] sm:$0xff] }
 0xe9c   :  { %v4095_v19 = vmax.f32 %v4078_v41, 0.0  ;;  %5115 = vmatpush.bf16.msra.mxu1 %v6933_v35  ;;  %v6965_v35 = vld [vmem:[%s9121_s1 + $0x5a8] sm:$0xff]  ;;  %v6964_v39 = vld [vmem:[%s9121_s1 + $0x5a0] sm:$0xff]  ;;  %v6963_v41 = vld [vmem:[%s9121_s1 + $0x598] sm:$0xff] }
 0xe9d   :  { %v4228_v7 = vpack.c.bf16 %v4092_v40, %v4084_v24  ;;  %5157 = vmatpush.bf16.msrb.mxu0 %v6957_v30  ;;  %v6973_v30 = vld [vmem:[%s9121_s1 + $0x5e8] sm:$0xff]  ;;  %v6972_v24 = vld [vmem:[%s9121_s1 + $0x5e0] sm:$0xff]  ;;  %v6978_v34 = vld [vmem:[%s9121_s1 + $0x610] sm:$0xff] }
 0xe9e   :  { %v4231_v13 = vpack.c.bf16 %v4095_v19, %v4087_v3  ;;  %5128 = vmatpush.bf16.msra.mxu2 %v6942_v46  ;;  %v4049_v14 = vpop.f32.mrf.mxu2  ;;  %v6987_v46 = vld [vmem:[%s9121_s1 + $0x658] sm:$0xff]  ;;  %v6980_v40 = vld [vmem:[%s9121_s1 + $0x620] sm:$0xff]  ;;  %v6986_v3 = vld [vmem:[%s9121_s1 + $0x650] sm:$0xff] }
 0xe9f   :  { %5142 = vmatpush.bf16.msra.mxu3 %v6950_v2  ;;  %v4050_v20 = vadd.f32 %v4049_v14, %v3877_v36  ;;  %v4063_v21 = vpop.f32.mrf.mxu3  ;;  %4680 = vmatmul.bf16.vlgmr.msrb.gmra.mxu1 %v4228_v7  ;;  %v6989_v36 = vld [vmem:[%s9121_s1 + $0x668] sm:$0xff]  ;;  %v6962_v2 = vld [vmem:[%s9121_s1 + $0x590] sm:$0xff]  ;;  %v6971_v19 = vld [vmem:[%s9121_s1 + $0x5d8] sm:$0xff] }
 0xea0   :  { %v4064_v31 = vadd.f32 %v4063_v21, %v3878_v6  ;;  %4722 = vmatmul.bf16.vlgmr.msra.gmra.mxu0 %v4231_v13  ;;  %5116 = vmatpush.bf16.msra.mxu1 %v6932_v61  ;;  %v6981_v6 = vld [vmem:[%s9121_s1 + $0x628] sm:$0xff]  ;;  %v6979_v61 = vld [vmem:[%s9121_s1 + $0x618] sm:$0xff] }
 0xea1   :  { %v4093_v43 = vmax.f32 %v4050_v20, 0.0  ;;  %5158 = vmatpush.bf16.msrb.mxu0 %v6956_v8  ;;  %v6985_v7 = vld [vmem:[%s9121_s1 + $0x648] sm:$0xff]  ;;  %v6970_v8 = vld [vmem:[%s9121_s1 + $0x5d0] sm:$0xff] }
 0xea2   :  { %v4094_v45 = vmax.f32 %v4064_v31, 0.0  ;;  %5129 = vmatpush.bf16.msra.mxu2 %v6941_v16  ;;  %v6969_v13 = vld [vmem:[%s9121_s1 + $0x5c8] sm:$0xff] }
 0xea3   :  { %v4229_v26 = vpack.c.bf16 %v4093_v43, %v4085_v33  ;;  %5143 = vmatpush.bf16.msra.mxu3 %v6949_v22  ;;  %v6977_v14 = vld [vmem:[%s9121_s1 + $0x608] sm:$0xff] }
 0xea4   :  { %v4230_v17 = vpack.c.bf16 %v4094_v45, %v4086_v44  ;;  %5117 = vmatpush.bf16.msra.mxu1 %v6931_v5 }
 0xea5   :  { %5159 = vmatpush.bf16.msrb.mxu0 %v6955_v23  ;;  %4694 = vmatmul.bf16.vlgmr.msrb.gmra.mxu2 %v4229_v26 }
 0xea6   :  { %4708 = vmatmul.bf16.vlgmr.msrb.gmra.mxu3 %v4230_v17  ;;  %5130 = vmatpush.bf16.msra.mxu2 %v6940_v48 }
 0xea7   :  { %5144 = vmatpush.bf16.msra.mxu3 %v6948_v42 }
 0xea8   :  { %5118 = vmatpush.bf16.msra.mxu1 %v6930_v50 }
 0xea9   :  { %5160 = vmatpush.bf16.msrb.mxu0 %v6954_v37 }
 0xeaa   :  { %5131 = vmatpush.bf16.msra.mxu2 %v6939_v52 }
 0xeab   :  { %5145 = vmatpush.bf16.msra.mxu3 %v6947_v28 }
 0xeac   :  { %5119 = vmatpush.bf16.msra.mxu1 %v6929_v57 }
 0xead   :  { %5161 = vmatpush.bf16.msrb.mxu0 %v6953_v15 }
 0xeae   :  { %5132 = vmatpush.bf16.msra.mxu2 %v6938_v54 }
 0xeaf   :  { %5146 = vmatpush.bf16.msra.mxu3 %v6946_v60  ;;  %5120 = vmatmul.bf16.vlgmr.msra.gmra.mxu1 %v8837_v51  ;;  %v6990_v51 = vld [vmem:[%s9121_s1 + $0x670] sm:$0xff] }
 0xeb0   :  { %5168 = vmatpush.bf16.msrb.mxu1 %v6968_v53  ;;  %5162 = vmatmul.bf16.vlgmr.msrb.gmra.mxu0 %v8845_v55  ;;  %v6975_v55 = vld [vmem:[%s9121_s1 + $0x5f8] sm:$0xff] }
 0xeb1   :  { %5210 = vmatpush.bf16.msra.mxu0 %v6992_v25 }
 0xeb2   :  { %5133 = vmatpush.bf16.msra.mxu2 %v6937_v58 }
 0xeb3   :  { %5147 = vmatpush.bf16.msra.mxu3 %v6945_v0 }
 0xeb4   :  { %5169 = vmatpush.bf16.msrb.mxu1 %v6967_v27 }
 0xeb5   :  { %5211 = vmatpush.bf16.msra.mxu0 %v6991_v56  ;;  %5134 = vmatmul.bf16.vlgmr.msra.gmra.mxu2 %v8853_v63  ;;  %v6982_v63 = vld [vmem:[%s9121_s1 + $0x630] sm:$0xff] }
 0xeb6   :  { %5182 = vmatpush.bf16.msrb.mxu2 %v6976_v59  ;;  %5148 = vmatmul.bf16.vlgmr.msra.gmra.mxu3 %v8856_v49  ;;  %v6988_v49 = vld [vmem:[%s9121_s1 + $0x660] sm:$0xff] }
 0xeb7   :  { %5196 = vmatpush.bf16.msrb.mxu3 %v6984_v10 }
 0xeb8   :  { %5170 = vmatpush.bf16.msrb.mxu1 %v6966_v47 }
 0xeb9   :  { %5212 = vmatpush.bf16.msra.mxu0 %v6990_v51 }
 0xeba   :  { %5183 = vmatpush.bf16.msrb.mxu2 %v6975_v55 }
 0xebb   :  { %5197 = vmatpush.bf16.msrb.mxu3 %v6983_v62 }
 0xebc   :  { %5171 = vmatpush.bf16.msrb.mxu1 %v6965_v35 }
 0xebd   :  { %5213 = vmatpush.bf16.msra.mxu0 %v6989_v36 }
 0xebe   :  { %5184 = vmatpush.bf16.msrb.mxu2 %v6974_v32 }
 0xebf   :  { %5198 = vmatpush.bf16.msrb.mxu3 %v6982_v63 }
 0xec0   :  { %5172 = vmatpush.bf16.msrb.mxu1 %v6964_v39 }
 0xec1   :  { %5214 = vmatpush.bf16.msra.mxu0 %v6988_v49 }
 0xec2   :  { %5185 = vmatpush.bf16.msrb.mxu2 %v6973_v30 }
 0xec3   :  { %5199 = vmatpush.bf16.msrb.mxu3 %v6981_v6 }
 0xec4   :  { %5173 = vmatpush.bf16.msrb.mxu1 %v6963_v41 }
 0xec5   :  { %5215 = vmatpush.bf16.msra.mxu0 %v6987_v46 }
 0xec6   :  { %5186 = vmatpush.bf16.msrb.mxu2 %v6972_v24 }
 0xec7   :  { %5200 = vmatpush.bf16.msrb.mxu3 %v6980_v40 }
 0xec8   :  { %5174 = vmatpush.bf16.msrb.mxu1 %v6962_v2 }
 0xec9   :  { %5216 = vmatpush.bf16.msra.mxu0 %v6986_v3  ;;  %v7126_v3 = vld [vmem:[%s9123_s3 + $0x20] ss:$0 sm:$0xff] }
 0xeca   :  { %5187 = vmatpush.bf16.msrb.mxu2 %v6971_v19 }
 0xecb   :  { %5201 = vmatpush.bf16.msrb.mxu3 %v6979_v61 }
 0xecc   :  { %5175 = vmatpush.bf16.msrb.mxu1 %v6961_v29 }
 0xecd   :  { %5217 = vmatpush.bf16.msra.mxu0 %v6985_v7 }
 0xece   :  { %5188 = vmatpush.bf16.msrb.mxu2 %v6970_v8 }
 0xecf   :  { %5202 = vmatpush.bf16.msrb.mxu3 %v6978_v34  ;;  %5176 = vmatmul.bf16.vlgmr.msrb.gmra.mxu1 %v8867_v4 }
 0xed0   :  { %5218 = vmatmul.bf16.vlgmr.msra.gmra.mxu0 %v8869_v18 }
 0xed2   :  { %5189 = vmatpush.bf16.msrb.mxu2 %v6969_v13 }
 0xed3   :  { %5203 = vmatpush.bf16.msrb.mxu3 %v6977_v14 }
 0xed5   :  { %5190 = vmatmul.bf16.vlgmr.msrb.gmra.mxu2 %v8876_v38 }
 0xed6   :  { %5204 = vmatmul.bf16.vlgmr.msrb.gmra.mxu3 %v8879_v11 }
 0xf0c   :  { %v4625_v16 = vpop.f32.mrf.mxu1 }
 0xf0d   :  { %v4667_v22 = vpop.f32.mrf.mxu0 }
 0xf14   :  { %v4627_v31 = vpop.f32.mrf.mxu1 }
 0xf15   :  { %v4669_v4 = vpop.f32.mrf.mxu0 }
 0xf18   :  { %v4639_v20 = vpop.f32.mrf.mxu2 }
 0xf19   :  { %v4653_v21 = vpop.f32.mrf.mxu3  ;;  %v4640_v23 = vadd.f32 %v4639_v20, %v4625_v16 }
 0xf1b   :  { %v4654_v18 = vadd.f32 %v4653_v21, %v4640_v23 }
 0xf1c   :  { %v4681_v43 = vpop.f32.mrf.mxu1 }
 0xf1d   :  { %v4723_v48 = vpop.f32.mrf.mxu0  ;;  %v4668_v42 = vadd.f32 %v4667_v22, %v4654_v18 }
 0xf1f   :  { %v4682_v50 = vadd.f32 %v4681_v43, %v4668_v42 }
 0xf20   :  { %v4641_v5 = vpop.f32.mrf.mxu2 }
 0xf21   :  { %v4655_v33 = vpop.f32.mrf.mxu3  ;;  %v4642_v17 = vadd.f32 %v4641_v5, %v4627_v31 }
 0xf23   :  { %v4656_v11 = vadd.f32 %v4655_v33, %v4642_v17 }
 0xf24   :  { %v4683_v26 = vpop.f32.mrf.mxu1 }
 0xf25   :  { %v4725_v52 = vpop.f32.mrf.mxu0  ;;  %v4670_v15 = vadd.f32 %v4669_v4, %v4656_v11 }
 0xf27   :  { %v4684_v25 = vadd.f32 %v4683_v26, %v4670_v15 }
 0xf28   :  { %v4695_v44 = vpop.f32.mrf.mxu2 }
 0xf29   :  { %v4709_v45 = vpop.f32.mrf.mxu3  ;;  %v4696_v28 = vadd.f32 %v4695_v44, %v4682_v50 }
 0xf2b   :  { %v4710_v53 = vadd.f32 %v4709_v45, %v4696_v28 }
 0xf2c   :  { %v5121_v57 = vpop.f32.mrf.mxu1 }
 0xf2d   :  { %v4724_v60 = vadd.f32 %v4723_v48, %v4710_v53  ;;  %v5163_v58 = vpop.f32.mrf.mxu0 }
 0xf2f   :  { %v5122_v59 = vadd.f32 %v5121_v57, %v4724_v60 }
 0xf30   :  { %v4697_v38 = vpop.f32.mrf.mxu2 }
 0xf31   :  { %v4711_v37 = vpop.f32.mrf.mxu3  ;;  %v4698_v27 = vadd.f32 %v4697_v38, %v4684_v25 }
 0xf33   :  { %v4712_v10 = vadd.f32 %v4711_v37, %v4698_v27 }
 0xf34   :  { %v5123_v0 = vpop.f32.mrf.mxu1 }
 0xf35   :  { %v4726_v51 = vadd.f32 %v4725_v52, %v4712_v10  ;;  %v5165_v36 = vpop.f32.mrf.mxu0 }
 0xf37   :  { %v5124_v63 = vadd.f32 %v5123_v0, %v4726_v51  ;;  %v7129_v51 = vld [vmem:[%s9123_s3 + $0x23] ss:$0 sm:$0xff] }
 0xf38   :  { %v5135_v54 = vpop.f32.mrf.mxu2 }
 0xf39   :  { %v5149_v56 = vpop.f32.mrf.mxu3  ;;  %v5136_v47 = vadd.f32 %v5135_v54, %v5122_v59  ;;  %v7128_v59 = vld [vmem:[%s9123_s3 + $0x22] ss:$0 sm:$0xff] }
 0xf3b   :  { %v5150_v62 = vadd.f32 %v5149_v56, %v5136_v47  ;;  %v7127_v56 = vld [vmem:[%s9123_s3 + $0x21] ss:$0 sm:$0xff] }
 0xf3d   :  { %v5164_v49 = vadd.f32 %v5163_v58, %v5150_v62 }
 0xf40   :  { %v5137_v55 = vpop.f32.mrf.mxu2 }
 0xf41   :  { %v5151_v35 = vpop.f32.mrf.mxu3  ;;  %v5138_v39 = vadd.f32 %v5137_v55, %v5124_v63 }
 0xf43   :  { %v5152_v41 = vadd.f32 %v5151_v35, %v5138_v39 }
 0xf45   :  { %v5166_v61 = vadd.f32 %v5165_v36, %v5152_v41 }
 0xf4c   :  { %v5177_v32 = vpop.f32.mrf.mxu1 }
 0xf4d   :  { %v5178_v30 = vadd.f32 %v5177_v32, %v5164_v49  ;;  %v5219_v40 = vpop.f32.mrf.mxu0 }
 0xf54   :  { %v5179_v19 = vpop.f32.mrf.mxu1 }
 0xf55   :  { %v5180_v7 = vadd.f32 %v5179_v19, %v5166_v61  ;;  %v5221_v22 = vpop.f32.mrf.mxu0 }
 0xf58   :  { %v5191_v6 = vpop.f32.mrf.mxu2 }
 0xf59   :  { %v5192_v46 = vadd.f32 %v5191_v6, %v5178_v30  ;;  %v5205_v24 = vpop.f32.mrf.mxu3 }
 0xf5b   :  { %v5206_v2 = vadd.f32 %v5205_v24, %v5192_v46  ;;  %v7130_v46 = vld [vmem:[%s9123_s3 + $0x24] ss:$0 sm:$0xff] }
 0xf5d   :  { %v5220_v29 = vadd.f32 %v5219_v40, %v5206_v2 }
 0xf5f   :  { %v5226_v8 = vadd.f32 %v7126_v3, %v5220_v29 }
 0xf60   :  { %v5193_v34 = vpop.f32.mrf.mxu2 }
 0xf61   :  { %v5194_v13 = vadd.f32 %v5193_v34, %v5180_v7  ;;  %v5228_v14 = vadd.f32 %v5226_v8, %v8533_v1  ;;  %v5207_v16 = vpop.f32.mrf.mxu3 }
 0xf63   :  { %v5208_v20 = vadd.f32 %v5207_v16, %v5194_v13  ;;  %v5232_v21 = vsel %vm82_vm2, %v5228_v14, 0.0 }
 0xf64   :  { %5233 = vadd.xlane.f32.xlu2 %v5232_v21 }
 0xf65   :  { %v5222_v31 = vadd.f32 %v5221_v22, %v5208_v20 }
 0xf67   :  { %v5227_v5 = vadd.f32 %v7126_v3, %v5222_v31 }
 0xf69   :  { %v5229_v33 = vadd.f32 %v5227_v5, %v8535_v12 }
 0xf6b   :  { %v5235_v4 = vsel %vm82_vm2, %v5229_v33, 0.0 }
 0xf6c   :  { %5236 = vadd.xlane.f32.xlu1 %v5235_v4 }
 0xfd7   :  { %v5234_v43 = vpop.xlane.xlu2 %5233 }
 0xfd8   :  { %v5238_v23 = vmul.f32 %v5234_v43, %v7468_v9 }
 0xfda   :  { %v5240_v44 = vsub.f32 %v5228_v14, %v5238_v23 }
 0xfdc   :  { %v5242_v45 = vmul.f32 %v5240_v44, %v5240_v44 }
 0xfde   :  { %v5244_v1 = vsel %vm82_vm2, %v5242_v45, 0.0 }
 0xfdf   :  { %v5237_v48 = vpop.xlane.xlu1 %5236  ;;  %5245 = vadd.xlane.f32.xlu0 %v5244_v1 }
 0xfe0   :  { %v5239_v18 = vmul.f32 %v5237_v48, %v7468_v9 }
 0xfe2   :  { %v5241_v26 = vsub.f32 %v5229_v33, %v5239_v18 }
 0xfe4   :  { %v5243_v42 = vmul.f32 %v5241_v26, %v5241_v26 }
 0xfe6   :  { %v5247_v17 = vsel %vm82_vm2, %v5243_v42, 0.0 }
 0xfe7   :  { %5248 = vadd.xlane.f32.xlu2 %v5247_v17 }
0x1052   :  { %v5246_v12 = vpop.xlane.xlu0 %5245 }
0x1053   :  { %v5250_v38 = vmul.f32 %v5246_v12, %v7468_v9 }
0x1055   :  { %v5252_v50 = vadd.f32 1e-05, %v5250_v38 }
0x1057   :  { %7209 = vrsqrt.f32 %v5252_v50  ;;  %vm5260_vm1 = vweird.f32 %v5252_v50 }
0x105a   :  { %v5249_v11 = vpop.xlane.xlu2 %5248 }
0x105b   :  { %v5251_v37 = vmul.f32 %v5249_v11, %v7468_v9 }
0x105d   :  { %v7210_v52 = vpop.eup %7209  ;;  %v5253_v28 = vadd.f32 1e-05, %v5251_v37 }
0x105e   :  { %v5255_v57 = vmul.f32 %v7210_v52, %v5252_v50  ;;  %vm5261_vm0 = vweird.f32 %v7210_v52 }
0x105f   :  { %7211 = vrsqrt.f32 %v5253_v28  ;;  %vm5262_vm5 = vmor %vm5260_vm1, %vm5261_vm0  ;;  %vm5270_vm7 = vweird.f32 %v5253_v28 }
0x1060   :  { %v5256_v15 = vmul.f32 %v7210_v52, %v5255_v57 }
0x1062   :  { %v5257_v53 = vmul.f32 0.5, %v5256_v15 }
0x1064   :  { %v5258_v25 = vsub.f32 1.5, %v5257_v53 }
0x1065   :  { %v7212_v54 = vpop.eup %7211 }
0x1066   :  { %v5259_v60 = vmul.f32 %v7210_v52, %v5258_v25  ;;  %v5265_v27 = vmul.f32 %v7212_v54, %v5253_v28  ;;  %vm5271_vm6 = vweird.f32 %v7212_v54 }
0x1067   :  { %vm5272_vm8 = vmor %vm5270_vm7, %vm5271_vm6 }
0x1068   :  { %v5263_v58 = vsel %vm5262_vm5, %v7210_v52, %v5259_v60  ;;  %v5266_v0 = vmul.f32 %v7212_v54, %v5265_v27 }
0x1069   :  { %v5274_v9 = vmul.f32 %v5263_v58, %v5240_v44 }
0x106a   :  { %v5267_v10 = vmul.f32 0.5, %v5266_v0 }
0x106b   :  { %v5277_v47 = vmul.f32 %v7127_v56, %v5274_v9 }
0x106c   :  { %v5268_v55 = vsub.f32 1.5, %v5267_v10 }
0x106d   :  { %v5280_v62 = vadd.f32 %v7128_v59, %v5277_v47 }
0x106e   :  { %v5269_v35 = vmul.f32 %v7212_v54, %v5268_v55 }
0x106f   :  { %v5284_v36 = vmul.f32 %v7129_v51, %v5280_v62 }
0x1070   :  { %v5273_v32 = vsel %vm5272_vm8, %v7212_v54, %v5269_v35 }
0x1071   :  { %v5286_v63 = vsel %vm82_vm2, %v5284_v36, 0.0  ;;  %v5275_v39 = vmul.f32 %v5273_v32, %v5241_v26 }
0x1072   :  { %5287 = vadd.xlane.f32.xlu1 %v5286_v63 }
0x1073   :  { %v5278_v49 = vmul.f32 %v7127_v56, %v5275_v39 }
0x1075   :  { %v5281_v30 = vadd.f32 %v7128_v59, %v5278_v49 }
0x1077   :  { %v5285_v6 = vmul.f32 %v7129_v51, %v5281_v30 }
0x1079   :  { %v5289_v41 = vsel %vm82_vm2, %v5285_v6, 0.0 }
0x107a   :  { %5290 = vadd.xlane.f32.xlu0 %v5289_v41 }
0x10e5   :  { %v5288_v24 = vpop.xlane.xlu1 %5287 }
0x10e6   :  { %v5294_v40 = vadd.f32 %v7130_v46, %v5288_v24 }
0x10e8   :  { %v5296_v2 = vmul.f32 1.442695, %v5294_v40 }
0x10ea   :  { %7213 = vpow2.f32 %v5296_v2 }
0x10ed   :  { %v5291_v3 = vpop.xlane.xlu0 %5290 }
0x10ee   :  { %v5295_v19 = vadd.f32 %v7130_v46, %v5291_v3 }
0x10f0   :  { %v7214_v61 = vpop.eup %7213  ;;  %v5298_v29 = vmul.f32 1.442695, %v5295_v19 }
0x10f1   :  { %5301 = vst.msk [vmem:[%s9126_s5] sm:$0xff] %vm5300_vm9, %v7214_v61 }
0x10f2   :  { %7215 = vpow2.f32 %v5298_v29 }
0x10f8   :  { %v7216_v7 = vpop.eup %7215 }
0x10f9   :  { %5302 = vst.msk [vmem:[%s9126_s5 + $0x8] sm:$0xff] %vm5300_vm9, %v7216_v7 }

</bundles_post_ra>
